<compile_context>
chip_gen: v7x
topology: tpu7x:2x2x1
jax: 0.10.0
libtpu: 0.0.40
codegen_flags: <defaults>
</compile_context>

<pallas_src>
import jax
import jax.numpy as jnp
from jax.experimental import pallas as pl
from jax.experimental.pallas import tpu as pltpu


def _round_up(x, m):
    return ((x + m - 1) // m) * m


def _make_resblock_kernel(H, W, C, K, Wp, io_dtype):
    """Fused conv1 -> bias -> ReLU -> conv2(res_scale folded) -> + x, one image per step."""
    P = K // 2
    Hp = H + 2 * P
    taps = [(i, j) for i in range(K) for j in range(K)]          # tap idx = i*K + j

    def conv_wide(pad_ref, w_ref, b_ref):
        # ONE MXU matmul per conv: (Hp*Wp, C) @ (C, K*K*C); all taps live in the lane dim.
        # Both reshapes are tile-exact (Wp % 8 == 0) -> free re-views, no strided copies.
        t = jnp.dot(pad_ref[...].reshape(Hp * Wp, C), w_ref[...],
                    preferred_element_type=jnp.float32)
        t = t.reshape(Hp, Wp, K * K * C)
        # Combine taps with shifted-window adds (XLU + VPU; MXU-idle slots).  Seed with
        # "first tap + bias": no zero-init pass, no VMEM accumulator RMW, chained f32
        # values keep the MXU issuing back-to-back (v7x MRB accumulate path).
        acc = t[0:H, 0:W, 0:C] + b_ref[...]
        for idx in range(1, K * K):
            i, j = taps[idx]
            c0 = idx * C
            acc = acc + t[i:i + H, j:j + W, c0:c0 + C]
        return acc                                               # (H, W, C) float32

    def kernel(x_ref, w1_ref, b1_ref, w2_ref, b2_ref, out_ref, pad_ref):
        # Zero only the halo strips (perimeter + alignment columns); the interior is
        # fully overwritten below.  Re-done per grid step so the batch axis can stay
        # "parallel" (megacore-safe), but it is only the thin border.
        if P > 0:
            pad_ref[0:P, :, :] = jnp.zeros((P, Wp, C), io_dtype)
            pad_ref[P + H:Hp, :, :] = jnp.zeros((P, Wp, C), io_dtype)
            pad_ref[P:P + H, 0:P, :] = jnp.zeros((H, P, C), io_dtype)
        if Wp - (P + W) > 0:
            pad_ref[P:P + H, P + W:Wp, :] = jnp.zeros((H, Wp - P - W, C), io_dtype)

        # ---- conv1 + bias + ReLU (input cast happens here, not as a wrapper XLA op) ----
        pad_ref[P:P + H, P:P + W, :] = x_ref[...].astype(io_dtype)
        h = jnp.maximum(conv_wide(pad_ref, w1_ref, b1_ref), 0.0)

        # ---- conv2 (res_scale pre-folded into w2/b2); halo still zero, reuse pad_ref ----
        pad_ref[P:P + H, P:P + W, :] = h.astype(io_dtype)
        res = conv_wide(pad_ref, w2_ref, b2_ref)

        # ---- epilogue: re-read x for the skip (not kept live across both convs) --------
        out_ref[...] = (res + x_ref[...].astype(jnp.float32)).astype(out_ref.dtype)

    return kernel


def resblock_forward_nhwc(x_nhwc, params, *, io_dtype=None):
    """Core entry point: NHWC in / NHWC out (no transposes, no wrapper-side pad/cast)."""
    N, H, W, C = x_nhwc.shape
    K = int(params["kernel_size"])
    P = K // 2
    Hp = H + 2 * P
    Wp = _round_up(W + 2 * P, 8)      # sublane-aligned so the in-kernel reshapes are free

    if io_dtype is None:
        # MXU input dtype for activations/weights. Default: keep the input dtype (no extra
        # HBM cast pass). On v6e/v7x pass io_dtype=jnp.bfloat16 to halve scratch VMEM and
        # DMA bytes; keep f32 on v5e.
        io_dtype = x_nhwc.dtype

    w1 = params["w1_wide"].astype(io_dtype)      # (C, K*K*C)
    w2 = params["w2_wide"].astype(io_dtype)      # (C, K*K*C), res_scale folded in
    b1 = params["b1"].astype(jnp.float32)        # (1, 1, C)
    b2 = params["b2"].astype(jnp.float32)        # (1, 1, C), res_scale folded in

    kernel = _make_resblock_kernel(H, W, C, K, Wp, io_dtype)

    io_item = jnp.dtype(io_dtype).itemsize
    x_item = jnp.dtype(x_nhwc.dtype).itemsize

    flops = 2 * (2 * K * K * H * W * C * C) * N                     # two dense KxK convs
    bytes_accessed = (2 * N * H * W * C) * x_item \
        + (int(w1.size) + int(w2.size)) * io_item + (int(b1.size) + int(b2.size)) * 4

    # Explicit VMEM budget: padded scratch + double-buffered in/out blocks + weights
    # + headroom for the wide f32 intermediates (t / acc) that may spill to VMEM.
    pad_bytes = Hp * Wp * C * io_item
    blk_bytes = H * W * C * x_item
    w_bytes = (int(w1.size) + int(w2.size)) * io_item
    spill_bytes = (Hp * Wp * K * K * C + 2 * H * W * C) * 4
    vmem_needed = pad_bytes + 4 * blk_bytes + 2 * w_bytes + spill_bytes + (1 << 20)
    vmem_limit = int(min(64 << 20, max(2 * vmem_needed, 32 << 20)))

    # TODO(synk): for production H,W,C (esp. v7x's 64 MiB VMEM) add row-strip tiling with
    # a 2P-row halo as a second "parallel" grid axis (keeps both v7x TCs busy at small N)
    # and a >=128-wide Cout tile; full-image blocks are fine at these test sizes.  If the
    # constant-index weight blocks show up double-buffered at production sizes, mark them
    # pipeline_mode=pl.Buffered(1).
    out = pl.pallas_call(
        kernel,
        out_shape=jax.ShapeDtypeStruct((N, H, W, C), x_nhwc.dtype),
        grid_spec=pltpu.PrefetchScalarGridSpec(
            num_scalar_prefetch=0,
            grid=(N,),
            in_specs=[
                pl.BlockSpec((pl.Squeezed(), H, W, C), lambda n: (n, 0, 0, 0)),
                pl.BlockSpec((C, K * K * C), lambda n: (0, 0)),
                pl.BlockSpec((1, 1, C), lambda n: (0, 0, 0)),
                pl.BlockSpec((C, K * K * C), lambda n: (0, 0)),
                pl.BlockSpec((1, 1, C), lambda n: (0, 0, 0)),
            ],
            out_specs=pl.BlockSpec((pl.Squeezed(), H, W, C),
                                   lambda n: (n, 0, 0, 0)),
            scratch_shapes=[
                # Zero-halo padded buffer, reused by both convs (halo zeroed once/step).
                pltpu.VMEM((Hp, Wp, C), io_dtype),
            ],
        ),
        compiler_params=pltpu.CompilerParams(
            dimension_semantics=("parallel",),        # v7x: shard batch over the 2 TCs
            vmem_limit_bytes=vmem_limit),
        cost_estimate=pl.CostEstimate(flops=flops, transcendentals=0,
                                      bytes_accessed=bytes_accessed),
    )(x_nhwc, w1, b1, w2, b2)
    return out


def resblock_forward(x_nchw, params, *, io_dtype=None):
    """PyTorch-parity wrapper: NCHW in/out (keep the surrounding model NHWC to skip these)."""
    x_nhwc = jnp.transpose(x_nchw, (0, 2, 3, 1))
    out = resblock_forward_nhwc(x_nhwc, params, io_dtype=io_dtype)
    return jnp.transpose(out, (0, 3, 1, 2))


def init_params(key, n_feats, kernel_size, *, bias=True, res_scale=1.0):
    """Deterministic synthetic parameters matching the module's __init__ shapes."""
    K = kernel_size
    k1, k2, k3, k4 = jax.random.split(key, 4)
    w1 = 0.1 * jax.random.normal(k1, (n_feats, n_feats, K, K), jnp.float32)   # (O,I,Kh,Kw)
    w2 = 0.1 * jax.random.normal(k2, (n_feats, n_feats, K, K), jnp.float32)
    if bias:
        b1 = 0.1 * jax.random.normal(k3, (n_feats,), jnp.float32)
        b2 = 0.1 * jax.random.normal(k4, (n_feats,), jnp.float32)
    else:
        b1 = jnp.zeros((n_feats,), jnp.float32)
        b2 = jnp.zeros((n_feats,), jnp.float32)

    def to_wide(w_oihw):
        # (Cout, Cin, Kh, Kw) -> (Cin, Kh, Kw, Cout) -> (Cin, K*K*Cout)
        # column index = (i*K + j) * Cout + co  (matches the kernel's tap packing)
        return jnp.transpose(w_oihw, (1, 2, 3, 0)).reshape(n_feats, K * K * n_feats)

    return dict(
        kernel_size=K,
        res_scale=float(res_scale),
        w1_oihw=w1, w2_oihw=w2, b1_vec=b1, b2_vec=b2,           # for the reference
        w1_wide=to_wide(w1),
        w2_wide=to_wide(w2) * res_scale,                         # fold res_scale into conv2
        b1=b1.reshape(1, 1, n_feats),
        b2=(b2 * res_scale).reshape(1, 1, n_feats),
    )


def reference_forward(x_nchw, params):
    """Pure-JAX reference (lax convs in NCHW, exactly the PyTorch ResBlock math)."""
    K = int(params["kernel_size"])
    P = K // 2

    def conv(x, w, b):
        y = jax.lax.conv_general_dilated(
            x, w, window_strides=(1, 1), padding=((P, P), (P, P)),
            dimension_numbers=("NCHW", "OIHW", "NCHW"),
            precision=jax.lax.Precision.HIGHEST)
        return y + b.reshape(1, -1, 1, 1)

    h = jnp.maximum(conv(x_nchw, params["w1_oihw"], params["b1_vec"]), 0.0)
    res = conv(h, params["w2_oihw"], params["b2_vec"]) * params["res_scale"]
    return res + x_nchw


if __name__ == "__main__":
    N, C, H, W = 2, 4, 16, 16
    kernel_size = 3

    key = jax.random.PRNGKey(0)
    key_x, key_p = jax.random.split(key)
    x = jax.random.normal(key_x, (N, C, H, W), jnp.float32)
    params = init_params(key_p, C, kernel_size, bias=True, res_scale=0.1)

    out = jax.block_until_ready(resblock_forward(x, params))
    ref = jax.block_until_ready(reference_forward(x, params))

    assert out.shape == (N, C, H, W)
    assert jnp.allclose(out, ref, atol=2e-3, rtol=2e-3), "mismatch vs reference"
    print("KERNEL_OK")
</pallas_src>

<mosaic_0001>
module attributes {stable_mosaic.version = 11 : i64} {
  func.func @kernel(%arg0: i32, %arg1: memref<1x16x16x4xf32, #tpu.memory_space<vmem>>, %arg2: memref<4x36xf32, #tpu.memory_space<vmem>>, %arg3: memref<1x1x4xf32, #tpu.memory_space<vmem>>, %arg4: memref<4x36xf32, #tpu.memory_space<vmem>>, %arg5: memref<1x1x4xf32, #tpu.memory_space<vmem>>, %arg6: memref<1x16x16x4xf32, #tpu.memory_space<vmem>>, %arg7: memref<18x24x4xf32, #tpu.memory_space<vmem>>) attributes {dimension_semantics = [#tpu.dimension_semantics<parallel>], iteration_bounds = array<i64: 2>, scalar_prefetch = 0 : i64, scratch_operands = 1 : i64, tpu.core_type = #tpu.core_type<tc>, window_params = [{transform_indices = @transform_0, window_bounds = array<i64: 1, 16, 16, 4>}, {pipeline_mode = #tpu.pipeline_mode<synchronous>, transform_indices = @transform_1, window_bounds = array<i64: 4, 36>}, {pipeline_mode = #tpu.pipeline_mode<synchronous>, transform_indices = @transform_2, window_bounds = array<i64: 1, 1, 4>}, {pipeline_mode = #tpu.pipeline_mode<synchronous>, transform_indices = @transform_3, window_bounds = array<i64: 4, 36>}, {pipeline_mode = #tpu.pipeline_mode<synchronous>, transform_indices = @transform_4, window_bounds = array<i64: 1, 1, 4>}, {transform_indices = @transform_5, window_bounds = array<i64: 1, 16, 16, 4>}]} {
    %cst = arith.constant 0.000000e+00 : f32
    %0 = vector.broadcast %cst : f32 to vector<1x24x4xf32>
    %c0 = arith.constant 0 : index
    %c0_0 = arith.constant 0 : index
    %c0_1 = arith.constant 0 : index
    %1 = vector.load %arg7[%c0, %c0_0, %c0_1] : memref<18x24x4xf32, #tpu.memory_space<vmem>>, vector<1x24x4xf32>
    tpu.vector_store %arg7[%c0, %c0_0, %c0_1], %0 {strides = array<i32>} : memref<18x24x4xf32, #tpu.memory_space<vmem>>, vector<1x24x4xf32>,
    %cst_2 = arith.constant 0.000000e+00 : f32
    %2 = vector.broadcast %cst_2 : f32 to vector<1x24x4xf32>
    %c17 = arith.constant 17 : index
    %c0_3 = arith.constant 0 : index
    %c0_4 = arith.constant 0 : index
    %3 = vector.load %arg7[%c17, %c0_3, %c0_4] : memref<18x24x4xf32, #tpu.memory_space<vmem>>, vector<1x24x4xf32>
    tpu.vector_store %arg7[%c17, %c0_3, %c0_4], %2 {strides = array<i32>} : memref<18x24x4xf32, #tpu.memory_space<vmem>>, vector<1x24x4xf32>,
    %cst_5 = arith.constant 0.000000e+00 : f32
    %4 = vector.broadcast %cst_5 : f32 to vector<16x1x4xf32>
    %c1 = arith.constant 1 : index
    %c0_6 = arith.constant 0 : index
    %c0_7 = arith.constant 0 : index
    %5 = vector.load %arg7[%c1, %c0_6, %c0_7] : memref<18x24x4xf32, #tpu.memory_space<vmem>>, vector<16x1x4xf32>
    tpu.vector_store %arg7[%c1, %c0_6, %c0_7], %4 {strides = array<i32>} : memref<18x24x4xf32, #tpu.memory_space<vmem>>, vector<16x1x4xf32>,
    %cst_8 = arith.constant 0.000000e+00 : f32
    %6 = vector.broadcast %cst_8 : f32 to vector<16x7x4xf32>
    %c1_9 = arith.constant 1 : index
    %c17_10 = arith.constant 17 : index
    %c0_11 = arith.constant 0 : index
    %7 = vector.load %arg7[%c1_9, %c17_10, %c0_11] : memref<18x24x4xf32, #tpu.memory_space<vmem>>, vector<16x7x4xf32>
    tpu.vector_store %arg7[%c1_9, %c17_10, %c0_11], %6 {strides = array<i32>} : memref<18x24x4xf32, #tpu.memory_space<vmem>>, vector<16x7x4xf32>,
    %c0_12 = arith.constant 0 : index
    %c0_13 = arith.constant 0 : index
    %c0_14 = arith.constant 0 : index
    %c0_15 = arith.constant 0 : index
    %8 = vector.load %arg1[%c0_12, %c0_13, %c0_14, %c0_15] : memref<1x16x16x4xf32, #tpu.memory_space<vmem>>, vector<1x16x16x4xf32>
    %9 = vector.shape_cast %8 : vector<1x16x16x4xf32> to vector<16x16x4xf32>
    %c1_16 = arith.constant 1 : index
    %c1_17 = arith.constant 1 : index
    %c0_18 = arith.constant 0 : index
    %10 = vector.load %arg7[%c1_16, %c1_17, %c0_18] : memref<18x24x4xf32, #tpu.memory_space<vmem>>, vector<16x16x4xf32>
    tpu.vector_store %arg7[%c1_16, %c1_17, %c0_18], %9 {strides = array<i32>} : memref<18x24x4xf32, #tpu.memory_space<vmem>>, vector<16x16x4xf32>,
    %c0_19 = arith.constant 0 : index
    %c0_20 = arith.constant 0 : index
    %c0_21 = arith.constant 0 : index
    %11 = vector.load %arg7[%c0_19, %c0_20, %c0_21] : memref<18x24x4xf32, #tpu.memory_space<vmem>>, vector<18x24x4xf32>
    %12 = vector.shape_cast %11 : vector<18x24x4xf32> to vector<432x4xf32>
    %c0_22 = arith.constant 0 : index
    %c0_23 = arith.constant 0 : index
    %13 = vector.load %arg2[%c0_22, %c0_23] : memref<4x36xf32, #tpu.memory_space<vmem>>, vector<4x36xf32>
    %cst_24 = arith.constant dense<0.000000e+00> : vector<432x36xf32>
    %14 = tpu.matmul %12, %13, %cst_24 {dimension_numbers = #tpu.dot_dimension_numbers<[1], [0], [0], [1], [0, 0, 1, 1], [], []>} : vector<432x4xf32>, vector<4x36xf32>, vector<432x36xf32> -> vector<432x36xf32>
    %15 = vector.shape_cast %14 : vector<432x36xf32> to vector<18x24x36xf32>
    %16 = vector.extract_strided_slice %15 {offsets = [0, 0, 0], sizes = [16, 16, 4], strides = [1, 1, 1]} : vector<18x24x36xf32> to vector<16x16x4xf32>
    %c0_25 = arith.constant 0 : index
    %c0_26 = arith.constant 0 : index
    %c0_27 = arith.constant 0 : index
    %17 = vector.load %arg3[%c0_25, %c0_26, %c0_27] : memref<1x1x4xf32, #tpu.memory_space<vmem>>, vector<1x1x4xf32>
    %18 = vector.broadcast %17 : vector<1x1x4xf32> to vector<16x16x4xf32>
    %19 = arith.addf %16, %18 : vector<16x16x4xf32>
    %20 = vector.extract_strided_slice %15 {offsets = [0, 1, 4], sizes = [16, 16, 4], strides = [1, 1, 1]} : vector<18x24x36xf32> to vector<16x16x4xf32>
    %21 = arith.addf %19, %20 : vector<16x16x4xf32>
    %22 = vector.extract_strided_slice %15 {offsets = [0, 2, 8], sizes = [16, 16, 4], strides = [1, 1, 1]} : vector<18x24x36xf32> to vector<16x16x4xf32>
    %23 = arith.addf %21, %22 : vector<16x16x4xf32>
    %24 = vector.extract_strided_slice %15 {offsets = [1, 0, 12], sizes = [16, 16, 4], strides = [1, 1, 1]} : vector<18x24x36xf32> to vector<16x16x4xf32>
    %25 = arith.addf %23, %24 : vector<16x16x4xf32>
    %26 = vector.extract_strided_slice %15 {offsets = [1, 1, 16], sizes = [16, 16, 4], strides = [1, 1, 1]} : vector<18x24x36xf32> to vector<16x16x4xf32>
    %27 = arith.addf %25, %26 : vector<16x16x4xf32>
    %28 = vector.extract_strided_slice %15 {offsets = [1, 2, 20], sizes = [16, 16, 4], strides = [1, 1, 1]} : vector<18x24x36xf32> to vector<16x16x4xf32>
    %29 = arith.addf %27, %28 : vector<16x16x4xf32>
    %30 = vector.extract_strided_slice %15 {offsets = [2, 0, 24], sizes = [16, 16, 4], strides = [1, 1, 1]} : vector<18x24x36xf32> to vector<16x16x4xf32>
    %31 = arith.addf %29, %30 : vector<16x16x4xf32>
    %32 = vector.extract_strided_slice %15 {offsets = [2, 1, 28], sizes = [16, 16, 4], strides = [1, 1, 1]} : vector<18x24x36xf32> to vector<16x16x4xf32>
    %33 = arith.addf %31, %32 : vector<16x16x4xf32>
    %34 = vector.extract_strided_slice %15 {offsets = [2, 2, 32], sizes = [16, 16, 4], strides = [1, 1, 1]} : vector<18x24x36xf32> to vector<16x16x4xf32>
    %35 = arith.addf %33, %34 : vector<16x16x4xf32>
    %cst_28 = arith.constant 0.000000e+00 : f32
    %36 = vector.broadcast %cst_28 : f32 to vector<16x16x4xf32>
    %37 = arith.maximumf %35, %36 : vector<16x16x4xf32>
    %c1_29 = arith.constant 1 : index
    %c1_30 = arith.constant 1 : index
    %c0_31 = arith.constant 0 : index
    %38 = vector.load %arg7[%c1_29, %c1_30, %c0_31] : memref<18x24x4xf32, #tpu.memory_space<vmem>>, vector<16x16x4xf32>
    tpu.vector_store %arg7[%c1_29, %c1_30, %c0_31], %37 {strides = array<i32>} : memref<18x24x4xf32, #tpu.memory_space<vmem>>, vector<16x16x4xf32>,
    %c0_32 = arith.constant 0 : index
    %c0_33 = arith.constant 0 : index
    %c0_34 = arith.constant 0 : index
    %39 = vector.load %arg7[%c0_32, %c0_33, %c0_34] : memref<18x24x4xf32, #tpu.memory_space<vmem>>, vector<18x24x4xf32>
    %40 = vector.shape_cast %39 : vector<18x24x4xf32> to vector<432x4xf32>
    %c0_35 = arith.constant 0 : index
    %c0_36 = arith.constant 0 : index
    %41 = vector.load %arg4[%c0_35, %c0_36] : memref<4x36xf32, #tpu.memory_space<vmem>>, vector<4x36xf32>
    %cst_37 = arith.constant dense<0.000000e+00> : vector<432x36xf32>
    %42 = tpu.matmul %40, %41, %cst_37 {dimension_numbers = #tpu.dot_dimension_numbers<[1], [0], [0], [1], [0, 0, 1, 1], [], []>} : vector<432x4xf32>, vector<4x36xf32>, vector<432x36xf32> -> vector<432x36xf32>
    %43 = vector.shape_cast %42 : vector<432x36xf32> to vector<18x24x36xf32>
    %44 = vector.extract_strided_slice %43 {offsets = [0, 0, 0], sizes = [16, 16, 4], strides = [1, 1, 1]} : vector<18x24x36xf32> to vector<16x16x4xf32>
    %c0_38 = arith.constant 0 : index
    %c0_39 = arith.constant 0 : index
    %c0_40 = arith.constant 0 : index
    %45 = vector.load %arg5[%c0_38, %c0_39, %c0_40] : memref<1x1x4xf32, #tpu.memory_space<vmem>>, vector<1x1x4xf32>
    %46 = vector.broadcast %45 : vector<1x1x4xf32> to vector<16x16x4xf32>
    %47 = arith.addf %44, %46 : vector<16x16x4xf32>
    %48 = vector.extract_strided_slice %43 {offsets = [0, 1, 4], sizes = [16, 16, 4], strides = [1, 1, 1]} : vector<18x24x36xf32> to vector<16x16x4xf32>
    %49 = arith.addf %47, %48 : vector<16x16x4xf32>
    %50 = vector.extract_strided_slice %43 {offsets = [0, 2, 8], sizes = [16, 16, 4], strides = [1, 1, 1]} : vector<18x24x36xf32> to vector<16x16x4xf32>
    %51 = arith.addf %49, %50 : vector<16x16x4xf32>
    %52 = vector.extract_strided_slice %43 {offsets = [1, 0, 12], sizes = [16, 16, 4], strides = [1, 1, 1]} : vector<18x24x36xf32> to vector<16x16x4xf32>
    %53 = arith.addf %51, %52 : vector<16x16x4xf32>
    %54 = vector.extract_strided_slice %43 {offsets = [1, 1, 16], sizes = [16, 16, 4], strides = [1, 1, 1]} : vector<18x24x36xf32> to vector<16x16x4xf32>
    %55 = arith.addf %53, %54 : vector<16x16x4xf32>
    %56 = vector.extract_strided_slice %43 {offsets = [1, 2, 20], sizes = [16, 16, 4], strides = [1, 1, 1]} : vector<18x24x36xf32> to vector<16x16x4xf32>
    %57 = arith.addf %55, %56 : vector<16x16x4xf32>
    %58 = vector.extract_strided_slice %43 {offsets = [2, 0, 24], sizes = [16, 16, 4], strides = [1, 1, 1]} : vector<18x24x36xf32> to vector<16x16x4xf32>
    %59 = arith.addf %57, %58 : vector<16x16x4xf32>
    %60 = vector.extract_strided_slice %43 {offsets = [2, 1, 28], sizes = [16, 16, 4], strides = [1, 1, 1]} : vector<18x24x36xf32> to vector<16x16x4xf32>
    %61 = arith.addf %59, %60 : vector<16x16x4xf32>
    %62 = vector.extract_strided_slice %43 {offsets = [2, 2, 32], sizes = [16, 16, 4], strides = [1, 1, 1]} : vector<18x24x36xf32> to vector<16x16x4xf32>
    %63 = arith.addf %61, %62 : vector<16x16x4xf32>
    %c0_41 = arith.constant 0 : index
    %c0_42 = arith.constant 0 : index
    %c0_43 = arith.constant 0 : index
    %c0_44 = arith.constant 0 : index
    %64 = vector.load %arg1[%c0_41, %c0_42, %c0_43, %c0_44] : memref<1x16x16x4xf32, #tpu.memory_space<vmem>>, vector<1x16x16x4xf32>
    %65 = vector.shape_cast %64 : vector<1x16x16x4xf32> to vector<16x16x4xf32>
    %66 = arith.addf %63, %65 : vector<16x16x4xf32>
    %c0_45 = arith.constant 0 : index
    %c0_46 = arith.constant 0 : index
    %c0_47 = arith.constant 0 : index
    %c0_48 = arith.constant 0 : index
    %67 = vector.load %arg6[%c0_45, %c0_46, %c0_47, %c0_48] : memref<1x16x16x4xf32, #tpu.memory_space<vmem>>, vector<1x16x16x4xf32>
    %68 = vector.shape_cast %67 : vector<1x16x16x4xf32> to vector<16x16x4xf32>
    %69 = vector.shape_cast %66 : vector<16x16x4xf32> to vector<1x16x16x4xf32>
    tpu.vector_store %arg6[%c0_45, %c0_46, %c0_47, %c0_48], %69 {strides = array<i32>} : memref<1x16x16x4xf32, #tpu.memory_space<vmem>>, vector<1x16x16x4xf32>,
    return
  }
  func.func @transform_0(%arg0: i32) -> (i32, i32, i32, i32) {
    %c0_i32 = arith.constant 0 : i32
    %c0_i32_0 = arith.constant 0 : i32
    %c0_i32_1 = arith.constant 0 : i32
    %c0_i32_2 = arith.constant 0 : i32
    return %arg0, %c0_i32, %c0_i32_0, %c0_i32_1 : i32, i32, i32, i32
  }
  func.func @transform_1(%arg0: i32) -> (i32, i32) {
    %c0_i32 = arith.constant 0 : i32
    %c0_i32_0 = arith.constant 0 : i32
    %c0_i32_1 = arith.constant 0 : i32
    return %c0_i32, %c0_i32_0 : i32, i32
  }
  func.func @transform_2(%arg0: i32) -> (i32, i32, i32) {
    %c0_i32 = arith.constant 0 : i32
    %c0_i32_0 = arith.constant 0 : i32
    %c0_i32_1 = arith.constant 0 : i32
    %c0_i32_2 = arith.constant 0 : i32
    return %c0_i32, %c0_i32_0, %c0_i32_1 : i32, i32, i32
  }
  func.func @transform_3(%arg0: i32) -> (i32, i32) {
    %c0_i32 = arith.constant 0 : i32
    %c0_i32_0 = arith.constant 0 : i32
    %c0_i32_1 = arith.constant 0 : i32
    return %c0_i32, %c0_i32_0 : i32, i32
  }
  func.func @transform_4(%arg0: i32) -> (i32, i32, i32) {
    %c0_i32 = arith.constant 0 : i32
    %c0_i32_0 = arith.constant 0 : i32
    %c0_i32_1 = arith.constant 0 : i32
    %c0_i32_2 = arith.constant 0 : i32
    return %c0_i32, %c0_i32_0, %c0_i32_1 : i32, i32, i32
  }
  func.func @transform_5(%arg0: i32) -> (i32, i32, i32, i32) {
    %c0_i32 = arith.constant 0 : i32
    %c0_i32_0 = arith.constant 0 : i32
    %c0_i32_1 = arith.constant 0 : i32
    %c0_i32_2 = arith.constant 0 : i32
    return %arg0, %c0_i32, %c0_i32_0, %c0_i32_1 : i32, i32, i32, i32
  }
}

</mosaic_0001>

<bundles_post_ra>
// kernel: tpu_custom_call.1
= control target key start
LH: loop header
LB: loop body
LE: loop exit
PB: predicated region body
PF: predicated region fallthrough
CT: control target
= control target key end

     0   :  { %s4719_s18 = smov 0   ;;  %s8374_s0 = inlined_call_operand.vmem [shape: f32[2,16,16,4], index: 0, kind: input, shape index: {}]   ;;  %s8375_s1 = inlined_call_operand.vmem [shape: f32[4,36], index: 1, kind: input, shape index: {}]   ;;  %s8376_s2 = inlined_call_operand.vmem [shape: f32[1,1,4], index: 2, kind: input, shape index: {}]   ;;  %s8377_s3 = inlined_call_operand.vmem [shape: f32[4,36], index: 3, kind: input, shape index: {}]   ;;  %s8378_s4 = inlined_call_operand.vmem [shape: f32[1,1,4], index: 4, kind: input, shape index: {}]   ;;  %s8379_s5 = inlined_call_operand.vmem [shape: f32[2,16,16,4], index: 5, kind: output, shape index: {}]  }
   0x1 LB: > { %s4254_s19 = sadd.s32 4294967295, %s4678_s18   ;;  %p4258_p0 = scmp.ge.s32.totalorder %s4678_s18, 1  ;;  %s4678_s18 = sphi %s4719_s18, %s15_s18  }
   0x2   : > { %p187_p1 = scmp.lt.s32.totalorder %s4678_s18, 3 }
   0x4   : > { %p188_p2 = pnand %p4258_p0, %p187_p1 }
   0x6   : > { %191 = sbr.rel (%p188_p2) target bundleno = 1671 (0x687), region = 40 }
   0xd   : > { %v386_v0 = vld [vmem:[%s8375_s1] sm:$0xf]  ;;  %vm549_vm0 = vcmask 1043456   ;;  %vm225_vm1 = vcmask 31744   ;;  %p215_p3 = scmp.lt.s32.totalorder %s4254_s19, 1  ;;  %v4680_v1 = vmov 0.0  }
   0xe   : > { %4489 = vmatprep.subr.msk.mxu0 %vm549_vm0, %v386_v0  ;;  %226 = vst.msk [vmem:[#allocation2] sm:$0xff] %vm225_vm1, %v4680_v1  ;;  %227 = vst.msk [vmem:[#allocation2 + $0x8] sm:$0xff] %vm225_vm1, %v4680_v1  ;;  %vm234_vm2 = vcmask 24576   ;;  %vm251_vm3 = vcmask 30720   ;;  %vm975_vm4 = vcmask 1046528   ;;  %vm1184_vm5 = vcmask 1045504  }
   0xf   : > { %228 = vst.msk [vmem:[#allocation2 + $0x10] sm:$0xff] %vm225_vm1, %v4680_v1  ;;  %230 = vst.msk [vmem:[#allocation2 + $0x198] sm:$0xff] %vm225_vm1, %v4680_v1  ;;  %4490 = vmatpush3.msk.msra.mxu0 %vm549_vm0, %v386_v0  ;;  %s9526_s19 = smov (!%p215_p3, %s4254_s19), 1  ;;  %s4681_s26 = smov 124  }
  0x10   : > { %231 = vst.msk [vmem:[#allocation2 + $0x1a0] sm:$0xff] %vm225_vm1, %v4680_v1  ;;  %232 = vst.msk [vmem:[#allocation2 + $0x1a8] sm:$0xff] %vm225_vm1, %v4680_v1  ;;  %s4377_s22 = sshll.u32 %s9526_s19, 8  ;;  %s4682_s27 = smov 120  }
  0x11   : > { %235 = vst.msk [vmem:[#allocation2 + $0x18] sm:$0x1] %vm234_vm2, %v4680_v1  ;;  %236 = vst.msk [vmem:[#allocation2 + $0x30] sm:$0x1] %vm234_vm2, %v4680_v1  ;;  %s4778_s25 = scalar_lea.vmem %s8374_s0, %s4377_s22  ;;  %s4683_s28 = smov 116  }
  0x12   : > { %237 = vst.msk [vmem:[#allocation2 + $0x48] sm:$0x1] %vm234_vm2, %v4680_v1  ;;  %238 = vst.msk [vmem:[#allocation2 + $0x60] sm:$0x1] %vm234_vm2, %v4680_v1  ;;  %v268_v2 = vld [vmem:[%s4778_s25] sm:$0xff]  ;;  %v269_v3 = vld [vmem:[%s4778_s25 + $0x8] sm:$0xff]  ;;  %s8217_s17 = scalar_lea.vmem %s8379_s5, %s4377_s22 }
  0x13   : > { %239 = vst.msk [vmem:[#allocation2 + $0x78] sm:$0x1] %vm234_vm2, %v4680_v1  ;;  %240 = vst.msk [vmem:[#allocation2 + $0x90] sm:$0x1] %vm234_vm2, %v4680_v1  ;;  %v270_v4 = vld [vmem:[%s4778_s25 + $0x10] sm:$0xff]  ;;  %v271_v5 = vld [vmem:[%s4778_s25 + $0x18] sm:$0xff] }
  0x14   : > { %241 = vst.msk [vmem:[#allocation2 + $0xa8] sm:$0x1] %vm234_vm2, %v4680_v1  ;;  %242 = vst.msk [vmem:[#allocation2 + $0xc0] sm:$0x1] %vm234_vm2, %v4680_v1  ;;  %v272_v6 = vld [vmem:[%s4778_s25 + $0x20] sm:$0xff]  ;;  %v273_v7 = vld [vmem:[%s4778_s25 + $0x28] sm:$0xff] }
  0x15   : > { %243 = vst.msk [vmem:[#allocation2 + $0xd8] sm:$0x1] %vm234_vm2, %v4680_v1  ;;  %244 = vst.msk [vmem:[#allocation2 + $0xf0] sm:$0x1] %vm234_vm2, %v4680_v1  ;;  %v332_v8 = vld [vmem:[#allocation2] sm:$0xff]  ;;  %v333_v9 = vld [vmem:[#allocation2 + $0x8] sm:$0xff] }
  0x16   : > { %245 = vst.msk [vmem:[#allocation2 + $0x108] sm:$0x1] %vm234_vm2, %v4680_v1  ;;  %246 = vst.msk [vmem:[#allocation2 + $0x120] sm:$0x1] %vm234_vm2, %v4680_v1  ;;  %v334_v10 = vld [vmem:[#allocation2 + $0x10] sm:$0xff]  ;;  %4491 = vmatprep.mubr.msk.f32.mxu0 %vm225_vm1, %v332_v8  ;;  %v275_v12 = vld [vmem:[%s4778_s25 + $0x38] sm:$0xff] }
  0x17   : > { %247 = vst.msk [vmem:[#allocation2 + $0x138] sm:$0x1] %vm234_vm2, %v4680_v1  ;;  %248 = vst.msk [vmem:[#allocation2 + $0x150] sm:$0x1] %vm234_vm2, %v4680_v1  ;;  %v274_v11 = vld [vmem:[%s4778_s25 + $0x30] sm:$0xff]  ;;  %v276_v13 = vld [vmem:[%s4778_s25 + $0x40] sm:$0xff]  ;;  %4492 = vmatmul.mubr.msk.f32.vlgmr.msra.gmra.mrb[0].mxu0 %vm225_vm1, %v333_v9 }
  0x18   : > { %249 = vst.msk [vmem:[#allocation2 + $0x168] sm:$0x1] %vm234_vm2, %v4680_v1  ;;  %250 = vst.msk [vmem:[#allocation2 + $0x180] sm:$0x1] %vm234_vm2, %v4680_v1  ;;  %v277_v14 = vld [vmem:[%s4778_s25 + $0x48] sm:$0xff]  ;;  %v278_v15 = vld [vmem:[%s4778_s25 + $0x50] sm:$0xff]  ;;  %4494 = vmatprep.mubr.msk.f32.mxu0 %vm225_vm1, %v334_v10 }
  0x19   : > { %252 = vst.msk [vmem:[#allocation2 + $0x29] sm:$0x7f] %vm251_vm3, %v4680_v1  ;;  %253 = vst.msk [vmem:[#allocation2 + $0x41] sm:$0x7f] %vm251_vm3, %v4680_v1  ;;  %v279_v16 = vld [vmem:[%s4778_s25 + $0x58] sm:$0xff]  ;;  %v280_v17 = vld [vmem:[%s4778_s25 + $0x60] sm:$0xff] }
  0x1a   : > { %254 = vst.msk [vmem:[#allocation2 + $0x59] sm:$0x7f] %vm251_vm3, %v4680_v1  ;;  %255 = vst.msk [vmem:[#allocation2 + $0x71] sm:$0x7f] %vm251_vm3, %v4680_v1  ;;  %v281_v18 = vld [vmem:[%s4778_s25 + $0x68] sm:$0xff]  ;;  %v282_v19 = vld [vmem:[%s4778_s25 + $0x70] sm:$0xff] }
  0x1b   : > { %256 = vst.msk [vmem:[#allocation2 + $0x89] sm:$0x7f] %vm251_vm3, %v4680_v1  ;;  %257 = vst.msk [vmem:[#allocation2 + $0xa1] sm:$0x7f] %vm251_vm3, %v4680_v1  ;;  %v283_v20 = vld [vmem:[%s4778_s25 + $0x78] sm:$0xff]  ;;  %v284_v21 = vld [vmem:[%s4778_s25 + $0x80] sm:$0xff] }
  0x1c   : > { %258 = vst.msk [vmem:[#allocation2 + $0xb9] sm:$0x7f] %vm251_vm3, %v4680_v1  ;;  %259 = vst.msk [vmem:[#allocation2 + $0xd1] sm:$0x7f] %vm251_vm3, %v4680_v1  ;;  %v285_v22 = vld [vmem:[%s4778_s25 + $0x88] sm:$0xff]  ;;  %v286_v23 = vld [vmem:[%s4778_s25 + $0x90] sm:$0xff] }
  0x1d   : > { %260 = vst.msk [vmem:[#allocation2 + $0xe9] sm:$0x7f] %vm251_vm3, %v4680_v1  ;;  %261 = vst.msk [vmem:[#allocation2 + $0x101] sm:$0x7f] %vm251_vm3, %v4680_v1  ;;  %v287_v24 = vld [vmem:[%s4778_s25 + $0x98] sm:$0xff]  ;;  %v288_v25 = vld [vmem:[%s4778_s25 + $0xa0] sm:$0xff] }
  0x1e   : > { %262 = vst.msk [vmem:[#allocation2 + $0x119] sm:$0x7f] %vm251_vm3, %v4680_v1  ;;  %263 = vst.msk [vmem:[#allocation2 + $0x131] sm:$0x7f] %vm251_vm3, %v4680_v1  ;;  %v289_v33 = vld [vmem:[%s4778_s25 + $0xa8] sm:$0xff]  ;;  %v290_v60 = vld [vmem:[%s4778_s25 + $0xb0] sm:$0xff] }
  0x1f   : > { %264 = vst.msk [vmem:[#allocation2 + $0x149] sm:$0x7f] %vm251_vm3, %v4680_v1  ;;  %265 = vst.msk [vmem:[#allocation2 + $0x161] sm:$0x7f] %vm251_vm3, %v4680_v1  ;;  %v291_v61 = vld [vmem:[%s4778_s25 + $0xb8] sm:$0xff]  ;;  %v292_v62 = vld [vmem:[%s4778_s25 + $0xc0] sm:$0xff] }
  0x20   : > { %266 = vst.msk [vmem:[#allocation2 + $0x179] sm:$0x7f] %vm251_vm3, %v4680_v1  ;;  %267 = vst.msk [vmem:[#allocation2 + $0x191] sm:$0x7f] %vm251_vm3, %v4680_v1  ;;  %v296_v8 = vld [vmem:[%s4778_s25 + $0xe0] sm:$0xff]  ;;  %s4684_s29 = smov 112  }
  0x21   : > { %300 = vst.msk [vmem:[#allocation2 + $0x19] sm:$0xff] %vm225_vm1, %v268_v2  ;;  %301 = vst.msk [vmem:[#allocation2 + $0x21] sm:$0xff] %vm225_vm1, %v269_v3  ;;  %v293_v3 = vld [vmem:[%s4778_s25 + $0xc8] sm:$0xff]  ;;  %s4685_s30 = smov 108   ;;  %s4686_s6 = smov 104  }
  0x22   : > { %302 = vst.msk [vmem:[#allocation2 + $0x31] sm:$0xff] %vm225_vm1, %v270_v4  ;;  %303 = vst.msk [vmem:[#allocation2 + $0x39] sm:$0xff] %vm225_vm1, %v271_v5  ;;  %s4687_s9 = smov 100   ;;  %s4688_s10 = smov 96  }
  0x23   : > { %304 = vst.msk [vmem:[#allocation2 + $0x49] sm:$0xff] %vm225_vm1, %v272_v6  ;;  %305 = vst.msk [vmem:[#allocation2 + $0x51] sm:$0xff] %vm225_vm1, %v273_v7  ;;  %v294_v6 = vld [vmem:[%s4778_s25 + $0xd0] sm:$0xff]  ;;  %v295_v7 = vld [vmem:[%s4778_s25 + $0xd8] sm:$0xff] }
  0x24   : > { %306 = vst.msk [vmem:[#allocation2 + $0x61] sm:$0xff] %vm225_vm1, %v274_v11  ;;  %307 = vst.msk [vmem:[#allocation2 + $0x69] sm:$0xff] %vm225_vm1, %v275_v12 }
  0x25   : > { %308 = vst.msk [vmem:[#allocation2 + $0x79] sm:$0xff] %vm225_vm1, %v276_v13  ;;  %309 = vst.msk [vmem:[#allocation2 + $0x81] sm:$0xff] %vm225_vm1, %v277_v14  ;;  %v297_v13 = vld [vmem:[%s4778_s25 + $0xe8] sm:$0xff] }
  0x26   : > { %310 = vst.msk [vmem:[#allocation2 + $0x91] sm:$0xff] %vm225_vm1, %v278_v15  ;;  %311 = vst.msk [vmem:[#allocation2 + $0x99] sm:$0xff] %vm225_vm1, %v279_v16  ;;  %v298_v16 = vld [vmem:[%s4778_s25 + $0xf0] sm:$0xff] }
  0x27   : > { %312 = vst.msk [vmem:[#allocation2 + $0xa9] sm:$0xff] %vm225_vm1, %v280_v17  ;;  %313 = vst.msk [vmem:[#allocation2 + $0xb1] sm:$0xff] %vm225_vm1, %v281_v18  ;;  %v299_v17 = vld [vmem:[%s4778_s25 + $0xf8] sm:$0xff] }
  0x28   : > { %314 = vst.msk [vmem:[#allocation2 + $0xc1] sm:$0xff] %vm225_vm1, %v282_v19  ;;  %315 = vst.msk [vmem:[#allocation2 + $0xc9] sm:$0xff] %vm225_vm1, %v283_v20  ;;  %v335_v26 = vld [vmem:[#allocation2 + $0x18] sm:$0xff]  ;;  %v336_v27 = vld [vmem:[#allocation2 + $0x20] sm:$0xff] }
  0x29   : > { %316 = vst.msk [vmem:[#allocation2 + $0xd9] sm:$0xff] %vm225_vm1, %v284_v21  ;;  %317 = vst.msk [vmem:[#allocation2 + $0xe1] sm:$0xff] %vm225_vm1, %v285_v22  ;;  %4495 = vmatmul.mubr.msk.f32.gmra.mrb[2].mxu0 %vm225_vm1, %v335_v26  ;;  %v337_v28 = vld [vmem:[#allocation2 + $0x28] sm:$0xff]  ;;  %v338_v29 = vld [vmem:[#allocation2 + $0x30] sm:$0xff] }
  0x2a   : > { %318 = vst.msk [vmem:[#allocation2 + $0xf1] sm:$0xff] %vm225_vm1, %v286_v23  ;;  %319 = vst.msk [vmem:[#allocation2 + $0xf9] sm:$0xff] %vm225_vm1, %v287_v24  ;;  %4497 = vmatprep.mubr.msk.f32.mxu0 %vm225_vm1, %v336_v27  ;;  %v339_v30 = vld [vmem:[#allocation2 + $0x38] sm:$0xff]  ;;  %v340_v31 = vld [vmem:[#allocation2 + $0x40] sm:$0xff] }
  0x2b   : > { %320 = vst.msk [vmem:[#allocation2 + $0x109] sm:$0xff] %vm225_vm1, %v288_v25  ;;  %v341_v32 = vld [vmem:[#allocation2 + $0x48] sm:$0xff]  ;;  %v342_v34 = vld [vmem:[#allocation2 + $0x50] sm:$0xff]  ;;  %321 = vst.msk [vmem:[#allocation2 + $0x111] sm:$0xff] %vm225_vm1, %v289_v33 }
  0x2c   : > { %v343_v35 = vld [vmem:[#allocation2 + $0x58] sm:$0xff]  ;;  %v344_v36 = vld [vmem:[#allocation2 + $0x60] sm:$0xff]  ;;  %v345_v37 = vld [vmem:[#allocation2 + $0x68] sm:$0xff]  ;;  %322 = vst.msk [vmem:[#allocation2 + $0x121] sm:$0xff] %vm225_vm1, %v290_v60 }
  0x2d   : > { %4498 = vmatmul.mubr.msk.f32.gmra.mrb[4].mxu0 %vm225_vm1, %v337_v28  ;;  %v346_v38 = vld [vmem:[#allocation2 + $0x70] sm:$0xff]  ;;  %v347_v39 = vld [vmem:[#allocation2 + $0x78] sm:$0xff]  ;;  %v348_v40 = vld [vmem:[#allocation2 + $0x80] sm:$0xff]  ;;  %323 = vst.msk [vmem:[#allocation2 + $0x129] sm:$0xff] %vm225_vm1, %v291_v61 }
  0x2e   : > { %4500 = vmatprep.mubr.msk.f32.mxu0 %vm225_vm1, %v338_v29  ;;  %v349_v41 = vld [vmem:[#allocation2 + $0x88] sm:$0xff]  ;;  %v350_v42 = vld [vmem:[#allocation2 + $0x90] sm:$0xff]  ;;  %v351_v43 = vld [vmem:[#allocation2 + $0x98] sm:$0xff]  ;;  %324 = vst.msk [vmem:[#allocation2 + $0x139] sm:$0xff] %vm225_vm1, %v292_v62 }
  0x2f   : > { %v352_v44 = vld [vmem:[#allocation2 + $0xa0] sm:$0xff]  ;;  %v353_v45 = vld [vmem:[#allocation2 + $0xa8] sm:$0xff]  ;;  %v354_v46 = vld [vmem:[#allocation2 + $0xb0] sm:$0xff]  ;;  %325 = vst.msk [vmem:[#allocation2 + $0x141] sm:$0xff] %vm225_vm1, %v293_v3 }
  0x30   : > { %v355_v47 = vld [vmem:[#allocation2 + $0xb8] sm:$0xff]  ;;  %v356_v48 = vld [vmem:[#allocation2 + $0xc0] sm:$0xff]  ;;  %v357_v49 = vld [vmem:[#allocation2 + $0xc8] sm:$0xff]  ;;  %326 = vst.msk [vmem:[#allocation2 + $0x151] sm:$0xff] %vm225_vm1, %v294_v6 }
  0x31   : > { %4501 = vmatmul.mubr.msk.f32.gmra.mrb[6].mxu0 %vm225_vm1, %v339_v30  ;;  %v358_v50 = vld [vmem:[#allocation2 + $0xd0] sm:$0xff]  ;;  %v359_v51 = vld [vmem:[#allocation2 + $0xd8] sm:$0xff]  ;;  %v360_v52 = vld [vmem:[#allocation2 + $0xe0] sm:$0xff]  ;;  %327 = vst.msk [vmem:[#allocation2 + $0x159] sm:$0xff] %vm225_vm1, %v295_v7 }
  0x32   : > { %4503 = vmatprep.mubr.msk.f32.mxu0 %vm225_vm1, %v340_v31  ;;  %v361_v53 = vld [vmem:[#allocation2 + $0xe8] sm:$0xff]  ;;  %v362_v54 = vld [vmem:[#allocation2 + $0xf0] sm:$0xff]  ;;  %v363_v55 = vld [vmem:[#allocation2 + $0xf8] sm:$0xff]  ;;  %328 = vst.msk [vmem:[#allocation2 + $0x169] sm:$0xff] %vm225_vm1, %v296_v8 }
  0x33   : > { %v364_v56 = vld [vmem:[#allocation2 + $0x100] sm:$0xff]  ;;  %v365_v57 = vld [vmem:[#allocation2 + $0x108] sm:$0xff]  ;;  %v366_v58 = vld [vmem:[#allocation2 + $0x110] sm:$0xff]  ;;  %329 = vst.msk [vmem:[#allocation2 + $0x171] sm:$0xff] %vm225_vm1, %v297_v13 }
  0x34   : > { %v367_v59 = vld [vmem:[#allocation2 + $0x118] sm:$0xff]  ;;  %v368_v63 = vld [vmem:[#allocation2 + $0x120] sm:$0xff]  ;;  %v369_v0 = vld [vmem:[#allocation2 + $0x128] sm:$0xff]  ;;  %330 = vst.msk [vmem:[#allocation2 + $0x181] sm:$0xff] %vm225_vm1, %v298_v16 }
  0x35   : > { %4504 = vmatmul.mubr.msk.f32.gmra.mrb[8].mxu0 %vm225_vm1, %v341_v32  ;;  %v370_v1 = vld [vmem:[#allocation2 + $0x130] sm:$0xff]  ;;  %v371_v2 = vld [vmem:[#allocation2 + $0x138] sm:$0xff]  ;;  %331 = vst.msk [vmem:[#allocation2 + $0x189] sm:$0xff] %vm225_vm1, %v299_v17  ;;  %v384_v22 = vld [vmem:[#allocation2 + $0x1a0] sm:$0xff] }
  0x36   : > { %4506 = vmatprep.mubr.msk.f32.mxu0 %vm225_vm1, %v342_v34  ;;  %v372_v4 = vld [vmem:[#allocation2 + $0x140] sm:$0xff]  ;;  %v373_v5 = vld [vmem:[#allocation2 + $0x148] sm:$0xff]  ;;  %v383_v21 = vld [vmem:[#allocation2 + $0x198] sm:$0xff] }
  0x37   : > { %v374_v9 = vld [vmem:[#allocation2 + $0x150] sm:$0xff]  ;;  %v385_v23 = vld [vmem:[#allocation2 + $0x1a8] sm:$0xff] }
  0x38   : > { %v375_v10 = vld [vmem:[#allocation2 + $0x158] sm:$0xff]  ;;  %v376_v11 = vld [vmem:[#allocation2 + $0x160] sm:$0xff] }
  0x39   : > { %4507 = vmatmul.mubr.msk.f32.gmra.mrb[10].mxu0 %vm225_vm1, %v343_v35  ;;  %v377_v12 = vld [vmem:[#allocation2 + $0x168] sm:$0xff] }
  0x3a   : > { %4509 = vmatprep.mubr.msk.f32.mxu0 %vm225_vm1, %v344_v36  ;;  %v378_v14 = vld [vmem:[#allocation2 + $0x170] sm:$0xff]  ;;  %v379_v15 = vld [vmem:[#allocation2 + $0x178] sm:$0xff] }
  0x3b   : > { %v380_v18 = vld [vmem:[#allocation2 + $0x180] sm:$0xff] }
  0x3c   : > { %v381_v19 = vld [vmem:[#allocation2 + $0x188] sm:$0xff]  ;;  %v382_v20 = vld [vmem:[#allocation2 + $0x190] sm:$0xff] }
  0x3d   : > { %4510 = vmatmul.mubr.msk.f32.gmra.mrb[12].mxu0 %vm225_vm1, %v345_v37 }
  0x3e   : > { %4512 = vmatprep.mubr.msk.f32.mxu0 %vm225_vm1, %v346_v38 }
  0x41   : > { %4513 = vmatmul.mubr.msk.f32.gmra.mrb[14].mxu0 %vm225_vm1, %v347_v39 }
  0x42   : > { %4515 = vmatprep.mubr.msk.f32.mxu0 %vm225_vm1, %v348_v40 }
  0x45   : > { %4516 = vmatmul.mubr.msk.f32.gmra.mrb[16].mxu0 %vm225_vm1, %v349_v41 }
  0x46   : > { %4518 = vmatprep.mubr.msk.f32.mxu0 %vm225_vm1, %v350_v42 }
  0x49   : > { %4519 = vmatmul.mubr.msk.f32.gmra.mrb[18].mxu0 %vm225_vm1, %v351_v43 }
  0x4a   : > { %4521 = vmatprep.mubr.msk.f32.mxu0 %vm225_vm1, %v352_v44 }
  0x4d   : > { %4522 = vmatmul.mubr.msk.f32.gmra.mrb[20].mxu0 %vm225_vm1, %v353_v45 }
  0x4e   : > { %4524 = vmatprep.mubr.msk.f32.mxu0 %vm225_vm1, %v354_v46 }
  0x51   : > { %4525 = vmatmul.mubr.msk.f32.gmra.mrb[22].mxu0 %vm225_vm1, %v355_v47 }
  0x52   : > { %4527 = vmatprep.mubr.msk.f32.mxu0 %vm225_vm1, %v356_v48 }
  0x55   : > { %4528 = vmatmul.mubr.msk.f32.gmra.mrb[24].mxu0 %vm225_vm1, %v357_v49 }
  0x56   : > { %4530 = vmatprep.mubr.msk.f32.mxu0 %vm225_vm1, %v358_v50 }
  0x59   : > { %4531 = vmatmul.mubr.msk.f32.gmra.mrb[26].mxu0 %vm225_vm1, %v359_v51 }
  0x5a   : > { %4533 = vmatprep.mubr.msk.f32.mxu0 %vm225_vm1, %v360_v52 }
  0x5d   : > { %4534 = vmatmul.mubr.msk.f32.gmra.mrb[28].mxu0 %vm225_vm1, %v361_v53 }
  0x5e   : > { %4536 = vmatprep.mubr.msk.f32.mxu0 %vm225_vm1, %v362_v54 }
  0x61   : > { %4537 = vmatmul.mubr.msk.f32.gmra.mrb[30].mxu0 %vm225_vm1, %v363_v55 }
  0x62   : > { %4539 = vmatprep.mubr.msk.f32.mxu0 %vm225_vm1, %v364_v56 }
  0x65   : > { %4540 = vmatmul.mubr.msk.f32.gmra.mrb[32].mxu0 %vm225_vm1, %v365_v57 }
  0x66   : > { %4542 = vmatprep.mubr.msk.f32.mxu0 %vm225_vm1, %v366_v58 }
  0x69   : > { %4543 = vmatmul.mubr.msk.f32.gmra.mrb[34].mxu0 %vm225_vm1, %v367_v59 }
  0x6a   : > { %4545 = vmatprep.mubr.msk.f32.mxu0 %vm225_vm1, %v368_v63 }
  0x6d   : > { %4546 = vmatmul.mubr.msk.f32.gmra.mrb[36].mxu0 %vm225_vm1, %v369_v0 }
  0x6e   : > { %4548 = vmatprep.mubr.msk.f32.mxu0 %vm225_vm1, %v370_v1 }
  0x71   : > { %4549 = vmatmul.mubr.msk.f32.gmra.mrb[38].mxu0 %vm225_vm1, %v371_v2 }
  0x72   : > { %4551 = vmatprep.mubr.msk.f32.mxu0 %vm225_vm1, %v372_v4 }
  0x75   : > { %4552 = vmatmul.mubr.msk.f32.gmra.mrb[40].mxu0 %vm225_vm1, %v373_v5 }
  0x76   : > { %4554 = vmatprep.mubr.msk.f32.mxu0 %vm225_vm1, %v374_v9 }
  0x79   : > { %4555 = vmatmul.mubr.msk.f32.gmra.mrb[42].mxu0 %vm225_vm1, %v375_v10 }
  0x7a   : > { %4557 = vmatprep.mubr.msk.f32.mxu0 %vm225_vm1, %v376_v11 }
  0x7d   : > { %4558 = vmatmul.mubr.msk.f32.gmra.mrb[44].mxu0 %vm225_vm1, %v377_v12 }
  0x7e   : > { %4560 = vmatprep.mubr.msk.f32.mxu0 %vm225_vm1, %v378_v14 }
  0x81   : > { %4561 = vmatmul.mubr.msk.f32.gmra.mrb[46].mxu0 %vm225_vm1, %v379_v15 }
  0x82   : > { %4563 = vmatprep.mubr.msk.f32.mxu0 %vm225_vm1, %v380_v18 }
  0x85   : > { %4564 = vmatmul.mubr.msk.f32.gmra.mrb[48].mxu0 %vm225_vm1, %v381_v19 }
  0x86   : > { %4566 = vmatprep.mubr.msk.f32.mxu0 %vm225_vm1, %v382_v20 }
  0x89   : > { %4567 = vmatmul.mubr.msk.f32.gmra.mrb[50].mxu0 %vm225_vm1, %v383_v21 }
  0x8a   : > { %4569 = vmatprep.mubr.msk.f32.mxu0 %vm225_vm1, %v384_v22 }
  0x8d   : > { %4570 = vmatmul.mubr.msk.f32.gmra.mrb[52].mxu0 %vm225_vm1, %v385_v23 }
  0xea   : > { %v4898_v24 = vpop.f32.mrb[0].mxu0 }
  0xeb   : > { %8552 = vst [vmem:[#allocation3_spill] sm:$0xff] %v4898_v24  ;;  %v977_v25 = vrot.slane %v4898_v24, 1  ;;  %v1186_v26 = vrot.slane %v4898_v24, 2  ;;  %v4902_v27 = vpop.f32.mrb[1].mxu0 }
  0xec   : > { %8553 = vst [vmem:[#allocation4_spill] sm:$0xff] %v4902_v27  ;;  %v976_v28 = vrot.slane %v4902_v27, 1  ;;  %v1185_v29 = vrot.slane %v4902_v27, 2 }
  0xee   : > { %v978_v30 = vsel %vm975_vm4, %v976_v28, %v977_v25  ;;  %v1187_v31 = vsel %vm1184_vm5, %v1185_v29, %v1186_v26 }
  0xef   : > { %1056 = vrot.lane.b32.xlu0 %v978_v30, %s4681_s26 }
  0xf3   : > { %1265 = vrot.lane.b32.xlu0 %v1187_v31, %s4682_s27 }
  0xfc   : > { %v4909_v32 = vpop.f32.mrb[2].mxu0 }
  0xfd   : > { %8554 = vst [vmem:[#allocation5_spill] sm:$0xff] %v4909_v32  ;;  %v629_v33 = vpop.f32.mrb[3].mxu0  ;;  %v981_v36 = vrot.slane %v4909_v32, 1  ;;  %v1190_v37 = vrot.slane %v4909_v32, 2  ;;  %1395 = vrot.lane.b32.xlu0 %v4909_v32, %s4683_s28 }
  0xfe   : > { %v979_v34 = vrot.slane %v629_v33, 1  ;;  %v1188_v35 = vrot.slane %v629_v33, 2 }
 0x100   : > { %v4499_v38 = vpop.f32.mrb[4].mxu0  ;;  %v1189_v39 = vsel %vm1184_vm5, %v1186_v26, %v1188_v35  ;;  %v980_v40 = vsel %vm975_vm4, %v977_v25, %v979_v34 }
 0x101   : > { %v984_v41 = vrot.slane %v4499_v38, 1  ;;  %v1193_v42 = vrot.slane %v4499_v38, 2  ;;  %1267 = vrot.lane.b32.xlu1 %v1189_v39, %s4682_s27  ;;  %v4917_v43 = vpop.f32.mrb[5].mxu0  ;;  %1058 = vrot.lane.b32.xlu0 %v980_v40, %s4681_s26 }
 0x102   : > { %8555 = vst [vmem:[#allocation6_spill] sm:$0xff] %v4917_v43  ;;  %v982_v44 = vrot.slane %v4917_v43, 1  ;;  %v1191_v45 = vrot.slane %v4917_v43, 2 }
 0x104   : > { %v983_v46 = vsel %vm975_vm4, %v981_v36, %v982_v44  ;;  %v1192_v47 = vsel %vm1184_vm5, %v1190_v37, %v1191_v45  ;;  %v985_v48 = vsel %vm975_vm4, %v982_v44, %v984_v41  ;;  %v4927_v49 = vsel %vm1184_vm5, %v1191_v45, %v1193_v42  ;;  %v4929_v50 = vpop.f32.mrb[6].mxu0 }
 0x105   : > { %8556 = vst [vmem:[#allocation7_spill] sm:$0xff] %v4929_v50  ;;  %1397 = vrot.lane.b32.xlu1 %v4917_v43, %s4683_s28  ;;  %v4933_v51 = vpop.f32.mrb[7].mxu0  ;;  %v987_v52 = vrot.slane %v4929_v50, 1  ;;  %v1196_v53 = vrot.slane %v4929_v50, 2  ;;  %1269 = vrot.lane.b32.xlu0 %v1192_v47, %s4682_s27 }
 0x106   : > { %8557 = vst [vmem:[#allocation8_spill] sm:$0xff] %v4933_v51  ;;  %v986_v54 = vrot.slane %v4933_v51, 1  ;;  %v1195_v55 = vrot.slane %v4933_v51, 2 }
 0x108   : > { %v4940_v56 = vpop.f32.mrb[8].mxu0  ;;  %v4943_v57 = vsel %vm975_vm4, %v986_v54, %v987_v52  ;;  %v4946_v58 = vsel %vm1184_vm5, %v1195_v55, %v1196_v53 }
 0x109   : > { %8558 = vst [vmem:[#allocation9_spill] sm:$0xff] %v4943_v57  ;;  %8559 = vst [vmem:[#allocation10_spill] sm:$0xff] %v4946_v58  ;;  %1060 = vrot.lane.b32.xlu1 %v983_v46, %s4681_s26  ;;  %v659_v59 = vpop.f32.mrb[9].mxu0  ;;  %v991_v1 = vrot.slane %v4940_v56, 1  ;;  %v1200_v2 = vrot.slane %v4940_v56, 2  ;;  %1529 = vrot.lane.b32.xlu0 %v983_v46, %s4684_s29 }
 0x10a   : > { %v989_v60 = vrot.slane %v659_v59, 1  ;;  %v1198_v61 = vrot.slane %v659_v59, 2 }
 0x10c   : > { %v4508_v62 = vpop.f32.mrb[10].mxu0  ;;  %v4951_v63 = vsel %vm975_vm4, %v987_v52, %v989_v60  ;;  %v4954_v0 = vsel %vm1184_vm5, %v1196_v53, %v1198_v61 }
 0x10d   : > { %8560 = vst [vmem:[#allocation11_spill] sm:$0xff] %v4951_v63  ;;  %8561 = vst [vmem:[#allocation12_spill] sm:$0xff] %v4954_v0  ;;  %1062 = vrot.lane.b32.xlu1 %v985_v48, %s4681_s26  ;;  %v994_v3 = vrot.slane %v4508_v62, 1  ;;  %v1203_v4 = vrot.slane %v4508_v62, 2  ;;  %v4959_v5 = vpop.f32.mrb[11].mxu0  ;;  %1662 = vrot.lane.b32.xlu0 %v1192_v47, %s4685_s30 }
 0x10e   : > { %v992_v6 = vrot.slane %v4959_v5, 1  ;;  %v1201_v7 = vrot.slane %v4959_v5, 2 }
 0x110   : > { %v4965_v8 = vsel %vm975_vm4, %v991_v1, %v992_v6  ;;  %v4968_v9 = vsel %vm1184_vm5, %v1200_v2, %v1201_v7  ;;  %v4971_v10 = vsel %vm975_vm4, %v992_v6, %v994_v3  ;;  %v4974_v11 = vsel %vm1184_vm5, %v1201_v7, %v1203_v4  ;;  %v4976_v12 = vpop.f32.mrb[12].mxu0 }
 0x111   : > { %8562 = vst [vmem:[#allocation13_spill] sm:$0xff] %v4965_v8  ;;  %8563 = vst [vmem:[#allocation14_spill] sm:$0xff] %v4968_v9  ;;  %1271 = vrot.lane.b32.xlu1 %v4927_v49, %s4682_s27  ;;  %v4980_v13 = vpop.f32.mrb[13].mxu0  ;;  %v997_v14 = vrot.slane %v4976_v12, 1  ;;  %v1206_v15 = vrot.slane %v4976_v12, 2  ;;  %1399 = vrot.lane.b32.xlu0 %v4933_v51, %s4683_s28 }
 0x112   : > { %8564 = vst [vmem:[#allocation15_spill] sm:$0xff] %v4971_v10  ;;  %8565 = vst [vmem:[#allocation16_spill] sm:$0xff] %v4974_v11  ;;  %v996_v16 = vrot.slane %v4980_v13, 1  ;;  %v1205_v17 = vrot.slane %v4980_v13, 2 }
 0x114   : > { %v4987_v18 = vpop.f32.mrb[14].mxu0  ;;  %v4990_v19 = vsel %vm975_vm4, %v996_v16, %v997_v14  ;;  %v4993_v20 = vsel %vm1184_vm5, %v1205_v17, %v1206_v15 }
 0x115   : > { %8566 = vst [vmem:[#allocation17_spill] sm:$0xff] %v4990_v19  ;;  %8567 = vst [vmem:[#allocation18_spill] sm:$0xff] %v4993_v20  ;;  %1401 = vrot.lane.b32.xlu1 %v4929_v50, %s4683_s28  ;;  %v689_v21 = vpop.f32.mrb[15].mxu0  ;;  %v1001_v29 = vrot.slane %v4987_v18, 1  ;;  %v1210_v30 = vrot.slane %v4987_v18, 2  ;;  %1792 = vrot.lane.b32.xlu0 %v4933_v51, %s4686_s6 }
 0x116   : > { %v999_v22 = vrot.slane %v689_v21, 1  ;;  %v1208_v23 = vrot.slane %v689_v21, 2 }
 0x118   : > { %v4517_v25 = vpop.f32.mrb[16].mxu0  ;;  %v5000_v26 = vsel %vm975_vm4, %v997_v14, %v999_v22  ;;  %v5003_v28 = vsel %vm1184_vm5, %v1206_v15, %v1208_v23 }
 0x119   : > { %8568 = vst [vmem:[#allocation19_spill] sm:$0xff] %v5000_v26  ;;  %8569 = vst [vmem:[#allocation20_spill] sm:$0xff] %v5003_v28  ;;  %1531 = vrot.lane.b32.xlu1 %v985_v48, %s4684_s29  ;;  %v1004_v31 = vrot.slane %v4517_v25, 1  ;;  %v1213_v33 = vrot.slane %v4517_v25, 2  ;;  %v5008_v34 = vpop.f32.mrb[17].mxu0  ;;  %1064 = vrot.lane.b32.xlu0 %v4943_v57, %s4681_s26 }
 0x11a   : > { %v1002_v35 = vrot.slane %v5008_v34, 1  ;;  %v1211_v36 = vrot.slane %v5008_v34, 2 }
 0x11c   : > { %v5015_v37 = vsel %vm975_vm4, %v1001_v29, %v1002_v35  ;;  %v5018_v38 = vsel %vm1184_vm5, %v1210_v30, %v1211_v36  ;;  %v5021_v39 = vsel %vm975_vm4, %v1002_v35, %v1004_v31  ;;  %v5024_v40 = vsel %vm1184_vm5, %v1211_v36, %v1213_v33  ;;  %v5026_v41 = vpop.f32.mrb[18].mxu0 }
 0x11d   : > { %8570 = vst [vmem:[#allocation21_spill] sm:$0xff] %v5015_v37  ;;  %8571 = vst [vmem:[#allocation22_spill] sm:$0xff] %v5018_v38  ;;  %1664 = vrot.lane.b32.xlu1 %v4927_v49, %s4685_s30  ;;  %v5030_v42 = vpop.f32.mrb[19].mxu0  ;;  %v1007_v44 = vrot.slane %v5026_v41, 1  ;;  %v1216_v45 = vrot.slane %v5026_v41, 2  ;;  %1273 = vrot.lane.b32.xlu0 %v4946_v58, %s4682_s27 }
 0x11e   : > { %8572 = vst [vmem:[#allocation23_spill] sm:$0xff] %v5021_v39  ;;  %8573 = vst [vmem:[#allocation24_spill] sm:$0xff] %v5024_v40  ;;  %v1006_v46 = vrot.slane %v5030_v42, 1  ;;  %v1215_v47 = vrot.slane %v5030_v42, 2 }
 0x11f   : > { %8574 = vst [vmem:[#allocation25_spill] sm:$0xff] %v5030_v42 }
 0x120   : > { %v5038_v48 = vpop.f32.mrb[20].mxu0  ;;  %v5041_v52 = vsel %vm975_vm4, %v1006_v46, %v1007_v44  ;;  %v5044_v49 = vsel %vm1184_vm5, %v1215_v47, %v1216_v45 }
 0x121   : > { %8575 = vst [vmem:[#allocation26_spill] sm:$0xff] %v5038_v48  ;;  %8576 = vst [vmem:[#allocation27_spill] sm:$0xff] %v5041_v52  ;;  %1794 = vrot.lane.b32.xlu1 %v4929_v50, %s4686_s6  ;;  %v719_v53 = vpop.f32.mrb[21].mxu0  ;;  %v1011_v62 = vrot.slane %v5038_v48, 1  ;;  %v1220_v1 = vrot.slane %v5038_v48, 2  ;;  %1403 = vrot.lane.b32.xlu0 %v4940_v56, %s4683_s28 }
 0x122   : > { %8577 = vst [vmem:[#allocation28_spill] sm:$0xff] %v5044_v49  ;;  %v1009_v54 = vrot.slane %v719_v53, 1  ;;  %v1218_v55 = vrot.slane %v719_v53, 2 }
 0x124   : > { %v4526_v59 = vpop.f32.mrb[22].mxu0  ;;  %v5051_v60 = vsel %vm975_vm4, %v1007_v44, %v1009_v54  ;;  %v5054_v61 = vsel %vm1184_vm5, %v1216_v45, %v1218_v55 }
 0x125   : > { %8578 = vst [vmem:[#allocation29_spill] sm:$0xff] %v5051_v60  ;;  %8579 = vst [vmem:[#allocation30_spill] sm:$0xff] %v5054_v61  ;;  %1066 = vrot.lane.b32.xlu1 %v4951_v63, %s4681_s26  ;;  %v1014_v2 = vrot.slane %v4526_v59, 1  ;;  %v1223_v3 = vrot.slane %v4526_v59, 2  ;;  %v5060_v4 = vpop.f32.mrb[23].mxu0  ;;  %1533 = vrot.lane.b32.xlu0 %v4943_v57, %s4684_s29 }
 0x126   : > { %8580 = vst [vmem:[#allocation31_spill] sm:$0xff] %v5060_v4  ;;  %v1012_v6 = vrot.slane %v5060_v4, 1  ;;  %v1221_v7 = vrot.slane %v5060_v4, 2 }
 0x128   : > { %v5067_v14 = vsel %vm975_vm4, %v1011_v62, %v1012_v6  ;;  %v5070_v15 = vsel %vm1184_vm5, %v1220_v1, %v1221_v7  ;;  %v5073_v16 = vsel %vm975_vm4, %v1012_v6, %v1014_v2  ;;  %v5076_v17 = vsel %vm1184_vm5, %v1221_v7, %v1223_v3  ;;  %v5078_v21 = vpop.f32.mrb[24].mxu0 }
 0x129   : > { %8581 = vst [vmem:[#allocation32_spill] sm:$0xff] %v5067_v14  ;;  %8582 = vst [vmem:[#allocation33_spill] sm:$0xff] %v5070_v15  ;;  %1275 = vrot.lane.b32.xlu1 %v4954_v0, %s4682_s27  ;;  %v5082_v22 = vpop.f32.mrb[25].mxu0  ;;  %v1017_v23 = vrot.slane %v5078_v21, 1  ;;  %v1226_v25 = vrot.slane %v5078_v21, 2  ;;  %1666 = vrot.lane.b32.xlu0 %v4946_v58, %s4685_s30 }
 0x12a   : > { %8583 = vst [vmem:[#allocation34_spill] sm:$0xff] %v5073_v16  ;;  %8584 = vst [vmem:[#allocation35_spill] sm:$0xff] %v5076_v17  ;;  %v1016_v29 = vrot.slane %v5082_v22, 1  ;;  %v1225_v30 = vrot.slane %v5082_v22, 2 }
 0x12b   : > { %8585 = vst [vmem:[#allocation36_spill] sm:$0xff] %v5078_v21  ;;  %8586 = vst [vmem:[#allocation37_spill] sm:$0xff] %v5082_v22 }
 0x12c   : > { %v5090_v31 = vpop.f32.mrb[26].mxu0  ;;  %v5093_v33 = vsel %vm975_vm4, %v1016_v29, %v1017_v23  ;;  %v5096_v35 = vsel %vm1184_vm5, %v1225_v30, %v1226_v25 }
 0x12d   : > { %8587 = vst [vmem:[#allocation38_spill] sm:$0xff] %v5090_v31  ;;  %8588 = vst [vmem:[#allocation39_spill] sm:$0xff] %v5093_v33  ;;  %1535 = vrot.lane.b32.xlu1 %v4951_v63, %s4684_s29  ;;  %v749_v36 = vpop.f32.mrb[27].mxu0  ;;  %v1021_v54 = vrot.slane %v5090_v31, 1  ;;  %v1230_v55 = vrot.slane %v5090_v31, 2  ;;  %1068 = vrot.lane.b32.xlu0 %v4965_v8, %s4681_s26 }
 0x12e   : > { %8589 = vst [vmem:[#allocation40_spill] sm:$0xff] %v5096_v35  ;;  %v1019_v44 = vrot.slane %v749_v36, 1  ;;  %v1228_v45 = vrot.slane %v749_v36, 2 }
 0x130   : > { %v4535_v46 = vpop.f32.mrb[28].mxu0  ;;  %v5103_v47 = vsel %vm975_vm4, %v1017_v23, %v1019_v44  ;;  %v5106_v53 = vsel %vm1184_vm5, %v1226_v25, %v1228_v45 }
 0x131   : > { %8590 = vst [vmem:[#allocation41_spill] sm:$0xff] %v5103_v47  ;;  %8591 = vst [vmem:[#allocation42_spill] sm:$0xff] %v5106_v53  ;;  %1668 = vrot.lane.b32.xlu1 %v4954_v0, %s4685_s30  ;;  %v1024_v59 = vrot.slane %v4535_v46, 1  ;;  %v1233_v62 = vrot.slane %v4535_v46, 2  ;;  %v5112_v1 = vpop.f32.mrb[29].mxu0  ;;  %1277 = vrot.lane.b32.xlu0 %v4968_v9, %s4682_s27 }
 0x132   : > { %8592 = vst [vmem:[#allocation43_spill] sm:$0xff] %v5112_v1  ;;  %v1022_v2 = vrot.slane %v5112_v1, 1  ;;  %v1231_v3 = vrot.slane %v5112_v1, 2 }
 0x134   : > { %v5119_v6 = vsel %vm975_vm4, %v1021_v54, %v1022_v2  ;;  %v5122_v7 = vsel %vm1184_vm5, %v1230_v55, %v1231_v3  ;;  %v5125_v23 = vsel %vm975_vm4, %v1022_v2, %v1024_v59  ;;  %v5128_v25 = vsel %vm1184_vm5, %v1231_v3, %v1233_v62  ;;  %v5132_v29 = vpop.f32.mrb[30].mxu0 }
 0x135   : > { %8593 = vst [vmem:[#allocation44_spill] sm:$0xff] %v5122_v7  ;;  %8594 = vst [vmem:[#allocation45_spill] sm:$0xff] %v5125_v23  ;;  %1405 = vrot.lane.b32.xlu1 %v4959_v5, %s4683_s28  ;;  %v5136_v30 = vpop.f32.mrb[31].mxu0  ;;  %v1027_v55 = vrot.slane %v5132_v29, 1  ;;  %1537 = vrot.lane.b32.xlu0 %v4965_v8, %s4684_s29  ;;  %v1236_v62 = vrot.slane %v5132_v29, 2 }
 0x136   : > { %8595 = vst [vmem:[#allocation46_spill] sm:$0xff] %v5128_v25  ;;  %v1026_v54 = vrot.slane %v5136_v30, 1  ;;  %v1235_v59 = vrot.slane %v5136_v30, 2 }
 0x138   : > { %v5140_v36 = vpop.f32.mrb[32].mxu0  ;;  %v5151_v2 = vsel %vm975_vm4, %v1026_v54, %v1027_v55 }
 0x139   : > { %1070 = vrot.lane.b32.xlu1 %v4971_v10, %s4681_s26  ;;  %v779_v44 = vpop.f32.mrb[33].mxu0  ;;  %1670 = vrot.lane.b32.xlu0 %v4968_v9, %s4685_s30 }
 0x13a   : > { %v1029_v45 = vrot.slane %v779_v44, 1  ;;  %v1238_v46 = vrot.slane %v779_v44, 2  ;;  %v5157_v44 = vsel %vm1184_vm5, %v1235_v59, %v1236_v62  ;;  %v1240_v59 = vrot.slane %v5140_v36, 2 }
 0x13c   : > { %v5154_v3 = vsel %vm975_vm4, %v1027_v55, %v1029_v45  ;;  %v5160_v50 = vsel %vm1184_vm5, %v1236_v62, %v1238_v46  ;;  %v4544_v54 = vpop.f32.mrb[34].mxu0  ;;  %v1031_v55 = vrot.slane %v5140_v36, 1 }
 0x13d   : > { %1279 = vrot.lane.b32.xlu1 %v4974_v11, %s4682_s27  ;;  %1407 = vrot.lane.b32.xlu0 %v4980_v13, %s4683_s28  ;;  %v5170_v45 = vpop.f32.mrb[35].mxu0  ;;  %v1034_v32 = vrot.slane %v4544_v54, 1  ;;  %v1243_v27 = vrot.slane %v4544_v54, 2 }
 0x13e   : > { %v1032_v46 = vrot.slane %v5170_v45, 1  ;;  %v1241_v62 = vrot.slane %v5170_v45, 2 }
 0x140   : > { %v5179_v51 = vsel %vm975_vm4, %v1031_v55, %v1032_v46  ;;  %v5182_v43 = vsel %vm1184_vm5, %v1240_v59, %v1241_v62  ;;  %v5195_v55 = vsel %vm975_vm4, %v1032_v46, %v1034_v32  ;;  %v5198_v59 = vsel %vm1184_vm5, %v1241_v62, %v1243_v27  ;;  %v5212_v27 = vpop.f32.mrb[36].mxu0 }
 0x141   : > { %1409 = vrot.lane.b32.xlu1 %v4976_v12, %s4683_s28  ;;  %1072 = vrot.lane.b32.xlu0 %v4990_v19, %s4681_s26  ;;  %v5216_v32 = vpop.f32.mrb[37].mxu0  ;;  %v1246_v0 = vrot.slane %v5212_v27, 2 }
 0x144   : > { %v5220_v54 = vpop.f32.mrb[38].mxu0 }
 0x145   : > { %1539 = vrot.lane.b32.xlu1 %v4971_v10, %s4684_s29  ;;  %1281 = vrot.lane.b32.xlu0 %v4993_v20, %s4682_s27  ;;  %v809_v46 = vpop.f32.mrb[39].mxu0 }
 0x146   : > { %v1039_v62 = vrot.slane %v809_v46, 1  ;;  %v1248_v24 = vrot.slane %v809_v46, 2 }
 0x149   : > { %1672 = vrot.lane.b32.xlu1 %v4974_v11, %s4685_s30  ;;  %1411 = vrot.lane.b32.xlu0 %v4987_v18, %s4683_s28  ;;  %v1037_v11 = vrot.slane %v5212_v27, 1 }
 0x14b   : > { %v5234_v58 = vsel %vm975_vm4, %v1037_v11, %v1039_v62  ;;  %v1250_v62 = vrot.slane %v5220_v54, 2 }
 0x14d   : > { %1074 = vrot.lane.b32.xlu1 %v5000_v26, %s4681_s26  ;;  %1541 = vrot.lane.b32.xlu0 %v4990_v19, %s4684_s29 }
 0x151   : > { %1283 = vrot.lane.b32.xlu1 %v5003_v28, %s4682_s27  ;;  %1674 = vrot.lane.b32.xlu0 %v4993_v20, %s4685_s30  ;;  %v1245_v20 = vrot.slane %v5216_v32, 2 }
 0x153   : > { %v5237_v46 = vsel %vm1184_vm5, %v1245_v20, %v1246_v0 }
 0x155   : > { %1543 = vrot.lane.b32.xlu1 %v5000_v26, %s4684_s29  ;;  %1076 = vrot.lane.b32.xlu0 %v5015_v37, %s4681_s26  ;;  %v5240_v26 = vsel %vm1184_vm5, %v1246_v0, %v1248_v24  ;;  %v1041_v24 = vrot.slane %v5220_v54, 1 }
 0x159   : > { %1676 = vrot.lane.b32.xlu1 %v5003_v28, %s4685_s30  ;;  %1285 = vrot.lane.b32.xlu0 %v5018_v38, %s4682_s27  ;;  %v1036_v28 = vrot.slane %v5216_v32, 1 }
 0x15b   : > { %v5231_v9 = vsel %vm975_vm4, %v1036_v28, %v1037_v11  ;;  %v4553_v28 = vpop.f32.mrb[40].mxu0 }
 0x15c   : > { %v5250_v11 = vpop.f32.mrb[41].mxu0  ;;  %v1253_v63 = vrot.slane %v4553_v28, 2 }
 0x15d   : > { %1413 = vrot.lane.b32.xlu1 %v5008_v34, %s4683_s28  ;;  %1545 = vrot.lane.b32.xlu0 %v5015_v37, %s4684_s29  ;;  %v1042_v0 = vrot.slane %v5250_v11, 1 }
 0x15f   : > { %v5261_v37 = vsel %vm975_vm4, %v1041_v24, %v1042_v0  ;;  %v1044_v24 = vrot.slane %v4553_v28, 1 }
 0x161   : > { %1078 = vrot.lane.b32.xlu1 %v5021_v39, %s4681_s26  ;;  %1678 = vrot.lane.b32.xlu0 %v5018_v38, %s4685_s30  ;;  %v5252_v20 = vpop.permute.xlu0 %1056  ;;  %v1251_v38 = vrot.slane %v5250_v11, 2 }
 0x162   : > { %8596 = vst [vmem:[#allocation47_spill] sm:$0xff] %v5252_v20 }
 0x165   : > { %1287 = vrot.lane.b32.xlu1 %v5024_v40, %s4682_s27  ;;  %1415 = vrot.lane.b32.xlu0 %v5030_v42, %s4683_s28  ;;  %v5268_v20 = vpop.permute.xlu0 %1265 }
 0x166   : > { %8597 = vst [vmem:[#allocation48_spill] sm:$0xff] %v5268_v20  ;;  %v5287_v20 = vsel %vm975_vm4, %v1042_v0, %v1044_v24 }
 0x169   : > { %1417 = vrot.lane.b32.xlu1 %v5026_v41, %s4683_s28  ;;  %1080 = vrot.lane.b32.xlu0 %v5041_v52, %s4681_s26 }
 0x16d   : > { %1547 = vrot.lane.b32.xlu1 %v5021_v39, %s4684_s29  ;;  %v5264_v39 = vsel %vm1184_vm5, %v1250_v62, %v1251_v38  ;;  %1289 = vrot.lane.b32.xlu0 %v5044_v49, %s4682_s27 }
 0x16f   : > { %v5276_v19 = vpop.permute.xlu0 %1395 }
 0x170   : > { %8599 = vst [vmem:[#allocation50_spill] sm:$0xff] %v5276_v19 }
 0x171   : > { %1680 = vrot.lane.b32.xlu1 %v5024_v40, %s4685_s30  ;;  %1419 = vrot.lane.b32.xlu0 %v5038_v48, %s4683_s28 }
 0x173   : > { %v5270_v10 = vpop.permute.xlu1 %1267  ;;  %v5284_v62 = vpop.permute.xlu0 %1058 }
 0x174   : > { %8598 = vst [vmem:[#allocation49_spill] sm:$0xff] %v5270_v10  ;;  %8601 = vst [vmem:[#allocation52_spill] sm:$0xff] %v5284_v62  ;;  %v5290_v10 = vsel %vm1184_vm5, %v1251_v38, %v1253_v63 }
 0x175   : > { %1082 = vrot.lane.b32.xlu1 %v5051_v60, %s4681_s26  ;;  %1549 = vrot.lane.b32.xlu0 %v5041_v52, %s4684_s29 }
 0x177   : > { %v5278_v8 = vpop.permute.xlu1 %1397  ;;  %v5298_v28 = vpop.permute.xlu0 %1269 }
 0x178   : > { %8600 = vst [vmem:[#allocation51_spill] sm:$0xff] %v5278_v8  ;;  %8603 = vst [vmem:[#allocation54_spill] sm:$0xff] %v5298_v28  ;;  %v5318_v28 = vpop.f32.mrb[42].mxu0 }
 0x179   : > { %1291 = vrot.lane.b32.xlu1 %v5054_v61, %s4682_s27  ;;  %1682 = vrot.lane.b32.xlu0 %v5044_v49, %s4685_s30 }
 0x17b   : > { %v5292_v40 = vpop.permute.xlu1 %1060  ;;  %v5306_v63 = vpop.permute.xlu0 %1529 }
 0x17c   : > { %8602 = vst [vmem:[#allocation53_spill] sm:$0xff] %v5292_v40  ;;  %8605 = vst [vmem:[#allocation56_spill] sm:$0xff] %v5306_v63 }
 0x17d   : > { %1551 = vrot.lane.b32.xlu1 %v5051_v60, %s4684_s29  ;;  %1084 = vrot.lane.b32.xlu0 %v5067_v14, %s4681_s26  ;;  %v1256_v60 = vrot.slane %v5318_v28, 2 }
 0x17f   : > { %v5300_v8 = vpop.permute.xlu1 %1062  ;;  %v5314_v0 = vpop.permute.xlu0 %1662 }
 0x180   : > { %8604 = vst [vmem:[#allocation55_spill] sm:$0xff] %v5300_v8  ;;  %8607 = vst [vmem:[#allocation58_spill] sm:$0xff] %v5314_v0  ;;  %v5322_v8 = vpop.f32.mrb[43].mxu0 }
 0x181   : > { %1684 = vrot.lane.b32.xlu1 %v5054_v61, %s4685_s30  ;;  %1293 = vrot.lane.b32.xlu0 %v5070_v15, %s4682_s27  ;;  %v1047_v61 = vrot.slane %v5318_v28, 1  ;;  %v1255_v49 = vrot.slane %v5322_v8, 2 }
 0x183   : > { %v5308_v38 = vpop.permute.xlu1 %1271  ;;  %v5328_v63 = vpop.permute.xlu0 %1399 }
 0x184   : > { %8606 = vst [vmem:[#allocation57_spill] sm:$0xff] %v5308_v38  ;;  %v5326_v38 = vpop.f32.mrb[44].mxu0  ;;  %8609 = vst [vmem:[#allocation60_spill] sm:$0xff] %v5328_v63 }
 0x185   : > { %1421 = vrot.lane.b32.xlu1 %v5060_v4, %s4683_s28  ;;  %v839_v19 = vpop.f32.mrb[45].mxu0  ;;  %1553 = vrot.lane.b32.xlu0 %v5067_v14, %s4684_s29 }
 0x186   : > { %v1049_v0 = vrot.slane %v839_v19, 1  ;;  %v1258_v62 = vrot.slane %v839_v19, 2  ;;  %v5346_v19 = vsel %vm1184_vm5, %v1255_v49, %v1256_v60  ;;  %v4562_v49 = vpop.f32.mrb[46].mxu0 }
 0x187   : > { %v5316_v24 = vpop.permute.xlu1 %1401  ;;  %v5340_v63 = vpop.permute.xlu0 %1792  ;;  %v1263_v4 = vrot.slane %v4562_v49, 2 }
 0x188   : > { %8608 = vst [vmem:[#allocation59_spill] sm:$0xff] %v5316_v24  ;;  %v1046_v24 = vrot.slane %v5322_v8, 1  ;;  %8611 = vst [vmem:[#allocation62_spill] sm:$0xff] %v5340_v63  ;;  %v5349_v52 = vsel %vm975_vm4, %v1047_v61, %v1049_v0  ;;  %v5352_v14 = vsel %vm1184_vm5, %v1256_v60, %v1258_v62  ;;  %v5368_v60 = vpop.f32.mrb[47].mxu0  ;;  %v1051_v62 = vrot.slane %v5326_v38, 1 }
 0x189   : > { %1086 = vrot.lane.b32.xlu1 %v5073_v16, %s4681_s26  ;;  %1686 = vrot.lane.b32.xlu0 %v5070_v15, %s4685_s30  ;;  %v1052_v0 = vrot.slane %v5368_v60, 1 }
 0x18b   : > { %v5330_v40 = vpop.permute.xlu1 %1531  ;;  %v5360_v63 = vpop.permute.xlu0 %1064  ;;  %v5381_v15 = vsel %vm975_vm4, %v1051_v62, %v1052_v0  ;;  %v1054_v62 = vrot.slane %v4562_v49, 1 }
 0x18c   : > { %8610 = vst [vmem:[#allocation61_spill] sm:$0xff] %v5330_v40  ;;  %v5343_v40 = vsel %vm975_vm4, %v1046_v24, %v1047_v61  ;;  %8613 = vst [vmem:[#allocation64_spill] sm:$0xff] %v5360_v63  ;;  %v1261_v63 = vrot.slane %v5368_v60, 2 }
 0x18d   : > { %1295 = vrot.lane.b32.xlu1 %v5076_v17, %s4682_s27  ;;  %1423 = vrot.lane.b32.xlu0 %v5082_v22, %s4683_s28 }
 0x18f   : > { %v5354_v57 = vpop.permute.xlu1 %1664  ;;  %v5370_v61 = vpop.permute.xlu0 %1273 }
 0x190   : > { %8612 = vst [vmem:[#allocation63_spill] sm:$0xff] %v5354_v57  ;;  %8615 = vst [vmem:[#allocation66_spill] sm:$0xff] %v5370_v61  ;;  %v1260_v57 = vrot.slane %v5326_v38, 2 }
 0x191   : > { %1425 = vrot.lane.b32.xlu1 %v5078_v21, %s4683_s28  ;;  %1088 = vrot.lane.b32.xlu0 %v5093_v33, %s4681_s26 }
 0x193   : > { %v5362_v24 = vpop.permute.xlu1 %1794  ;;  %v5388_v61 = vpop.permute.xlu0 %1403 }
 0x194   : > { %8614 = vst [vmem:[#allocation65_spill] sm:$0xff] %v5362_v24  ;;  %8617 = vst [vmem:[#allocation68_spill] sm:$0xff] %v5388_v61  ;;  %v5407_v61 = vsel %vm975_vm4, %v1052_v0, %v1054_v62 }
 0x195   : > { %1555 = vrot.lane.b32.xlu1 %v5073_v16, %s4684_s29  ;;  %v5384_v16 = vsel %vm1184_vm5, %v1260_v57, %v1261_v63  ;;  %1297 = vrot.lane.b32.xlu0 %v5096_v35, %s4682_s27 }
 0x197   : > { %v5376_v24 = vpop.permute.xlu1 %1066 }
 0x198   : > { %8616 = vst [vmem:[#allocation67_spill] sm:$0xff] %v5376_v24  ;;  %v5396_v24 = vpop.permute.xlu0 %1533 }
 0x199   : > { %1688 = vrot.lane.b32.xlu1 %v5076_v17, %s4685_s30  ;;  %8619 = vst [vmem:[#allocation70_spill] sm:$0xff] %v5396_v24  ;;  %1427 = vrot.lane.b32.xlu0 %v5090_v31, %s4683_s28 }
 0x19b   : > { %v5390_v21 = vpop.permute.xlu1 %1275 }
 0x19c   : > { %8618 = vst [vmem:[#allocation69_spill] sm:$0xff] %v5390_v21  ;;  %v5404_v57 = vpop.permute.xlu0 %1666  ;;  %v5410_v21 = vsel %vm1184_vm5, %v1261_v63, %v1263_v4 }
 0x19d   : > { %1090 = vrot.lane.b32.xlu1 %v5103_v47, %s4681_s26  ;;  %8621 = vst [vmem:[#allocation72_spill] sm:$0xff] %v5404_v57  ;;  %1557 = vrot.lane.b32.xlu0 %v5093_v33, %s4684_s29 }
 0x19f   : > { %v5398_v22 = vpop.permute.xlu1 %1535 }
 0x1a0   : > { %8620 = vst [vmem:[#allocation71_spill] sm:$0xff] %v5398_v22  ;;  %v5418_v49 = vpop.permute.xlu0 %1068 }
 0x1a1   : > { %1299 = vrot.lane.b32.xlu1 %v5106_v53, %s4682_s27  ;;  %8623 = vst [vmem:[#allocation74_spill] sm:$0xff] %v5418_v49  ;;  %1690 = vrot.lane.b32.xlu0 %v5096_v35, %s4685_s30 }
 0x1a3   : > { %v5412_v17 = vpop.permute.xlu1 %1668 }
 0x1a4   : > { %8622 = vst [vmem:[#allocation73_spill] sm:$0xff] %v5412_v17  ;;  %v5426_v4 = vpop.permute.xlu0 %1277  ;;  %v5438_v17 = vpop.f32.mrb[48].mxu0 }
 0x1a5   : > { %1559 = vrot.lane.b32.xlu1 %v5103_v47, %s4684_s29  ;;  %8625 = vst [vmem:[#allocation76_spill] sm:$0xff] %v5426_v4  ;;  %1092 = vrot.lane.b32.xlu0 %v5119_v6, %s4681_s26  ;;  %v5442_v57 = vpop.f32.mrb[49].mxu0  ;;  %v1525_v4 = vrot.slane %v5438_v17, 1 }
 0x1a6   : > { %v1524_v24 = vrot.slane %v5442_v57, 1 }
 0x1a7   : > { %v5420_v22 = vpop.permute.xlu1 %1405 }
 0x1a8   : > { %8624 = vst [vmem:[#allocation75_spill] sm:$0xff] %v5420_v22  ;;  %v5434_v0 = vpop.permute.xlu0 %1537  ;;  %v1658_v22 = vrot.slane %v5438_v17, 2  ;;  %v5461_v33 = vsel %vm975_vm4, %v1524_v24, %v1525_v4 }
 0x1a9   : > { %1692 = vrot.lane.b32.xlu1 %v5106_v53, %s4685_s30  ;;  %8627 = vst [vmem:[#allocation78_spill] sm:$0xff] %v5434_v0  ;;  %1301 = vrot.lane.b32.xlu0 %v5122_v7, %s4682_s27  ;;  %v1657_v0 = vrot.slane %v5442_v57, 2 }
 0x1ab   : > { %v5428_v63 = vpop.permute.xlu1 %1070 }
 0x1ac   : > { %8626 = vst [vmem:[#allocation77_spill] sm:$0xff] %v5428_v63  ;;  %v5450_v63 = vpop.f32.mrb[50].mxu0 }
 0x1ad   : > { %1429 = vrot.lane.b32.xlu1 %v5112_v1, %s4683_s28  ;;  %v869_v49 = vpop.f32.mrb[51].mxu0  ;;  %1561 = vrot.lane.b32.xlu0 %v5119_v6, %s4684_s29  ;;  %v5464_v1 = vsel %vm1184_vm5, %v1657_v0, %v1658_v22 }
 0x1ae   : > { %v1527_v35 = vrot.slane %v869_v49, 1  ;;  %v1660_v47 = vrot.slane %v869_v49, 2 }
 0x1af   : > { %v5436_v62 = vpop.permute.xlu1 %1279 }
 0x1b0   : > { %8628 = vst [vmem:[#allocation79_spill] sm:$0xff] %v5436_v62  ;;  %v5452_v62 = vpop.permute.xlu0 %1670  ;;  %v5467_v31 = vsel %vm975_vm4, %v1525_v4, %v1527_v35  ;;  %v2054_v4 = vrot.slane %v5450_v63, 2 }
 0x1b1   : > { %1094 = vrot.lane.b32.xlu1 %v5125_v23, %s4681_s26  ;;  %8629 = vst [vmem:[#allocation80_spill] sm:$0xff] %v5452_v62  ;;  %v5470_v62 = vsel %vm1184_vm5, %v1658_v22, %v1660_v47  ;;  %1694 = vrot.lane.b32.xlu0 %v5122_v7, %s4685_s30  ;;  %v1921_v47 = vrot.slane %v5450_v63, 1 }
 0x1b3   : > { %v5454_v53 = vpop.permute.xlu1 %1409 }
 0x1b4   : > { %8630 = vst [vmem:[#allocation81_spill] sm:$0xff] %v5454_v53  ;;  %v5472_v53 = vpop.permute.xlu0 %1407 }
 0x1b5   : > { %1303 = vrot.lane.b32.xlu1 %v5128_v25, %s4682_s27  ;;  %8631 = vst [vmem:[#allocation82_spill] sm:$0xff] %v5472_v53  ;;  %1431 = vrot.lane.b32.xlu0 %v5136_v30, %s4683_s28 }
 0x1b7   : > { %v5474_v49 = vpop.permute.xlu1 %1539 }
 0x1b8   : > { %8632 = vst [vmem:[#allocation83_spill] sm:$0xff] %v5474_v49  ;;  %v5480_v24 = vpop.permute.xlu0 %1072  ;;  %v5496_v49 = vpop.f32.mrb[52].mxu0 }
 0x1b9   : > { %1433 = vrot.lane.b32.xlu1 %v5132_v29, %s4683_s28  ;;  %8633 = vst [vmem:[#allocation84_spill] sm:$0xff] %v5480_v24  ;;  %1096 = vrot.lane.b32.xlu0 %v5151_v2, %s4681_s26 }
 0x1bb   : > { %v5482_v0 = vpop.permute.xlu1 %1672 }
 0x1bc   : > { %8634 = vst [vmem:[#allocation85_spill] sm:$0xff] %v5482_v0  ;;  %v5488_v22 = vpop.permute.xlu0 %1281  ;;  %v5500_v0 = vpop.f32.mrb[53].mxu0 }
 0x1bd   : > { %1563 = vrot.lane.b32.xlu1 %v5125_v23, %s4684_s29  ;;  %8635 = vst [vmem:[#allocation86_spill] sm:$0xff] %v5488_v22  ;;  %v8427_v22 = vrot.slane %v5500_v0, 1  ;;  %1305 = vrot.lane.b32.xlu0 %v5157_v44, %s4682_s27 }
 0x1bf   : > { %v5490_v35 = vpop.permute.xlu1 %1074  ;;  %v5513_v7 = vsel %vm975_vm4, %v1921_v47, %v8427_v22 }
 0x1c0   : > { %8636 = vst [vmem:[#allocation87_spill] sm:$0xff] %v5490_v35  ;;  %v5502_v53 = vpop.permute.xlu0 %1411  ;;  %v8428_v35 = vrot.slane %v5500_v0, 2 }
 0x1c1   : > { %1696 = vrot.lane.b32.xlu1 %v5128_v25, %s4685_s30  ;;  %8637 = vst [vmem:[#allocation88_spill] sm:$0xff] %v5502_v53  ;;  %1435 = vrot.lane.b32.xlu0 %v5140_v36, %s4683_s28 }
 0x1c2   : > { %v5518_v25 = vsel %vm1184_vm5, %v2054_v4, %v8428_v35 }
 0x1c3   : > { %v5506_v24 = vpop.permute.xlu1 %1283  ;;  %8639 = vst [vmem:[#allocation90_spill] sm:$0xff] %v5518_v25 }
 0x1c4   : > { %8638 = vst [vmem:[#allocation89_spill] sm:$0xff] %v5506_v24  ;;  %v5522_v53 = vpop.permute.xlu0 %1541  ;;  %v8672_v24 = vrot.slane %v5500_v0, 1 }
 0x1c5   : > { %1098 = vrot.lane.b32.xlu1 %v5154_v3, %s4681_s26  ;;  %8640 = vst [vmem:[#allocation91_spill] sm:$0xff] %v5522_v53  ;;  %1565 = vrot.lane.b32.xlu0 %v5151_v2, %s4684_s29  ;;  %v2057_v53 = vrot.slane %v5496_v49, 2 }
 0x1c7   : > { %v5524_v23 = vpop.permute.xlu1 %1543 }
 0x1c8   : > { %8641 = vst [vmem:[#allocation92_spill] sm:$0xff] %v5524_v23  ;;  %v5530_v47 = vpop.permute.xlu0 %1674 }
 0x1c9   : > { %1307 = vrot.lane.b32.xlu1 %v5160_v50, %s4682_s27  ;;  %8642 = vst [vmem:[#allocation93_spill] sm:$0xff] %v5530_v47  ;;  %1698 = vrot.lane.b32.xlu0 %v5157_v44, %s4685_s30 }
 0x1cb   : > { %v5532_v22 = vpop.permute.xlu1 %1676 }
 0x1cc   : > { %8643 = vst [vmem:[#allocation94_spill] sm:$0xff] %v5532_v22  ;;  %v5538_v4 = vpop.permute.xlu0 %1076 }
 0x1cd   : > { %1567 = vrot.lane.b32.xlu1 %v5154_v3, %s4684_s29  ;;  %8644 = vst [vmem:[#allocation95_spill] sm:$0xff] %v5538_v4  ;;  %1100 = vrot.lane.b32.xlu0 %v5179_v51, %s4681_s26 }
 0x1cf   : > { %v5540_v35 = vpop.permute.xlu1 %1413 }
 0x1d0   : > { %8645 = vst [vmem:[#allocation96_spill] sm:$0xff] %v5540_v35  ;;  %v5546_v23 = vpop.permute.xlu0 %1285 }
 0x1d1   : > { %1700 = vrot.lane.b32.xlu1 %v5160_v50, %s4685_s30  ;;  %8646 = vst [vmem:[#allocation97_spill] sm:$0xff] %v5546_v23  ;;  %1309 = vrot.lane.b32.xlu0 %v5182_v43, %s4682_s27 }
 0x1d3   : > { %v5548_v47 = vpop.permute.xlu1 %1078 }
 0x1d4   : > { %8647 = vst [vmem:[#allocation98_spill] sm:$0xff] %v5548_v47  ;;  %v5554_v22 = vpop.permute.xlu0 %1545 }
 0x1d5   : > { %1437 = vrot.lane.b32.xlu1 %v5170_v45, %s4683_s28  ;;  %8648 = vst [vmem:[#allocation99_spill] sm:$0xff] %v5554_v22  ;;  %1569 = vrot.lane.b32.xlu0 %v5179_v51, %s4684_s29 }
 0x1d7   : > { %v5556_v4 = vpop.permute.xlu1 %1287 }
 0x1d8   : > { %8649 = vst [vmem:[#allocation100_spill] sm:$0xff] %v5556_v4  ;;  %v5562_v35 = vpop.permute.xlu0 %1678 }
 0x1d9   : > { %1102 = vrot.lane.b32.xlu1 %v5195_v55, %s4681_s26  ;;  %8650 = vst [vmem:[#allocation101_spill] sm:$0xff] %v5562_v35  ;;  %1702 = vrot.lane.b32.xlu0 %v5182_v43, %s4685_s30 }
 0x1db   : > { %v5564_v23 = vpop.permute.xlu1 %1417 }
 0x1dc   : > { %8651 = vst [vmem:[#allocation102_spill] sm:$0xff] %v5564_v23  ;;  %v5570_v47 = vpop.permute.xlu0 %1415 }
 0x1dd   : > { %1311 = vrot.lane.b32.xlu1 %v5198_v59, %s4682_s27  ;;  %8652 = vst [vmem:[#allocation103_spill] sm:$0xff] %v5570_v47  ;;  %1439 = vrot.lane.b32.xlu0 %v5216_v32, %s4683_s28 }
 0x1df   : > { %v5572_v22 = vpop.permute.xlu1 %1547 }
 0x1e0   : > { %8653 = vst [vmem:[#allocation104_spill] sm:$0xff] %v5572_v22  ;;  %v5578_v4 = vpop.permute.xlu0 %1080 }
 0x1e1   : > { %1441 = vrot.lane.b32.xlu1 %v5212_v27, %s4683_s28  ;;  %8654 = vst [vmem:[#allocation105_spill] sm:$0xff] %v5578_v4  ;;  %1104 = vrot.lane.b32.xlu0 %v5231_v9, %s4681_s26 }
 0x1e3   : > { %v5580_v35 = vpop.permute.xlu1 %1680 }
 0x1e4   : > { %8655 = vst [vmem:[#allocation106_spill] sm:$0xff] %v5580_v35  ;;  %v5586_v23 = vpop.permute.xlu0 %1289 }
 0x1e5   : > { %1571 = vrot.lane.b32.xlu1 %v5195_v55, %s4684_s29  ;;  %8656 = vst [vmem:[#allocation107_spill] sm:$0xff] %v5586_v23  ;;  %1313 = vrot.lane.b32.xlu0 %v5237_v46, %s4682_s27 }
 0x1e7   : > { %v5588_v47 = vpop.permute.xlu1 %1082 }
 0x1e8   : > { %8657 = vst [vmem:[#allocation108_spill] sm:$0xff] %v5588_v47  ;;  %v5594_v22 = vpop.permute.xlu0 %1419 }
 0x1e9   : > { %1704 = vrot.lane.b32.xlu1 %v5198_v59, %s4685_s30  ;;  %8658 = vst [vmem:[#allocation109_spill] sm:$0xff] %v5594_v22  ;;  %1443 = vrot.lane.b32.xlu0 %v5220_v54, %s4683_s28 }
 0x1eb   : > { %v5596_v4 = vpop.permute.xlu1 %1291 }
 0x1ec   : > { %8659 = vst [vmem:[#allocation110_spill] sm:$0xff] %v5596_v4  ;;  %v5602_v35 = vpop.permute.xlu0 %1549 }
 0x1ed   : > { %1106 = vrot.lane.b32.xlu1 %v5234_v58, %s4681_s26  ;;  %8660 = vst [vmem:[#allocation111_spill] sm:$0xff] %v5602_v35  ;;  %1573 = vrot.lane.b32.xlu0 %v5231_v9, %s4684_s29 }
 0x1ef   : > { %v5604_v23 = vpop.permute.xlu1 %1551 }
 0x1f0   : > { %8661 = vst [vmem:[#allocation112_spill] sm:$0xff] %v5604_v23  ;;  %v5610_v47 = vpop.permute.xlu0 %1682 }
 0x1f1   : > { %1315 = vrot.lane.b32.xlu1 %v5240_v26, %s4682_s27  ;;  %8662 = vst [vmem:[#allocation113_spill] sm:$0xff] %v5610_v47  ;;  %1706 = vrot.lane.b32.xlu0 %v5237_v46, %s4685_s30 }
 0x1f3   : > { %v5612_v22 = vpop.permute.xlu1 %1684 }
 0x1f4   : > { %8663 = vst [vmem:[#allocation114_spill] sm:$0xff] %v5612_v22  ;;  %v5618_v4 = vpop.permute.xlu0 %1084 }
 0x1f5   : > { %1575 = vrot.lane.b32.xlu1 %v5234_v58, %s4684_s29  ;;  %8664 = vst [vmem:[#allocation115_spill] sm:$0xff] %v5618_v4  ;;  %1108 = vrot.lane.b32.xlu0 %v5261_v37, %s4681_s26 }
 0x1f7   : > { %v5620_v35 = vpop.permute.xlu1 %1421 }
 0x1f8   : > { %8665 = vst [vmem:[#allocation116_spill] sm:$0xff] %v5620_v35  ;;  %v5626_v23 = vpop.permute.xlu0 %1293  ;;  %v1924_v35 = vrot.slane %v5496_v49, 1 }
 0x1f9   : > { %1708 = vrot.lane.b32.xlu1 %v5240_v26, %s4685_s30  ;;  %8666 = vst [vmem:[#allocation117_spill] sm:$0xff] %v5626_v23  ;;  %1317 = vrot.lane.b32.xlu0 %v5264_v39, %s4682_s27 }
 0x1fb   : > { %v5628_v47 = vpop.permute.xlu1 %1086 }
 0x1fc   : > { %8667 = vst [vmem:[#allocation118_spill] sm:$0xff] %v5628_v47  ;;  %v5634_v22 = vpop.permute.xlu0 %1553 }
 0x1fd   : > { %1445 = vrot.lane.b32.xlu1 %v5250_v11, %s4683_s28  ;;  %8668 = vst [vmem:[#allocation119_spill] sm:$0xff] %v5634_v22  ;;  %v5651_v22 = vsel %vm975_vm4, %v8672_v24, %v1924_v35  ;;  %1577 = vrot.lane.b32.xlu0 %v5261_v37, %s4684_s29 }
 0x1ff   : > { %v5636_v4 = vpop.permute.xlu1 %1295 }
 0x200   : > { %8669 = vst [vmem:[#allocation120_spill] sm:$0xff] %v5636_v4  ;;  %v5644_v23 = vpop.permute.xlu0 %1686  ;;  %v8673_v4 = vrot.slane %v5500_v0, 2 }
 0x201   : > { %1110 = vrot.lane.b32.xlu1 %v5287_v20, %s4681_s26  ;;  %8670 = vst [vmem:[#allocation121_spill] sm:$0xff] %v5644_v23  ;;  %1710 = vrot.lane.b32.xlu0 %v5264_v39, %s4685_s30 }
 0x202   : > { %v5656_v25 = vsel %vm1184_vm5, %v8673_v4, %v2057_v53 }
 0x203   : > { %v5646_v47 = vpop.permute.xlu1 %1425 }
 0x204   : > { %8671 = vst [vmem:[#allocation122_spill] sm:$0xff] %v5646_v47  ;;  %v5662_v49 = vpop.permute.xlu0 %1423 }
 0x205   : > { %1319 = vrot.lane.b32.xlu1 %v5290_v10, %s4682_s27  ;;  %8674 = vst [vmem:[#allocation123_spill] sm:$0xff] %v5662_v49  ;;  %1447 = vrot.lane.b32.xlu0 %v5322_v8, %s4683_s28 }
 0x207   : > { %v5664_v23 = vpop.permute.xlu1 %1555 }
 0x208   : > { %8675 = vst [vmem:[#allocation124_spill] sm:$0xff] %v5664_v23  ;;  %v5670_v24 = vpop.permute.xlu0 %1088 }
 0x209   : > { %1449 = vrot.lane.b32.xlu1 %v5318_v28, %s4683_s28  ;;  %8676 = vst [vmem:[#allocation125_spill] sm:$0xff] %v5670_v24  ;;  %1112 = vrot.lane.b32.xlu0 %v5343_v40, %s4681_s26 }
 0x20b   : > { %v5672_v53 = vpop.permute.xlu1 %1688 }
 0x20c   : > { %8677 = vst [vmem:[#allocation126_spill] sm:$0xff] %v5672_v53  ;;  %v5678_v35 = vpop.permute.xlu0 %1297 }
 0x20d   : > { %1579 = vrot.lane.b32.xlu1 %v5287_v20, %s4684_s29  ;;  %8678 = vst [vmem:[#allocation127_spill] sm:$0xff] %v5678_v35  ;;  %1321 = vrot.lane.b32.xlu0 %v5346_v19, %s4682_s27 }
 0x20f   : > { %v5680_v4 = vpop.permute.xlu1 %1090 }
 0x210   : > { %8679 = vst [vmem:[#allocation128_spill] sm:$0xff] %v5680_v4  ;;  %v5686_v49 = vpop.permute.xlu0 %1427 }
 0x211   : > { %1712 = vrot.lane.b32.xlu1 %v5290_v10, %s4685_s30  ;;  %8680 = vst [vmem:[#allocation129_spill] sm:$0xff] %v5686_v49  ;;  %1451 = vrot.lane.b32.xlu0 %v5326_v38, %s4683_s28 }
 0x213   : > { %v5688_v47 = vpop.permute.xlu1 %1299 }
 0x214   : > { %8681 = vst [vmem:[#allocation130_spill] sm:$0xff] %v5688_v47  ;;  %v5694_v53 = vpop.permute.xlu0 %1557 }
 0x215   : > { %1114 = vrot.lane.b32.xlu1 %v5349_v52, %s4681_s26  ;;  %8682 = vst [vmem:[#allocation131_spill] sm:$0xff] %v5694_v53  ;;  %1581 = vrot.lane.b32.xlu0 %v5343_v40, %s4684_s29 }
 0x217   : > { %v5696_v35 = vpop.permute.xlu1 %1559 }
 0x218   : > { %8683 = vst [vmem:[#allocation132_spill] sm:$0xff] %v5696_v35  ;;  %v5702_v4 = vpop.permute.xlu0 %1690 }
 0x219   : > { %1323 = vrot.lane.b32.xlu1 %v5352_v14, %s4682_s27  ;;  %8684 = vst [vmem:[#allocation133_spill] sm:$0xff] %v5702_v4  ;;  %1714 = vrot.lane.b32.xlu0 %v5346_v19, %s4685_s30 }
 0x21b   : > { %v5704_v49 = vpop.permute.xlu1 %1692 }
 0x21c   : > { %8685 = vst [vmem:[#allocation134_spill] sm:$0xff] %v5704_v49  ;;  %v5710_v47 = vpop.permute.xlu0 %1092 }
 0x21d   : > { %1583 = vrot.lane.b32.xlu1 %v5349_v52, %s4684_s29  ;;  %8686 = vst [vmem:[#allocation135_spill] sm:$0xff] %v5710_v47  ;;  %1116 = vrot.lane.b32.xlu0 %v5381_v15, %s4681_s26 }
 0x21f   : > { %v5712_v53 = vpop.permute.xlu1 %1429 }
 0x220   : > { %8687 = vst [vmem:[#allocation136_spill] sm:$0xff] %v5712_v53  ;;  %v5718_v35 = vpop.permute.xlu0 %1301 }
 0x221   : > { %1716 = vrot.lane.b32.xlu1 %v5352_v14, %s4685_s30  ;;  %8688 = vst [vmem:[#allocation137_spill] sm:$0xff] %v5718_v35  ;;  %1325 = vrot.lane.b32.xlu0 %v5384_v16, %s4682_s27 }
 0x223   : > { %v5720_v4 = vpop.permute.xlu1 %1094 }
 0x224   : > { %8689 = vst [vmem:[#allocation138_spill] sm:$0xff] %v5720_v4  ;;  %v5726_v49 = vpop.permute.xlu0 %1561 }
 0x225   : > { %1453 = vrot.lane.b32.xlu1 %v5368_v60, %s4683_s28  ;;  %8690 = vst [vmem:[#allocation139_spill] sm:$0xff] %v5726_v49  ;;  %1585 = vrot.lane.b32.xlu0 %v5381_v15, %s4684_s29 }
 0x227   : > { %v5728_v47 = vpop.permute.xlu1 %1303 }
 0x228   : > { %8691 = vst [vmem:[#allocation140_spill] sm:$0xff] %v5728_v47  ;;  %v5734_v53 = vpop.permute.xlu0 %1694 }
 0x229   : > { %1118 = vrot.lane.b32.xlu1 %v5407_v61, %s4681_s26  ;;  %8692 = vst [vmem:[#allocation141_spill] sm:$0xff] %v5734_v53  ;;  %1718 = vrot.lane.b32.xlu0 %v5384_v16, %s4685_s30 }
 0x22b   : > { %v5736_v35 = vpop.permute.xlu1 %1433 }
 0x22c   : > { %8693 = vst [vmem:[#allocation142_spill] sm:$0xff] %v5736_v35  ;;  %v5742_v4 = vpop.permute.xlu0 %1431 }
 0x22d   : > { %1327 = vrot.lane.b32.xlu1 %v5410_v21, %s4682_s27  ;;  %8694 = vst [vmem:[#allocation143_spill] sm:$0xff] %v5742_v4  ;;  %1455 = vrot.lane.b32.xlu0 %v5442_v57, %s4683_s28 }
 0x22f   : > { %v5744_v49 = vpop.permute.xlu1 %1563 }
 0x230   : > { %8695 = vst [vmem:[#allocation144_spill] sm:$0xff] %v5744_v49  ;;  %v5750_v47 = vpop.permute.xlu0 %1096 }
 0x231   : > { %1457 = vrot.lane.b32.xlu1 %v5438_v17, %s4683_s28  ;;  %8696 = vst [vmem:[#allocation145_spill] sm:$0xff] %v5750_v47  ;;  %1589 = vrot.lane.b32.xlu0 %v5461_v33, %s4684_s29 }
 0x233   : > { %v5752_v53 = vpop.permute.xlu1 %1696 }
 0x234   : > { %8697 = vst [vmem:[#allocation146_spill] sm:$0xff] %v5752_v53  ;;  %v5758_v35 = vpop.permute.xlu0 %1305  ;;  %v2251_v53 = vld [vmem:[#allocation2] sm:$0xff] }
 0x235   : > { %1587 = vrot.lane.b32.xlu1 %v5407_v61, %s4684_s29  ;;  %8698 = vst [vmem:[#allocation147_spill] sm:$0xff] %v5758_v35  ;;  %1722 = vrot.lane.b32.xlu0 %v5464_v1, %s4685_s30 }
 0x236   : > { %4574 = vmatprep.mubr.msk.f32.mxu1 %vm225_vm1, %v2251_v53 }
 0x237   : > { %v5760_v4 = vpop.permute.xlu1 %1098 }
 0x238   : > { %8699 = vst [vmem:[#allocation148_spill] sm:$0xff] %v5760_v4  ;;  %v5766_v49 = vpop.permute.xlu0 %1435  ;;  %v2305_v4 = vld [vmem:[%s8377_s3] sm:$0xf] }
 0x239   : > { %1720 = vrot.lane.b32.xlu1 %v5410_v21, %s4685_s30  ;;  %8700 = vst [vmem:[#allocation149_spill] sm:$0xff] %v5766_v49  ;;  %4572 = vmatprep.subr.msk.mxu1 %vm549_vm0, %v2305_v4 }
 0x23a   : > { %4573 = vmatpush3.msk.msra.mxu1 %vm549_vm0, %v2305_v4  ;;  %1796 = vrot.lane.b32.xlu0 %v4940_v56, %s4686_s6 }
 0x23b   : > { %v5768_v47 = vpop.permute.xlu1 %1307 }
 0x23c   : > { %8701 = vst [vmem:[#allocation150_spill] sm:$0xff] %v5768_v47  ;;  %v5777_v35 = vpop.permute.xlu0 %1565  ;;  %v2252_v47 = vld [vmem:[#allocation2 + $0x8] sm:$0xff] }
 0x23d   : > { %1798 = vrot.lane.b32.xlu1 %v4959_v5, %s4686_s6  ;;  %8702 = vst [vmem:[#allocation151_spill] sm:$0xff] %v5777_v35  ;;  %4575 = vmatmul.mubr.msk.f32.vlgmr.msra.gmra.mrb[0].mxu1 %vm225_vm1, %v2252_v47 }
 0x23e   : > { %1800 = vrot.lane.b32.xlu0 %v4980_v13, %s4686_s6 }
 0x23f   : > { %v5780_v24 = vpop.permute.xlu1 %1567 }
 0x240   : > { %8703 = vst [vmem:[#allocation152_spill] sm:$0xff] %v5780_v24  ;;  %v5789_v49 = vpop.permute.xlu0 %1698  ;;  %v8715_v24 = vld [vmem:[#allocation31_spill] sm:$0xff] }
 0x241   : > { %1591 = vrot.lane.b32.xlu1 %v5467_v31, %s4684_s29  ;;  %8704 = vst [vmem:[#allocation153_spill] sm:$0xff] %v5789_v49 }
 0x242   : > { %1804 = vrot.lane.b32.xlu0 %v4987_v18, %s4686_s6 }
 0x243   : > { %v5791_v35 = vpop.permute.xlu1 %1700 }
 0x244   : > { %8705 = vst [vmem:[#allocation154_spill] sm:$0xff] %v5791_v35  ;;  %v5797_v53 = vpop.permute.xlu0 %1100 }
 0x245   : > { %1724 = vrot.lane.b32.xlu1 %v5470_v62, %s4685_s30  ;;  %8706 = vst [vmem:[#allocation155_spill] sm:$0xff] %v5797_v53 }
 0x246   : > { %1808 = vrot.lane.b32.xlu0 %v5030_v42, %s4686_s6 }
 0x247   : > { %v5799_v4 = vpop.permute.xlu1 %1437 }
 0x248   : > { %8707 = vst [vmem:[#allocation156_spill] sm:$0xff] %v5799_v4  ;;  %v5805_v47 = vpop.permute.xlu0 %1309 }
 0x249   : > { %1802 = vrot.lane.b32.xlu1 %v4976_v12, %s4686_s6  ;;  %8708 = vst [vmem:[#allocation157_spill] sm:$0xff] %v5805_v47 }
 0x24a   : > { %1812 = vrot.lane.b32.xlu0 %v5038_v48, %s4686_s6  ;;  %v8719_v48 = vld [vmem:[#allocation36_spill] sm:$0xff] }
 0x24b   : > { %v5807_v49 = vpop.permute.xlu1 %1102 }
 0x24c   : > { %8709 = vst [vmem:[#allocation158_spill] sm:$0xff] %v5807_v49  ;;  %v5813_v35 = vpop.permute.xlu0 %1569  ;;  %v8714_v49 = vld [vmem:[#allocation37_spill] sm:$0xff] }
 0x24d   : > { %1806 = vrot.lane.b32.xlu1 %v5008_v34, %s4686_s6  ;;  %8710 = vst [vmem:[#allocation159_spill] sm:$0xff] %v5813_v35 }
 0x24e   : > { %1816 = vrot.lane.b32.xlu0 %v8714_v49, %s4686_s6 }
 0x24f   : > { %v5815_v53 = vpop.permute.xlu1 %1311 }
 0x250   : > { %8711 = vst [vmem:[#allocation160_spill] sm:$0xff] %v5815_v53  ;;  %v5821_v4 = vpop.permute.xlu0 %1702  ;;  %v8718_v53 = vld [vmem:[#allocation38_spill] sm:$0xff] }
 0x251   : > { %1810 = vrot.lane.b32.xlu1 %v5026_v41, %s4686_s6  ;;  %8712 = vst [vmem:[#allocation161_spill] sm:$0xff] %v5821_v4 }
 0x252   : > { %1820 = vrot.lane.b32.xlu0 %v8718_v53, %s4686_s6 }
 0x253   : > { %v5823_v47 = vpop.permute.xlu1 %1441 }
 0x254   : > { %8713 = vst [vmem:[#allocation162_spill] sm:$0xff] %v5823_v47  ;;  %v5829_v23 = vpop.permute.xlu0 %1439  ;;  %v8722_v47 = vld [vmem:[#allocation43_spill] sm:$0xff] }
 0x255   : > { %1814 = vrot.lane.b32.xlu1 %v8715_v24, %s4686_s6  ;;  %8716 = vst [vmem:[#allocation31_spill] sm:$0xff] %v5829_v23 }
 0x256   : > { %1824 = vrot.lane.b32.xlu0 %v5136_v30, %s4686_s6 }
 0x257   : > { %v5831_v35 = vpop.permute.xlu1 %1571 }
 0x258   : > { %8717 = vst [vmem:[#allocation163_spill] sm:$0xff] %v5831_v35  ;;  %v5837_v42 = vpop.permute.xlu0 %1104 }
 0x259   : > { %1818 = vrot.lane.b32.xlu1 %v8719_v48, %s4686_s6  ;;  %8720 = vst [vmem:[#allocation38_spill] sm:$0xff] %v5837_v42 }
 0x25a   : > { %1828 = vrot.lane.b32.xlu0 %v5140_v36, %s4686_s6 }
 0x25b   : > { %v5839_v4 = vpop.permute.xlu1 %1704 }
 0x25c   : > { %8721 = vst [vmem:[#allocation36_spill] sm:$0xff] %v5839_v4  ;;  %v5845_v49 = vpop.permute.xlu0 %1313 }
 0x25d   : > { %1822 = vrot.lane.b32.xlu1 %v8722_v47, %s4686_s6  ;;  %8723 = vst [vmem:[#allocation43_spill] sm:$0xff] %v5845_v49 }
 0x25e   : > { %1832 = vrot.lane.b32.xlu0 %v5216_v32, %s4686_s6 }
 0x25f   : > { %v5847_v23 = vpop.permute.xlu1 %1106 }
 0x260   : > { %8724 = vst [vmem:[#allocation164_spill] sm:$0xff] %v5847_v23  ;;  %v5853_v35 = vpop.permute.xlu0 %1443 }
 0x261   : > { %1826 = vrot.lane.b32.xlu1 %v5132_v29, %s4686_s6  ;;  %8725 = vst [vmem:[#allocation165_spill] sm:$0xff] %v5853_v35 }
 0x262   : > { %1836 = vrot.lane.b32.xlu0 %v5220_v54, %s4686_s6 }
 0x263   : > { %v5855_v42 = vpop.permute.xlu1 %1315 }
 0x264   : > { %8726 = vst [vmem:[#allocation166_spill] sm:$0xff] %v5855_v42  ;;  %v5861_v4 = vpop.permute.xlu0 %1573 }
 0x265   : > { %1830 = vrot.lane.b32.xlu1 %v5170_v45, %s4686_s6  ;;  %8727 = vst [vmem:[#allocation167_spill] sm:$0xff] %v5861_v4 }
 0x266   : > { %1840 = vrot.lane.b32.xlu0 %v5322_v8, %s4686_s6 }
 0x267   : > { %v5863_v49 = vpop.permute.xlu1 %1575 }
 0x268   : > { %8728 = vst [vmem:[#allocation168_spill] sm:$0xff] %v5863_v49  ;;  %v5869_v23 = vpop.permute.xlu0 %1706 }
 0x269   : > { %1834 = vrot.lane.b32.xlu1 %v5212_v27, %s4686_s6  ;;  %8729 = vst [vmem:[#allocation169_spill] sm:$0xff] %v5869_v23 }
 0x26a   : > { %1844 = vrot.lane.b32.xlu0 %v5326_v38, %s4686_s6 }
 0x26b   : > { %v5871_v35 = vpop.permute.xlu1 %1708 }
 0x26c   : > { %8730 = vst [vmem:[#allocation170_spill] sm:$0xff] %v5871_v35  ;;  %v5877_v42 = vpop.permute.xlu0 %1108 }
 0x26d   : > { %1838 = vrot.lane.b32.xlu1 %v5250_v11, %s4686_s6  ;;  %8731 = vst [vmem:[#allocation171_spill] sm:$0xff] %v5877_v42 }
 0x26e   : > { %1848 = vrot.lane.b32.xlu0 %v5442_v57, %s4686_s6  ;;  %v8739_v57 = vld [vmem:[#allocation9_spill] sm:$0xff] }
 0x26f   : > { %v5879_v4 = vpop.permute.xlu1 %1445 }
 0x270   : > { %8732 = vst [vmem:[#allocation172_spill] sm:$0xff] %v5879_v4  ;;  %v5885_v49 = vpop.permute.xlu0 %1317 }
 0x271   : > { %1842 = vrot.lane.b32.xlu1 %v5318_v28, %s4686_s6  ;;  %8733 = vst [vmem:[#allocation173_spill] sm:$0xff] %v5885_v49 }
 0x272   : > { %1852 = vrot.lane.b32.xlu0 %v5450_v63, %s4686_s6  ;;  %v8742_v63 = vld [vmem:[#allocation13_spill] sm:$0xff] }
 0x273   : > { %v5887_v23 = vpop.permute.xlu1 %1110 }
 0x274   : > { %8734 = vst [vmem:[#allocation174_spill] sm:$0xff] %v5887_v23  ;;  %v5893_v35 = vpop.permute.xlu0 %1577  ;;  %v8746_v23 = vld [vmem:[#allocation17_spill] sm:$0xff] }
 0x275   : > { %1846 = vrot.lane.b32.xlu1 %v5368_v60, %s4686_s6  ;;  %8735 = vst [vmem:[#allocation175_spill] sm:$0xff] %v5893_v35 }
 0x276   : > { %1926 = vrot.lane.b32.xlu0 %v8739_v57, %s4687_s9  ;;  %v8747_v57 = vld [vmem:[#allocation15_spill] sm:$0xff] }
 0x277   : > { %v5895_v42 = vpop.permute.xlu1 %1319 }
 0x278   : > { %8736 = vst [vmem:[#allocation176_spill] sm:$0xff] %v5895_v42  ;;  %v5901_v4 = vpop.permute.xlu0 %1710 }
 0x279   : > { %1850 = vrot.lane.b32.xlu1 %v5438_v17, %s4686_s6  ;;  %8737 = vst [vmem:[#allocation177_spill] sm:$0xff] %v5901_v4  ;;  %v8743_v17 = vld [vmem:[#allocation11_spill] sm:$0xff] }
 0x27a   : > { %1930 = vrot.lane.b32.xlu0 %v8742_v63, %s4687_s9  ;;  %v8751_v63 = vld [vmem:[#allocation19_spill] sm:$0xff] }
 0x27b   : > { %v5903_v49 = vpop.permute.xlu1 %1449 }
 0x27c   : > { %8738 = vst [vmem:[#allocation178_spill] sm:$0xff] %v5903_v49  ;;  %v5909_v35 = vpop.permute.xlu0 %1447 }
 0x27d   : > { %1854 = vrot.lane.b32.xlu1 %v5500_v0, %s4686_s6  ;;  %8740 = vst [vmem:[#allocation9_spill] sm:$0xff] %v5909_v35 }
 0x27e   : > { %1934 = vrot.lane.b32.xlu0 %v8746_v23, %s4687_s9  ;;  %v8755_v23 = vld [vmem:[#allocation23_spill] sm:$0xff] }
 0x27f   : > { %v5911_v42 = vpop.permute.xlu1 %1579 }
 0x280   : > { %8741 = vst [vmem:[#allocation179_spill] sm:$0xff] %v5911_v42  ;;  %v5917_v4 = vpop.permute.xlu0 %1112  ;;  %v8750_v42 = vld [vmem:[#allocation21_spill] sm:$0xff] }
 0x281   : > { %1928 = vrot.lane.b32.xlu1 %v8743_v17, %s4687_s9  ;;  %8744 = vst [vmem:[#allocation13_spill] sm:$0xff] %v5917_v4 }
 0x282   : > { %1938 = vrot.lane.b32.xlu0 %v8750_v42, %s4687_s9  ;;  %v8759_v42 = vld [vmem:[#allocation29_spill] sm:$0xff] }
 0x283   : > { %v5919_v49 = vpop.permute.xlu1 %1712 }
 0x284   : > { %8745 = vst [vmem:[#allocation11_spill] sm:$0xff] %v5919_v49  ;;  %v5925_v0 = vpop.permute.xlu0 %1321  ;;  %v8754_v49 = vld [vmem:[#allocation27_spill] sm:$0xff] }
 0x285   : > { %1932 = vrot.lane.b32.xlu1 %v8747_v57, %s4687_s9  ;;  %8748 = vst [vmem:[#allocation17_spill] sm:$0xff] %v5925_v0 }
 0x286   : > { %1942 = vrot.lane.b32.xlu0 %v8754_v49, %s4687_s9  ;;  %v8763_v49 = vld [vmem:[#allocation34_spill] sm:$0xff] }
 0x287   : > { %v5927_v35 = vpop.permute.xlu1 %1114 }
 0x288   : > { %8749 = vst [vmem:[#allocation15_spill] sm:$0xff] %v5927_v35  ;;  %v5933_v17 = vpop.permute.xlu0 %1451  ;;  %v8758_v35 = vld [vmem:[#allocation32_spill] sm:$0xff] }
 0x289   : > { %1936 = vrot.lane.b32.xlu1 %v8751_v63, %s4687_s9  ;;  %8752 = vst [vmem:[#allocation21_spill] sm:$0xff] %v5933_v17 }
 0x28a   : > { %1946 = vrot.lane.b32.xlu0 %v8758_v35, %s4687_s9  ;;  %v8766_v35 = vld [vmem:[#allocation41_spill] sm:$0xff] }
 0x28b   : > { %v5935_v4 = vpop.permute.xlu1 %1323 }
 0x28c   : > { %8753 = vst [vmem:[#allocation19_spill] sm:$0xff] %v5935_v4  ;;  %v5941_v57 = vpop.permute.xlu0 %1581  ;;  %v8762_v4 = vld [vmem:[#allocation39_spill] sm:$0xff] }
 0x28d   : > { %1940 = vrot.lane.b32.xlu1 %v8755_v23, %s4687_s9  ;;  %8756 = vst [vmem:[#allocation27_spill] sm:$0xff] %v5941_v57 }
 0x28e   : > { %1950 = vrot.lane.b32.xlu0 %v8762_v4, %s4687_s9  ;;  %v8769_v4 = vld [vmem:[#allocation45_spill] sm:$0xff] }
 0x28f   : > { %v5943_v0 = vpop.permute.xlu1 %1583 }
 0x290   : > { %8757 = vst [vmem:[#allocation23_spill] sm:$0xff] %v5943_v0  ;;  %v5949_v63 = vpop.permute.xlu0 %1714 }
 0x291   : > { %1944 = vrot.lane.b32.xlu1 %v8759_v42, %s4687_s9  ;;  %8760 = vst [vmem:[#allocation32_spill] sm:$0xff] %v5949_v63 }
 0x292   : > { %1954 = vrot.lane.b32.xlu0 %v5119_v6, %s4687_s9 }
 0x293   : > { %v5951_v17 = vpop.permute.xlu1 %1716 }
 0x294   : > { %8761 = vst [vmem:[#allocation29_spill] sm:$0xff] %v5951_v17  ;;  %v5957_v23 = vpop.permute.xlu0 %1116 }
 0x295   : > { %1948 = vrot.lane.b32.xlu1 %v8763_v49, %s4687_s9  ;;  %8764 = vst [vmem:[#allocation39_spill] sm:$0xff] %v5957_v23 }
 0x296   : > { %1958 = vrot.lane.b32.xlu0 %v5151_v2, %s4687_s9 }
 0x297   : > { %v5959_v57 = vpop.permute.xlu1 %1453 }
 0x298   : > { %8765 = vst [vmem:[#allocation34_spill] sm:$0xff] %v5959_v57  ;;  %v5965_v42 = vpop.permute.xlu0 %1325  ;;  %v8795_v57 = vld [vmem:[#allocation33_spill] sm:$0xff] }
 0x299   : > { %1952 = vrot.lane.b32.xlu1 %v8766_v35, %s4687_s9  ;;  %8767 = vst [vmem:[#allocation41_spill] sm:$0xff] %v5965_v42  ;;  %v8803_v42 = vld [vmem:[#allocation44_spill] sm:$0xff] }
 0x29a   : > { %1962 = vrot.lane.b32.xlu0 %v5179_v51, %s4687_s9 }
 0x29b   : > { %v5967_v0 = vpop.permute.xlu1 %1118 }
 0x29c   : > { %8768 = vst [vmem:[#allocation180_spill] sm:$0xff] %v5967_v0  ;;  %v5973_v49 = vpop.permute.xlu0 %1585 }
 0x29d   : > { %1956 = vrot.lane.b32.xlu1 %v8769_v4, %s4687_s9  ;;  %8770 = vst [vmem:[#allocation45_spill] sm:$0xff] %v5973_v49 }
 0x29e   : > { %1966 = vrot.lane.b32.xlu0 %v5231_v9, %s4687_s9 }
 0x29f   : > { %v5975_v17 = vpop.permute.xlu1 %1327 }
 0x2a0   : > { %8771 = vst [vmem:[#allocation181_spill] sm:$0xff] %v5975_v17  ;;  %v5981_v6 = vpop.permute.xlu0 %1718 }
 0x2a1   : > { %1960 = vrot.lane.b32.xlu1 %v5154_v3, %s4687_s9  ;;  %8772 = vst [vmem:[#allocation182_spill] sm:$0xff] %v5981_v6  ;;  %v8799_v6 = vld [vmem:[#allocation40_spill] sm:$0xff] }
 0x2a2   : > { %1970 = vrot.lane.b32.xlu0 %v5261_v37, %s4687_s9 }
 0x2a3   : > { %v5983_v35 = vpop.permute.xlu1 %1457 }
 0x2a4   : > { %8773 = vst [vmem:[#allocation183_spill] sm:$0xff] %v5983_v35  ;;  %v5989_v2 = vpop.permute.xlu0 %1455  ;;  %v8784_v35 = vld [vmem:[#allocation18_spill] sm:$0xff] }
 0x2a5   : > { %1964 = vrot.lane.b32.xlu1 %v5195_v55, %s4687_s9  ;;  %8774 = vst [vmem:[#allocation184_spill] sm:$0xff] %v5989_v2 }
 0x2a6   : > { %1974 = vrot.lane.b32.xlu0 %v5343_v40, %s4687_s9 }
 0x2a7   : > { %v5991_v4 = vpop.permute.xlu1 %1587 }
 0x2a8   : > { %8775 = vst [vmem:[#allocation185_spill] sm:$0xff] %v5991_v4  ;;  %v5997_v51 = vpop.permute.xlu0 %1589  ;;  %v8787_v4 = vld [vmem:[#allocation22_spill] sm:$0xff] }
 0x2a9   : > { %1968 = vrot.lane.b32.xlu1 %v5234_v58, %s4687_s9  ;;  %8776 = vst [vmem:[#allocation186_spill] sm:$0xff] %v5997_v51  ;;  %v8791_v51 = vld [vmem:[#allocation28_spill] sm:$0xff] }
 0x2aa   : > { %1978 = vrot.lane.b32.xlu0 %v5381_v15, %s4687_s9 }
 0x2ab   : > { %v5999_v3 = vpop.permute.xlu1 %1720 }
 0x2ac   : > { %8777 = vst [vmem:[#allocation187_spill] sm:$0xff] %v5999_v3  ;;  %v6005_v9 = vpop.permute.xlu0 %1722 }
 0x2ad   : > { %1972 = vrot.lane.b32.xlu1 %v5287_v20, %s4687_s9  ;;  %8778 = vst [vmem:[#allocation188_spill] sm:$0xff] %v6005_v9 }
 0x2ae   : > { %1982 = vrot.lane.b32.xlu0 %v5461_v33, %s4687_s9  ;;  %v8781_v33 = vld [vmem:[#allocation10_spill] sm:$0xff] }
 0x2af   : > { %v6007_v55 = vpop.permute.xlu1 %1798 }
 0x2b0   : > { %v6013_v58 = vpop.permute.xlu0 %1796 }
 0x2b1   : > { %1976 = vrot.lane.b32.xlu1 %v5349_v52, %s4687_s9  ;;  %v2253_v52 = vld [vmem:[#allocation2 + $0x10] sm:$0xff] }
 0x2b2   : > { %1986 = vrot.lane.b32.xlu0 %v5513_v7, %s4687_s9  ;;  %4577 = vmatprep.mubr.msk.f32.mxu1 %vm225_vm1, %v2253_v52 }
 0x2b3   : > { %v6015_v37 = vpop.permute.xlu1 %1591 }
 0x2b4   : > { %8779 = vst [vmem:[#allocation189_spill] sm:$0xff] %v6015_v37  ;;  %v6021_v40 = vpop.permute.xlu0 %1800 }
 0x2b5   : > { %1980 = vrot.lane.b32.xlu1 %v5407_v61, %s4687_s9 }
 0x2b6   : > { %2059 = vrot.lane.b32.xlu0 %v8781_v33, %s4688_s10  ;;  %v8785_v33 = vld [vmem:[#allocation16_spill] sm:$0xff] }
 0x2b7   : > { %v6023_v20 = vpop.permute.xlu1 %1724 }
 0x2b8   : > { %8780 = vst [vmem:[#allocation190_spill] sm:$0xff] %v6023_v20  ;;  %v6029_v15 = vpop.permute.xlu0 %1804  ;;  %v8783_v20 = vld [vmem:[#allocation12_spill] sm:$0xff] }
 0x2b9   : > { %1984 = vrot.lane.b32.xlu1 %v5467_v31, %s4687_s9  ;;  %v8782_v31 = vld [vmem:[#allocation14_spill] sm:$0xff] }
 0x2ba   : > { %2063 = vrot.lane.b32.xlu0 %v8782_v31, %s4688_s10  ;;  %v8788_v31 = vld [vmem:[#allocation20_spill] sm:$0xff] }
 0x2bb   : > { %v6032_v37 = vpop.permute.xlu1 %1802 }
 0x2bc   : > { %v6038_v61 = vpop.permute.xlu0 %1808 }
 0x2bd   : > { %1988 = vrot.lane.b32.xlu1 %v5651_v22, %s4687_s9 }
 0x2be   : > { %2067 = vrot.lane.b32.xlu0 %v8784_v35, %s4688_s10  ;;  %v8792_v35 = vld [vmem:[#allocation24_spill] sm:$0xff] }
 0x2bf   : > { %v6040_v7 = vpop.permute.xlu1 %1806 }
 0x2c0   : > { %v6046_v52 = vpop.permute.xlu0 %1812 }
 0x2c1   : > { %2061 = vrot.lane.b32.xlu1 %v8783_v20, %s4688_s10 }
 0x2c2   : > { %2071 = vrot.lane.b32.xlu0 %v8787_v4, %s4688_s10  ;;  %v8796_v4 = vld [vmem:[#allocation30_spill] sm:$0xff] }
 0x2c3   : > { %v6048_v3 = vpop.permute.xlu1 %1810 }
 0x2c4   : > { %v6054_v22 = vpop.permute.xlu0 %1816 }
 0x2c5   : > { %2065 = vrot.lane.b32.xlu1 %v8785_v33, %s4688_s10 }
 0x2c6   : > { %2075 = vrot.lane.b32.xlu0 %v8791_v51, %s4688_s10  ;;  %v8800_v51 = vld [vmem:[#allocation35_spill] sm:$0xff] }
 0x2c7   : > { %v6056_v9 = vpop.permute.xlu1 %1814 }
 0x2c8   : > { %8786 = vst [vmem:[#allocation10_spill] sm:$0xff] %v6056_v9  ;;  %v6062_v20 = vpop.permute.xlu0 %1820 }
 0x2c9   : > { %2069 = vrot.lane.b32.xlu1 %v8788_v31, %s4688_s10  ;;  %8789 = vst [vmem:[#allocation14_spill] sm:$0xff] %v6062_v20 }
 0x2ca   : > { %2079 = vrot.lane.b32.xlu0 %v8795_v57, %s4688_s10  ;;  %v8804_v57 = vld [vmem:[#allocation42_spill] sm:$0xff] }
 0x2cb   : > { %v6064_v17 = vpop.permute.xlu1 %1818 }
 0x2cc   : > { %8790 = vst [vmem:[#allocation12_spill] sm:$0xff] %v6064_v17  ;;  %v6070_v33 = vpop.permute.xlu0 %1824  ;;  %v8834_v17 = vld [vmem:[#allocation5_spill] sm:$0xff] }
 0x2cd   : > { %2073 = vrot.lane.b32.xlu1 %v8792_v35, %s4688_s10  ;;  %8793 = vst [vmem:[#allocation18_spill] sm:$0xff] %v6070_v33  ;;  %v8831_v33 = vld [vmem:[#allocation52_spill] sm:$0xff] }
 0x2ce   : > { %2083 = vrot.lane.b32.xlu0 %v8799_v6, %s4688_s10  ;;  %v8807_v6 = vld [vmem:[#allocation46_spill] sm:$0xff] }
 0x2cf   : > { %v6072_v0 = vpop.permute.xlu1 %1822 }
 0x2d0   : > { %8794 = vst [vmem:[#allocation16_spill] sm:$0xff] %v6072_v0  ;;  %v6078_v31 = vpop.permute.xlu0 %1828 }
 0x2d1   : > { %2077 = vrot.lane.b32.xlu1 %v8796_v4, %s4688_s10  ;;  %8797 = vst [vmem:[#allocation22_spill] sm:$0xff] %v6078_v31 }
 0x2d2   : > { %2087 = vrot.lane.b32.xlu0 %v8803_v42, %s4688_s10 }
 0x2d3   : > { %v6080_v2 = vpop.permute.xlu1 %1826 }
 0x2d4   : > { %8798 = vst [vmem:[#allocation20_spill] sm:$0xff] %v6080_v2  ;;  %v6086_v35 = vpop.permute.xlu0 %1832 }
 0x2d5   : > { %2081 = vrot.lane.b32.xlu1 %v8800_v51, %s4688_s10  ;;  %8801 = vst [vmem:[#allocation28_spill] sm:$0xff] %v6086_v35 }
 0x2d6   : > { %2091 = vrot.lane.b32.xlu0 %v5157_v44, %s4688_s10 }
 0x2d7   : > { %v6088_v49 = vpop.permute.xlu1 %1830 }
 0x2d8   : > { %8802 = vst [vmem:[#allocation24_spill] sm:$0xff] %v6088_v49  ;;  %v6094_v4 = vpop.permute.xlu0 %1836  ;;  %v6196_v49 = vld [vmem:[%s8376_s2] ss:$0 sm:$0xff] }
 0x2d9   : > { %2085 = vrot.lane.b32.xlu1 %v8804_v57, %s4688_s10  ;;  %8805 = vst [vmem:[#allocation33_spill] sm:$0xff] %v6094_v4  ;;  %v897_v20 = vadd.f32 %v8834_v17, %v6196_v49  ;;  %v902_v17 = vadd.f32 %v6196_v49, %v4959_v5  ;;  %v6252_v5 = vadd.f32 %v5026_v41, %v6196_v49  ;;  %v8846_v41 = vld [vmem:[#allocation53_spill] sm:$0xff] }
 0x2da   : > { %2095 = vrot.lane.b32.xlu0 %v5182_v43, %s4688_s10 }
 0x2db   : > { %v6096_v23 = vpop.permute.xlu1 %1834 }
 0x2dc   : > { %8806 = vst [vmem:[#allocation30_spill] sm:$0xff] %v6096_v23  ;;  %v6102_v51 = vpop.permute.xlu0 %1840 }
 0x2dd   : > { %2089 = vrot.lane.b32.xlu1 %v8807_v6, %s4688_s10  ;;  %8808 = vst [vmem:[#allocation40_spill] sm:$0xff] %v6102_v51 }
 0x2de   : > { %2099 = vrot.lane.b32.xlu0 %v5237_v46, %s4688_s10 }
 0x2df   : > { %v6104_v63 = vpop.permute.xlu1 %1838 }
 0x2e0   : > { %8809 = vst [vmem:[#allocation35_spill] sm:$0xff] %v6104_v63  ;;  %v6110_v42 = vpop.permute.xlu0 %1844 }
 0x2e1   : > { %2093 = vrot.lane.b32.xlu1 %v5160_v50, %s4688_s10  ;;  %8810 = vst [vmem:[#allocation44_spill] sm:$0xff] %v6110_v42 }
 0x2e2   : > { %2103 = vrot.lane.b32.xlu0 %v5264_v39, %s4688_s10 }
 0x2e3   : > { %v6112_v57 = vpop.permute.xlu1 %1842 }
 0x2e4   : > { %8811 = vst [vmem:[#allocation42_spill] sm:$0xff] %v6112_v57  ;;  %v6118_v44 = vpop.permute.xlu0 %1848 }
 0x2e5   : > { %2097 = vrot.lane.b32.xlu1 %v5198_v59, %s4688_s10  ;;  %8812 = vst [vmem:[#allocation46_spill] sm:$0xff] %v6118_v44 }
 0x2e6   : > { %2107 = vrot.lane.b32.xlu0 %v5346_v19, %s4688_s10 }
 0x2e7   : > { %v6120_v6 = vpop.permute.xlu1 %1846 }
 0x2e8   : > { %8813 = vst [vmem:[#allocation191_spill] sm:$0xff] %v6120_v6  ;;  %v6126_v43 = vpop.permute.xlu0 %1852 }
 0x2e9   : > { %2101 = vrot.lane.b32.xlu1 %v5240_v26, %s4688_s10  ;;  %8814 = vst [vmem:[#allocation192_spill] sm:$0xff] %v6126_v43 }
 0x2ea   : > { %2111 = vrot.lane.b32.xlu0 %v5384_v16, %s4688_s10 }
 0x2eb   : > { %v6128_v50 = vpop.permute.xlu1 %1850 }
 0x2ec   : > { %8815 = vst [vmem:[#allocation193_spill] sm:$0xff] %v6128_v50  ;;  %v6134_v59 = vpop.permute.xlu0 %1926 }
 0x2ed   : > { %2105 = vrot.lane.b32.xlu1 %v5290_v10, %s4688_s10 }
 0x2ee   : > { %2115 = vrot.lane.b32.xlu0 %v5464_v1, %s4688_s10 }
 0x2ef   : > { %v6136_v46 = vpop.permute.xlu1 %1854 }
 0x2f0   : > { %8816 = vst [vmem:[#allocation194_spill] sm:$0xff] %v6136_v46  ;;  %v6142_v26 = vpop.permute.xlu0 %1930  ;;  %v8817_v46 = vld [vmem:[#allocation90_spill] sm:$0xff] }
 0x2f1   : > { %2109 = vrot.lane.b32.xlu1 %v5352_v14, %s4688_s10 }
 0x2f2   : > { %2119 = vrot.lane.b32.xlu0 %v8817_v46, %s4688_s10 }
 0x2f3   : > { %v6144_v39 = vpop.permute.xlu1 %1928 }
 0x2f4   : > { %v6150_v10 = vpop.permute.xlu0 %1934 }
 0x2f5   : > { %2113 = vrot.lane.b32.xlu1 %v5410_v21, %s4688_s10 }
 0x2f7   : > { %v6152_v19 = vpop.permute.xlu1 %1932 }
 0x2f8   : > { %v6158_v14 = vpop.permute.xlu0 %1938 }
 0x2f9   : > { %2117 = vrot.lane.b32.xlu1 %v5470_v62, %s4688_s10 }
 0x2fb   : > { %v6160_v16 = vpop.permute.xlu1 %1936 }
 0x2fc   : > { %v6164_v1 = vpop.permute.xlu0 %1942 }
 0x2fd   : > { %2121 = vrot.lane.b32.xlu1 %v5656_v25, %s4688_s10 }
 0x2ff   : > { %v6166_v21 = vpop.permute.xlu1 %1940 }
 0x300   : > { %v6168_v50 = vpop.permute.xlu0 %1946 }
 0x303   : > { %v6170_v43 = vpop.permute.xlu1 %1944 }
 0x304   : > { %v6172_v6 = vpop.permute.xlu0 %1950 }
 0x305   : > { %8818 = vst [vmem:[#allocation90_spill] sm:$0xff] %v6172_v6  ;;  %v8847_v6 = vld [vmem:[#allocation37_spill] sm:$0xff] }
 0x307   : > { %v6174_v46 = vpop.permute.xlu1 %1948 }
 0x308   : > { %8819 = vst [vmem:[#allocation195_spill] sm:$0xff] %v6174_v46  ;;  %v6176_v62 = vpop.permute.xlu0 %1954  ;;  %v1154_v46 = vadd.f32 %v8846_v41, %v897_v20  ;;  %v6292_v20 = vadd.f32 %v6196_v49, %v5136_v30  ;;  %v8857_v30 = vld [vmem:[#allocation57_spill] sm:$0xff] }
 0x309   : > { %8820 = vst [vmem:[#allocation196_spill] sm:$0xff] %v6176_v62 }
 0x30b   : > { %v6178_v44 = vpop.permute.xlu1 %1952 }
 0x30c   : > { %8821 = vst [vmem:[#allocation197_spill] sm:$0xff] %v6178_v44  ;;  %v6180_v57 = vpop.permute.xlu0 %1958 }
 0x30d   : > { %8822 = vst [vmem:[#allocation198_spill] sm:$0xff] %v6180_v57  ;;  %v8830_v57 = vld [vmem:[#allocation3_spill] sm:$0xff] }
 0x30e   : > { %v896_v0 = vadd.f32 %v8830_v57, %v6196_v49 }
 0x30f   : > { %v6182_v42 = vpop.permute.xlu1 %1956 }
 0x310   : > { %8823 = vst [vmem:[#allocation199_spill] sm:$0xff] %v6182_v42  ;;  %v6184_v25 = vpop.permute.xlu0 %1962  ;;  %v6188_v51 = vpop.f32.mrb[0].mxu1  ;;  %v1153_v44 = vadd.f32 %v8831_v33, %v896_v0  ;;  %v8838_v33 = vld [vmem:[#allocation7_spill] sm:$0xff] }
 0x311   : > { %8824 = vst [vmem:[#allocation200_spill] sm:$0xff] %v6184_v25  ;;  %8826 = vst [vmem:[#allocation202_spill] sm:$0xff] %v6188_v51  ;;  %v8432_v23 = vrot.slane %v6188_v51, 1  ;;  %v6191_v4 = vpop.f32.mrb[1].mxu1  ;;  %v8433_v31 = vrot.slane %v6188_v51, 2  ;;  %v903_v51 = vadd.f32 %v6196_v49, %v4980_v13  ;;  %v8842_v13 = vld [vmem:[#allocation48_spill] sm:$0xff] }
 0x312   : > { %8827 = vst [vmem:[#allocation203_spill] sm:$0xff] %v6191_v4  ;;  %v2893_v35 = vrot.slane %v6191_v4, 1  ;;  %v3101_v25 = vrot.slane %v6191_v4, 2  ;;  %v8833_v4 = vld [vmem:[#allocation4_spill] sm:$0xff] }
 0x313   : > { %v6186_v63 = vpop.permute.xlu1 %1960 }
 0x314   : > { %8825 = vst [vmem:[#allocation201_spill] sm:$0xff] %v6186_v63  ;;  %v6199_v2 = vpop.permute.xlu0 %1966  ;;  %v2895_v42 = vsel %vm975_vm4, %v2893_v35, %v8432_v23  ;;  %v8836_v23 = vld [vmem:[#allocation6_spill] sm:$0xff] }
 0x315   : > { %8828 = vst [vmem:[#allocation204_spill] sm:$0xff] %v6199_v2  ;;  %2973 = vrot.lane.b32.xlu0 %v2895_v42, %s4681_s26  ;;  %v3103_v2 = vsel %vm1184_vm5, %v3101_v25, %v8433_v31  ;;  %v898_v57 = vadd.f32 %v6196_v49, %v8836_v23  ;;  %v8837_v42 = vld [vmem:[#allocation8_spill] sm:$0xff]  ;;  %v901_v25 = vadd.f32 %v4940_v56, %v6196_v49  ;;  %8850 = vst [vmem:[#allocation6_spill] sm:$0xff] %v6292_v20 }
 0x316   : > { %v899_v0 = vadd.f32 %v6196_v49, %v8837_v42  ;;  %v6239_v23 = vadd.f32 %v4976_v12, %v6196_v49  ;;  %v8840_v42 = vld [vmem:[#allocation49_spill] sm:$0xff]  ;;  %v6248_v56 = vadd.f32 %v6196_v49, %v5008_v34  ;;  %v6267_v34 = vadd.f32 %v6196_v49, %v8715_v24  ;;  %v8849_v24 = vld [vmem:[#allocation55_spill] sm:$0xff] }
 0x317   : > { %v6203_v63 = vpop.permute.xlu1 %1964  ;;  %v8843_v12 = vld [vmem:[#allocation25_spill] sm:$0xff]  ;;  %v1155_v9 = vadd.f32 %v8849_v24, %v898_v57  ;;  %v6305_v57 = vadd.f32 %v6196_v49, %v5170_v45 }
 0x318   : > { %8829 = vst [vmem:[#allocation205_spill] sm:$0xff] %v6203_v63  ;;  %v6212_v62 = vpop.permute.xlu0 %1970  ;;  %v895_v63 = vadd.f32 %v6196_v49, %v8833_v4  ;;  %v8839_v4 = vld [vmem:[#allocation47_spill] sm:$0xff]  ;;  %v8861_v45 = vld [vmem:[#allocation61_spill] sm:$0xff] }
 0x319   : > { %8832 = vst [vmem:[#allocation3_spill] sm:$0xff] %v6212_v62  ;;  %v900_v62 = vadd.f32 %v8838_v33, %v6196_v49  ;;  %3181 = vrot.lane.b32.xlu0 %v3103_v2, %s4682_s27  ;;  %v6244_v33 = vadd.f32 %v4987_v18, %v6196_v49  ;;  %8854 = vst [vmem:[#allocation47_spill] sm:$0xff] %v6305_v57  ;;  %v1364_v24 = vadd.f32 %v8857_v30, %v1155_v9  ;;  %v8863_v9 = vld [vmem:[#allocation58_spill] sm:$0xff] }
 0x31a   : > { %v1152_v31 = vadd.f32 %v8839_v4, %v895_v63  ;;  %v6259_v4 = vadd.f32 %v6196_v49, %v8843_v12  ;;  %v8848_v12 = vld [vmem:[#allocation50_spill] sm:$0xff] }
 0x31b   : > { %v6221_v35 = vpop.permute.xlu1 %1968 }
 0x31c   : > { %8835 = vst [vmem:[#allocation52_spill] sm:$0xff] %v6221_v35  ;;  %v1362_v35 = vadd.f32 %v8840_v42, %v1153_v44  ;;  %v6254_v63 = vpop.permute.xlu0 %1974  ;;  %v1361_v2 = vadd.f32 %v8842_v13, %v1152_v31  ;;  %v8844_v44 = vld [vmem:[#allocation26_spill] sm:$0xff]  ;;  %v6278_v31 = vadd.f32 %v8719_v48, %v6196_v49  ;;  %v6282_v13 = vadd.f32 %v8718_v53, %v6196_v49 }
 0x31d   : > { %8841 = vst [vmem:[#allocation4_spill] sm:$0xff] %v6254_v63  ;;  %v6263_v18 = vadd.f32 %v8844_v44, %v6196_v49  ;;  %v6274_v63 = vadd.f32 %v6196_v49, %v8847_v6  ;;  %v8851_v6 = vld [vmem:[#allocation51_spill] sm:$0xff]  ;;  %v6297_v48 = vadd.f32 %v5132_v29, %v6196_v49  ;;  %v6301_v53 = vadd.f32 %v5140_v36, %v6196_v49 }
 0x31e   : > { %v1491_v44 = vadd.f32 %v8848_v12, %v1361_v2  ;;  %v1492_v41 = vadd.f32 %v8851_v6, %v1362_v35  ;;  %v8856_v2 = vld [vmem:[#allocation56_spill] sm:$0xff]  ;;  %v6313_v35 = vadd.f32 %v6196_v49, %v5216_v32  ;;  %v6317_v29 = vadd.f32 %v5212_v27, %v6196_v49  ;;  %v8860_v6 = vld [vmem:[#allocation54_spill] sm:$0xff]  ;;  %v8864_v32 = vld [vmem:[#allocation59_spill] sm:$0xff] }
 0x31f   : > { %v6269_v42 = vpop.permute.xlu1 %1972  ;;  %8852 = vst [vmem:[#allocation8_spill] sm:$0xff] %v6297_v48  ;;  %8853 = vst [vmem:[#allocation7_spill] sm:$0xff] %v6301_v53  ;;  %v1363_v53 = vadd.f32 %v8860_v6, %v1154_v46  ;;  %v8862_v48 = vld [vmem:[#allocation64_spill] sm:$0xff]  ;;  %v1494_v30 = vadd.f32 %v8864_v32, %v1364_v24  ;;  %v6333_v27 = vadd.f32 %v6196_v49, %v5250_v11  ;;  %v8868_v6 = vld [vmem:[#allocation63_spill] sm:$0xff] }
 0x320   : > { %8845 = vst [vmem:[#allocation5_spill] sm:$0xff] %v6269_v42  ;;  %v6288_v42 = vadd.f32 %v6196_v49, %v8722_v47  ;;  %v6307_v47 = vpop.permute.xlu0 %1978  ;;  %v1625_v12 = vadd.f32 %v8856_v2, %v1491_v44  ;;  %8858 = vst [vmem:[#allocation48_spill] sm:$0xff] %v6313_v35  ;;  %v1626_v57 = vadd.f32 %v8861_v45, %v1492_v41  ;;  %v8865_v35 = vld [vmem:[#allocation67_spill] sm:$0xff]  ;;  %v8869_v45 = vld [vmem:[#allocation66_spill] sm:$0xff] }
 0x321   : > { %8855 = vst [vmem:[#allocation49_spill] sm:$0xff] %v6307_v47  ;;  %v1156_v47 = vadd.f32 %v8862_v48, %v899_v0  ;;  %v6326_v44 = vadd.f32 %v5220_v54, %v6196_v49  ;;  %v1157_v20 = vadd.f32 %v8865_v35, %v900_v62  ;;  %8866 = vst [vmem:[#allocation26_spill] sm:$0xff] %v6333_v27  ;;  %v8874_v35 = vld [vmem:[#allocation74_spill] sm:$0xff]  ;;  %v8885_v27 = vld [vmem:[#allocation79_spill] sm:$0xff] }
 0x322   : > { %v1758_v2 = vadd.f32 %v8863_v9, %v1625_v12  ;;  %v1759_v41 = vadd.f32 %v8868_v6, %v1626_v57  ;;  %v6340_v54 = vadd.f32 %v6196_v49, %v5322_v8  ;;  %v8872_v12 = vld [vmem:[#allocation62_spill] sm:$0xff]  ;;  %v8873_v9 = vld [vmem:[#allocation69_spill] sm:$0xff]  ;;  %v1158_v32 = vadd.f32 %v8874_v35, %v901_v25 }
 0x323   : > { %v6319_v36 = vpop.permute.xlu1 %1976  ;;  %v1365_v0 = vadd.f32 %v8869_v45, %v1156_v47  ;;  %v1366_v62 = vadd.f32 %v8873_v9, %v1157_v20  ;;  %v6349_v11 = vadd.f32 %v5318_v28, %v6196_v49  ;;  %v8877_v57 = vld [vmem:[#allocation65_spill] sm:$0xff]  ;;  %v8882_v9 = vld [vmem:[#allocation75_spill] sm:$0xff]  ;;  %v8883_v28 = vld [vmem:[#allocation76_spill] sm:$0xff] }
 0x324   : > { %8859 = vst [vmem:[#allocation25_spill] sm:$0xff] %v6319_v36  ;;  %v8867_v36 = vld [vmem:[#allocation60_spill] sm:$0xff]  ;;  %8870 = vst [vmem:[#allocation53_spill] sm:$0xff] %v6340_v54  ;;  %v6342_v48 = vpop.permute.xlu0 %1982  ;;  %v1888_v24 = vadd.f32 %v8872_v12, %v1758_v2  ;;  %v1889_v47 = vadd.f32 %v8877_v57, %v1759_v41  ;;  %v8879_v8 = vld [vmem:[#allocation77_spill] sm:$0xff] }
 0x325   : > { %v1493_v46 = vadd.f32 %v8867_v36, %v1363_v53  ;;  %8871 = vst [vmem:[#allocation37_spill] sm:$0xff] %v6342_v48  ;;  %8875 = vst [vmem:[#allocation50_spill] sm:$0xff] %v6349_v11  ;;  %v8878_v36 = vld [vmem:[#allocation68_spill] sm:$0xff]  ;;  %v1159_v45 = vadd.f32 %v8879_v8, %v902_v17  ;;  %v6358_v48 = vadd.f32 %v5326_v38, %v6196_v49  ;;  %v8880_v2 = vld [vmem:[#allocation70_spill] sm:$0xff] }
 0x326   : > { %v1495_v6 = vadd.f32 %v8878_v36, %v1365_v0  ;;  %v8881_v12 = vld [vmem:[#allocation71_spill] sm:$0xff]  ;;  %v1496_v35 = vadd.f32 %v8882_v9, %v1366_v62  ;;  %v1367_v11 = vadd.f32 %v8883_v28, %v1158_v32  ;;  %v8884_v54 = vld [vmem:[#allocation78_spill] sm:$0xff]  ;;  %v8886_v57 = vld [vmem:[#allocation84_spill] sm:$0xff]  ;;  %v6369_v17 = vadd.f32 %v6196_v49, %v5368_v60 }
 0x327   : > { %v6351_v53 = vpop.permute.xlu1 %1980  ;;  %v1627_v20 = vadd.f32 %v8880_v2, %v1493_v46  ;;  %v1628_v25 = vadd.f32 %v8881_v12, %v1494_v30  ;;  %v1368_v41 = vadd.f32 %v8885_v27, %v1159_v45  ;;  %v1160_v0 = vadd.f32 %v8886_v57, %v903_v51  ;;  %v8888_v36 = vld [vmem:[#allocation72_spill] sm:$0xff]  ;;  %v8889_v8 = vld [vmem:[#allocation82_spill] sm:$0xff]  ;;  %v8890_v2 = vld [vmem:[#allocation83_spill] sm:$0xff] }
 0x328   : > { %8876 = vst [vmem:[#allocation55_spill] sm:$0xff] %v6351_v53  ;;  %v1629_v53 = vadd.f32 %v8884_v54, %v1495_v6  ;;  %v6371_v38 = vpop.permute.xlu0 %1986  ;;  %v1497_v30 = vadd.f32 %v8889_v8, %v1367_v11  ;;  %v1630_v62 = vadd.f32 %v8890_v2, %v1496_v35  ;;  %v8891_v32 = vld [vmem:[#allocation87_spill] sm:$0xff]  ;;  %v8893_v27 = vld [vmem:[#allocation73_spill] sm:$0xff]  ;;  %v8894_v51 = vld [vmem:[#allocation80_spill] sm:$0xff]  ;;  %v2022_v35 = vadd.f32 %v6134_v59, %v1888_v24 }
 0x329   : > { %8887 = vst [vmem:[#allocation51_spill] sm:$0xff] %v6371_v38  ;;  %v1760_v46 = vadd.f32 %v8888_v36, %v1627_v20  ;;  %v1161_v12 = vadd.f32 %v8891_v32, %v6239_v23  ;;  %v1761_v6 = vadd.f32 %v8893_v27, %v1628_v25  ;;  %v8895_v9 = vld [vmem:[#allocation81_spill] sm:$0xff]  ;;  %v8896_v49 = vld [vmem:[#allocation86_spill] sm:$0xff]  ;;  %v8899_v11 = vld [vmem:[#allocation91_spill] sm:$0xff] }
 0x32a   : > { %v1762_v45 = vadd.f32 %v8894_v51, %v1629_v53  ;;  %v1498_v60 = vadd.f32 %v8895_v9, %v1368_v41  ;;  %v1369_v28 = vadd.f32 %v8896_v49, %v1160_v0  ;;  %v8897_v57 = vld [vmem:[#allocation85_spill] sm:$0xff]  ;;  %v1631_v8 = vadd.f32 %v8899_v11, %v1497_v30  ;;  %v8900_v2 = vld [vmem:[#allocation88_spill] sm:$0xff]  ;;  %v8902_v25 = vld [vmem:[#allocation95_spill] sm:$0xff] }
 0x32b   : > { %v6378_v54 = vpop.permute.xlu1 %1984  ;;  %v1763_v38 = vadd.f32 %v8897_v57, %v1630_v62  ;;  %v8898_v20 = vld [vmem:[#allocation89_spill] sm:$0xff]  ;;  %v8901_v32 = vld [vmem:[#allocation92_spill] sm:$0xff]  ;;  %v1162_v27 = vadd.f32 %v8902_v25, %v6244_v33  ;;  %v8903_v53 = vld [vmem:[#allocation98_spill] sm:$0xff] }
 0x32c   : > { %8892 = vst [vmem:[#allocation56_spill] sm:$0xff] %v6378_v54  ;;  %v1370_v36 = vadd.f32 %v8898_v20, %v1161_v12  ;;  %v1499_v23 = vadd.f32 %v8900_v2, %v1369_v28  ;;  %v1632_v54 = vadd.f32 %v8901_v32, %v1498_v60  ;;  %v1163_v41 = vadd.f32 %v8903_v53, %v6248_v56  ;;  %v2060_v51 = vpop.permute.xlu0 %2059  ;;  %v8904_v0 = vld [vmem:[#allocation93_spill] sm:$0xff]  ;;  %v8905_v62 = vld [vmem:[#allocation96_spill] sm:$0xff]  ;;  %v8906_v59 = vld [vmem:[#allocation94_spill] sm:$0xff] }
 0x32d   : > { %v1764_v9 = vadd.f32 %v8904_v0, %v1631_v8  ;;  %v1890_v12 = vadd.f32 %v6013_v58, %v1760_v46  ;;  %v2155_v30 = vadd.f32 %v2060_v51, %v2022_v35  ;;  %v8907_v28 = vld [vmem:[#allocation97_spill] sm:$0xff]  ;;  %v8908_v20 = vld [vmem:[#allocation99_spill] sm:$0xff]  ;;  %v8909_v33 = vld [vmem:[#allocation100_spill] sm:$0xff] }
 0x32e   : > { %v1500_v49 = vadd.f32 %v8905_v62, %v1370_v36  ;;  %v1765_v24 = vadd.f32 %v8906_v59, %v1632_v54  ;;  %v1371_v60 = vadd.f32 %v8907_v28, %v1162_v27  ;;  %v1633_v11 = vadd.f32 %v8908_v20, %v1499_v23  ;;  %v8910_v32 = vld [vmem:[#allocation104_spill] sm:$0xff]  ;;  %v8911_v25 = vld [vmem:[#allocation105_spill] sm:$0xff]  ;;  %v8913_v35 = vld [vmem:[#allocation102_spill] sm:$0xff] }
 0x32f   : > { %v6397_v57 = vpop.permute.xlu1 %1988  ;;  %v1372_v2 = vadd.f32 %v8909_v33, %v1163_v41  ;;  %v1164_v8 = vadd.f32 %v8911_v25, %v6259_v4  ;;  %v2024_v36 = vadd.f32 %v6142_v26, %v1890_v12  ;;  %v2187_v53 = vmax.f32 %v2155_v30, 0.0  ;;  %v8912_v58 = vld [vmem:[#allocation101_spill] sm:$0xff]  ;;  %v8914_v0 = vld [vmem:[#allocation103_spill] sm:$0xff]  ;;  %v8915_v23 = vld [vmem:[#allocation106_spill] sm:$0xff] }
 0x330   : > { %v1634_v56 = vadd.f32 %v8910_v32, %v1500_v49  ;;  %v1766_v46 = vadd.f32 %v8912_v58, %v1633_v11  ;;  %v1501_v54 = vadd.f32 %v8914_v0, %v1371_v60  ;;  %v2023_v27 = vadd.f32 %v6144_v39, %v1889_v47  ;;  %v2064_v62 = vpop.permute.xlu0 %2063  ;;  %v8916_v41 = vld [vmem:[#allocation107_spill] sm:$0xff]  ;;  %v8917_v12 = vld [vmem:[#allocation108_spill] sm:$0xff]  ;;  %v8919_v47 = vld [vmem:[#allocation109_spill] sm:$0xff] }
 0x331   : > { %v1502_v51 = vadd.f32 %v8913_v35, %v1372_v2  ;;  %v1373_v49 = vadd.f32 %v8916_v41, %v1164_v8  ;;  %v1892_v28 = vadd.f32 %v6021_v40, %v1762_v45  ;;  %2219 = vst.msk [vmem:[#allocation2 + $0x19] sm:$0xff] %vm225_vm1, %v2187_v53  ;;  %v2157_v26 = vadd.f32 %v2064_v62, %v2024_v36  ;;  %v8918_v20 = vld [vmem:[#allocation111_spill] sm:$0xff]  ;;  %v8920_v2 = vld [vmem:[#allocation112_spill] sm:$0xff]  ;;  %v8921_v40 = vld [vmem:[#allocation110_spill] sm:$0xff] }
 0x332   : > { %v6412_v59 = vadd.f32 %v8915_v23, %v1634_v56  ;;  %v1165_v30 = vadd.f32 %v8917_v12, %v6252_v5  ;;  %v1635_v11 = vadd.f32 %v8918_v20, %v1501_v54  ;;  %v1891_v60 = vadd.f32 %v6007_v55, %v1761_v6  ;;  %v8922_v8 = vld [vmem:[#allocation113_spill] sm:$0xff]  ;;  %v8923_v35 = vld [vmem:[#allocation114_spill] sm:$0xff]  ;;  %v8924_v55 = vld [vmem:[#allocation115_spill] sm:$0xff] }
 0x333   : > { %v2062_v4 = vpop.permute.xlu1 %2061  ;;  %v1503_v33 = vadd.f32 %v8919_v47, %v1373_v49  ;;  %v1636_v32 = vadd.f32 %v8920_v2, %v1502_v51  ;;  %v2026_v56 = vadd.f32 %v6150_v10, %v1892_v28  ;;  %v2189_v25 = vmax.f32 %v2157_v26, 0.0  ;;  %v8926_v23 = vld [vmem:[#allocation119_spill] sm:$0xff]  ;;  %v8927_v28 = vld [vmem:[#allocation116_spill] sm:$0xff]  ;;  %v8930_v20 = vld [vmem:[#allocation121_spill] sm:$0xff] }
 0x334   : > { %v2156_v39 = vadd.f32 %v2062_v4, %v2023_v27  ;;  %v1374_v45 = vadd.f32 %v8921_v40, %v1165_v30  ;;  %v1768_v36 = vadd.f32 %v8922_v8, %v1635_v11  ;;  %v2025_v53 = vadd.f32 %v6152_v19, %v1891_v60  ;;  %v2068_v5 = vpop.permute.xlu0 %2067  ;;  %v8925_v27 = vld [vmem:[#allocation118_spill] sm:$0xff]  ;;  %v8928_v4 = vld [vmem:[#allocation117_spill] sm:$0xff]  ;;  %v8929_v12 = vld [vmem:[#allocation120_spill] sm:$0xff] }
 0x335   : > { %v6428_v0 = vadd.f32 %v8923_v35, %v1636_v32  ;;  %v1166_v6 = vadd.f32 %v8924_v55, %v6263_v18  ;;  %v1894_v54 = vadd.f32 %v6029_v15, %v1764_v9  ;;  %2221 = vst.msk [vmem:[#allocation2 + $0x31] sm:$0xff] %vm225_vm1, %v2189_v25  ;;  %v2159_v10 = vadd.f32 %v2068_v5, %v2026_v56  ;;  %v8933_v25 = vld [vmem:[#allocation122_spill] sm:$0xff]  ;;  %v8937_v55 = vld [vmem:[#allocation128_spill] sm:$0xff] }
 0x336   : > { %v2188_v58 = vmax.f32 %v2156_v39, 0.0  ;;  %v1167_v62 = vadd.f32 %v8925_v27, %v6267_v34  ;;  %v1637_v41 = vadd.f32 %v8926_v23, %v1503_v33  ;;  %v1893_v19 = vadd.f32 %v6032_v37, %v1763_v38  ;;  %v8931_v37 = vld [vmem:[#allocation124_spill] sm:$0xff]  ;;  %v8932_v33 = vld [vmem:[#allocation125_spill] sm:$0xff] }
 0x337   : > { %v2066_v51 = vpop.permute.xlu1 %2065  ;;  %v1504_v26 = vadd.f32 %v8927_v28, %v1374_v45  ;;  %v1375_v18 = vadd.f32 %v8928_v4, %v1166_v6  ;;  %v2028_v15 = vadd.f32 %v6158_v14, %v1894_v54  ;;  %v2191_v9 = vmax.f32 %v2159_v10, 0.0  ;;  %v8934_v45 = vld [vmem:[#allocation123_spill] sm:$0xff]  ;;  %v8940_v23 = vld [vmem:[#allocation132_spill] sm:$0xff]  ;;  %v8941_v4 = vld [vmem:[#allocation130_spill] sm:$0xff] }
 0x338   : > { %2220 = vst.msk [vmem:[#allocation2 + $0x21] sm:$0xff] %vm225_vm1, %v2188_v58  ;;  %v2158_v49 = vadd.f32 %v2066_v51, %v2025_v53  ;;  %v1376_v30 = vadd.f32 %v8929_v12, %v1167_v62  ;;  %v1770_v11 = vadd.f32 %v8930_v20, %v1637_v41  ;;  %v2027_v34 = vadd.f32 %v6160_v16, %v1893_v19  ;;  %v2072_v39 = vpop.permute.xlu0 %2071  ;;  %v2254_v47 = vld [vmem:[#allocation2 + $0x18] sm:$0xff]  ;;  %v8935_v58 = vld [vmem:[#allocation126_spill] sm:$0xff]  ;;  %v8938_v54 = vld [vmem:[#allocation131_spill] sm:$0xff] }
 0x339   : > { %v1638_v38 = vadd.f32 %v8931_v37, %v1504_v26  ;;  %v1168_v2 = vadd.f32 %v8932_v33, %v6274_v63  ;;  %v1896_v32 = vadd.f32 %v6038_v61, %v1766_v46  ;;  %2223 = vst.msk [vmem:[#allocation2 + $0x49] sm:$0xff] %vm225_vm1, %v2191_v9  ;;  %v2161_v14 = vadd.f32 %v2072_v39, %v2028_v15  ;;  %v8936_v63 = vld [vmem:[#allocation127_spill] sm:$0xff]  ;;  %v8943_v12 = vld [vmem:[#allocation134_spill] sm:$0xff] }
 0x33a   : > { %v2190_v60 = vmax.f32 %v2158_v49, 0.0  ;;  %4578 = vmatmul.mubr.msk.f32.gmra.mrb[2].mxu1 %vm225_vm1, %v2254_v47  ;;  %v1506_v40 = vadd.f32 %v8933_v25, %v1376_v30  ;;  %v1505_v16 = vadd.f32 %v8934_v45, %v1375_v18  ;;  %v1895_v8 = vadd.f32 %v6040_v7, %v1765_v24  ;;  %v8939_v24 = vld [vmem:[#allocation129_spill] sm:$0xff]  ;;  %v8945_v39 = vld [vmem:[#allocation138_spill] sm:$0xff] }
 0x33b   : > { %v2070_v56 = vpop.permute.xlu1 %2069  ;;  %v6456_v5 = vadd.f32 %v8935_v58, %v1638_v38  ;;  %v1377_v61 = vadd.f32 %v8936_v63, %v1168_v2  ;;  %v2030_v46 = vadd.f32 %v6164_v1, %v1896_v32  ;;  %v2193_v35 = vmax.f32 %v2161_v14, 0.0  ;;  %v8942_v18 = vld [vmem:[#allocation133_spill] sm:$0xff]  ;;  %v8947_v2 = vld [vmem:[#allocation136_spill] sm:$0xff] }
 0x33c   : > { %2222 = vst.msk [vmem:[#allocation2 + $0x39] sm:$0xff] %vm225_vm1, %v2190_v60  ;;  %v2160_v53 = vadd.f32 %v2070_v56, %v2027_v34  ;;  %v1169_v6 = vadd.f32 %v8937_v55, %v6278_v31  ;;  %v1639_v10 = vadd.f32 %v8938_v54, %v1505_v16  ;;  %v2029_v51 = vadd.f32 %v6166_v21, %v1895_v8  ;;  %v2076_v7 = vpop.permute.xlu0 %2075  ;;  %v2257_v60 = vld [vmem:[#allocation2 + $0x30] sm:$0xff]  ;;  %v8950_v16 = vld [vmem:[#allocation141_spill] sm:$0xff]  ;;  %v8952_v63 = vld [vmem:[#allocation144_spill] sm:$0xff] }
 0x33d   : > { %v1507_v62 = vadd.f32 %v8939_v24, %v1377_v61  ;;  %v1640_v41 = vadd.f32 %v8940_v23, %v1506_v40  ;;  %v1898_v19 = vadd.f32 %v6046_v52, %v1768_v36  ;;  %2225 = vst.msk [vmem:[#allocation2 + $0x61] sm:$0xff] %vm225_vm1, %v2193_v35  ;;  %v2163_v49 = vadd.f32 %v2076_v7, %v2030_v46  ;;  %v8944_v36 = vld [vmem:[#allocation135_spill] sm:$0xff]  ;;  %v8953_v46 = vld [vmem:[#allocation6_spill] sm:$0xff]  ;;  %v8954_v35 = vld [vmem:[#allocation145_spill] sm:$0xff] }
 0x33e   : > { %v2192_v27 = vmax.f32 %v2160_v53, 0.0  ;;  %v1378_v31 = vadd.f32 %v8941_v4, %v1169_v6  ;;  %v1772_v15 = vadd.f32 %v8942_v18, %v1639_v10  ;;  %v1897_v21 = vadd.f32 %v6048_v3, %v6412_v59  ;;  %v8946_v59 = vld [vmem:[#allocation139_spill] sm:$0xff]  ;;  %v8956_v10 = vld [vmem:[#allocation142_spill] sm:$0xff]  ;;  %v8962_v18 = vld [vmem:[#allocation8_spill] sm:$0xff] }
 0x33f   : > { %v2074_v1 = vpop.permute.xlu1 %2073  ;;  %v2255_v28 = vld [vmem:[#allocation2 + $0x20] sm:$0xff]  ;;  %v2256_v26 = vld [vmem:[#allocation2 + $0x28] sm:$0xff]  ;;  %v6475_v52 = vadd.f32 %v8943_v12, %v1640_v41  ;;  %v1170_v30 = vadd.f32 %v8944_v36, %v6282_v13  ;;  %v2032_v20 = vadd.f32 %v6168_v50, %v1898_v19  ;;  %v2195_v34 = vmax.f32 %v2163_v49, 0.0  ;;  %v8958_v24 = vld [vmem:[#allocation195_spill] sm:$0xff] }
 0x340   : > { %2224 = vst.msk [vmem:[#allocation2 + $0x51] sm:$0xff] %vm225_vm1, %v2192_v27  ;;  %v2162_v9 = vadd.f32 %v2074_v1, %v2029_v51  ;;  %4580 = vmatprep.mubr.msk.f32.mxu1 %vm225_vm1, %v2255_v28  ;;  %v1171_v3 = vadd.f32 %v8945_v39, %v6288_v42  ;;  %v1641_v47 = vadd.f32 %v8946_v59, %v1507_v62  ;;  %v2080_v33 = vpop.permute.xlu0 %2079  ;;  %v8948_v13 = vld [vmem:[#allocation137_spill] sm:$0xff]  ;;  %v8949_v42 = vld [vmem:[#allocation140_spill] sm:$0xff]  ;;  %v8957_v27 = vld [vmem:[#allocation143_spill] sm:$0xff] }
 0x341   : > { %4581 = vmatmul.mubr.msk.f32.gmra.mrb[4].mxu1 %vm225_vm1, %v2256_v26  ;;  %v2031_v37 = vadd.f32 %v6170_v43, %v1897_v21  ;;  %v1508_v32 = vadd.f32 %v8947_v2, %v1378_v31  ;;  %v1379_v14 = vadd.f32 %v8948_v13, %v1170_v30  ;;  %v1900_v50 = vadd.f32 %v6054_v22, %v1770_v11  ;;  %v8951_v43 = vld [vmem:[#allocation10_spill] sm:$0xff]  ;;  %v8960_v49 = vld [vmem:[#allocation147_spill] sm:$0xff]  ;;  %v8963_v21 = vld [vmem:[#allocation148_spill] sm:$0xff] }
 0x342   : > { %v2194_v38 = vmax.f32 %v2162_v9, 0.0  ;;  %4583 = vmatprep.mubr.msk.f32.mxu1 %vm225_vm1, %v2257_v60  ;;  %2227 = vst.msk [vmem:[#allocation2 + $0x79] sm:$0xff] %vm225_vm1, %v2195_v34  ;;  %v2165_v56 = vadd.f32 %v2080_v33, %v2032_v20  ;;  %v1380_v45 = vadd.f32 %v8949_v42, %v1171_v3  ;;  %v1774_v8 = vadd.f32 %v8950_v16, %v1641_v47  ;;  %v8955_v11 = vld [vmem:[#allocation90_spill] sm:$0xff]  ;;  %v8964_v12 = vld [vmem:[#allocation151_spill] sm:$0xff]  ;;  %v8965_v30 = vld [vmem:[#allocation12_spill] sm:$0xff] }
 0x343   : > { %v2078_v25 = vpop.permute.xlu1 %2077  ;;  %v2258_v40 = vld [vmem:[#allocation2 + $0x38] sm:$0xff]  ;;  %v1899_v53 = vadd.f32 %v8951_v43, %v6428_v0  ;;  %v1642_v61 = vadd.f32 %v8952_v63, %v1508_v32  ;;  %v1172_v22 = vadd.f32 %v8954_v35, %v8953_v46  ;;  %v2034_v55 = vadd.f32 %v8955_v11, %v1900_v50  ;;  %v2259_v54 = vld [vmem:[#allocation2 + $0x40] sm:$0xff]  ;;  %v8959_v41 = vld [vmem:[#allocation146_spill] sm:$0xff] }
 0x344   : > { %2226 = vst.msk [vmem:[#allocation2 + $0x69] sm:$0xff] %vm225_vm1, %v2194_v38  ;;  %v2164_v58 = vadd.f32 %v2078_v25, %v2031_v37  ;;  %v2197_v6 = vmax.f32 %v2165_v56, 0.0  ;;  %v1510_v51 = vadd.f32 %v8956_v10, %v1380_v45  ;;  %v1509_v7 = vadd.f32 %v8957_v27, %v1379_v14  ;;  %v2084_v23 = vpop.permute.xlu0 %2083  ;;  %v8961_v28 = vld [vmem:[#allocation14_spill] sm:$0xff]  ;;  %v8966_v39 = vld [vmem:[#allocation149_spill] sm:$0xff]  ;;  %v8967_v59 = vld [vmem:[#allocation152_spill] sm:$0xff] }
 0x345   : > { %4584 = vmatmul.mubr.msk.f32.gmra.mrb[6].mxu1 %vm225_vm1, %v2258_v40  ;;  %v2033_v0 = vadd.f32 %v8958_v24, %v1899_v53  ;;  %v1775_v19 = vadd.f32 %v8959_v41, %v1642_v61  ;;  %v1381_v1 = vadd.f32 %v8960_v49, %v1172_v22  ;;  %v1902_v26 = vadd.f32 %v8961_v28, %v1772_v15  ;;  %v2260_v60 = vld [vmem:[#allocation2 + $0x48] sm:$0xff]  ;;  %v8968_v47 = vld [vmem:[#allocation196_spill] sm:$0xff]  ;;  %v8970_v13 = vld [vmem:[#allocation153_spill] sm:$0xff] }
 0x346   : > { %v2196_v62 = vmax.f32 %v2164_v58, 0.0  ;;  %4586 = vmatprep.mubr.msk.f32.mxu1 %vm225_vm1, %v2259_v54  ;;  %2229 = vst.msk [vmem:[#allocation2 + $0x91] sm:$0xff] %vm225_vm1, %v2197_v6  ;;  %v2167_v4 = vadd.f32 %v2084_v23, %v2034_v55  ;;  %v1173_v9 = vadd.f32 %v8963_v21, %v8962_v18  ;;  %v1643_v36 = vadd.f32 %v8964_v12, %v1509_v7  ;;  %v8969_v2 = vld [vmem:[#allocation150_spill] sm:$0xff]  ;;  %v8971_v50 = vld [vmem:[#allocation197_spill] sm:$0xff]  ;;  %v8973_v45 = vld [vmem:[#allocation7_spill] sm:$0xff] }
 0x347   : > { %v2082_v31 = vpop.permute.xlu1 %2081  ;;  %v1901_v20 = vadd.f32 %v8965_v30, %v6456_v5  ;;  %v1511_v3 = vadd.f32 %v8966_v39, %v1381_v1  ;;  %v1644_v15 = vadd.f32 %v8967_v59, %v1510_v51  ;;  %v2036_v37 = vadd.f32 %v8968_v47, %v1902_v26  ;;  %v2261_v33 = vld [vmem:[#allocation2 + $0x50] sm:$0xff]  ;;  %v8972_v40 = vld [vmem:[#allocation154_spill] sm:$0xff]  ;;  %v8979_v6 = vld [vmem:[#allocation16_spill] sm:$0xff] }
 0x348   : > { %2228 = vst.msk [vmem:[#allocation2 + $0x81] sm:$0xff] %vm225_vm1, %v2196_v62  ;;  %v2166_v34 = vadd.f32 %v2082_v31, %v2033_v0  ;;  %v2199_v38 = vmax.f32 %v2167_v4, 0.0  ;;  %v1382_v32 = vadd.f32 %v8969_v2, %v1173_v9  ;;  %v1776_v14 = vadd.f32 %v8970_v13, %v1643_v36  ;;  %v2088_v25 = vpop.permute.xlu0 %2087  ;;  %v8974_v16 = vld [vmem:[#allocation155_spill] sm:$0xff]  ;;  %v8975_v53 = vld [vmem:[#allocation18_spill] sm:$0xff]  ;;  %v2262_v51 = vld [vmem:[#allocation2 + $0x58] sm:$0xff] }
 0x349   : > { %4587 = vmatmul.mubr.msk.f32.gmra.mrb[8].mxu1 %vm225_vm1, %v2260_v60  ;;  %v2035_v5 = vadd.f32 %v8971_v50, %v1901_v20  ;;  %v1777_v42 = vadd.f32 %v8972_v40, %v1644_v15  ;;  %v1174_v43 = vadd.f32 %v8974_v16, %v8973_v45  ;;  %v1904_v58 = vadd.f32 %v8975_v53, %v1774_v8  ;;  %v8976_v46 = vld [vmem:[#allocation47_spill] sm:$0xff]  ;;  %v8977_v35 = vld [vmem:[#allocation158_spill] sm:$0xff]  ;;  %v8980_v27 = vld [vmem:[#allocation156_spill] sm:$0xff] }
 0x34a   : > { %v2198_v56 = vmax.f32 %v2166_v34, 0.0  ;;  %4589 = vmatprep.mubr.msk.f32.mxu1 %vm225_vm1, %v2261_v33  ;;  %2231 = vst.msk [vmem:[#allocation2 + $0xa9] sm:$0xff] %vm225_vm1, %v2199_v38  ;;  %v2169_v63 = vadd.f32 %v2088_v25, %v2036_v37  ;;  %v1175_v22 = vadd.f32 %v8977_v35, %v8976_v46  ;;  %v8978_v11 = vld [vmem:[#allocation159_spill] sm:$0xff]  ;;  %v1903_v54 = vadd.f32 %v8979_v6, %v6475_v52  ;;  %v8981_v24 = vld [vmem:[#allocation157_spill] sm:$0xff]  ;;  %v8982_v0 = vld [vmem:[#allocation198_spill] sm:$0xff] }
 0x34b   : > { %v2086_v61 = vpop.permute.xlu1 %2085  ;;  %v1645_v55 = vadd.f32 %v8978_v11, %v1511_v3  ;;  %v1512_v7 = vadd.f32 %v8980_v27, %v1382_v32  ;;  %v1383_v8 = vadd.f32 %v8981_v24, %v1174_v43  ;;  %v2038_v62 = vadd.f32 %v8982_v0, %v1904_v58  ;;  %v2263_v41 = vld [vmem:[#allocation2 + $0x60] sm:$0xff]  ;;  %v8983_v49 = vld [vmem:[#allocation160_spill] sm:$0xff]  ;;  %v8985_v4 = vld [vmem:[#allocation199_spill] sm:$0xff] }
 0x34c   : > { %2230 = vst.msk [vmem:[#allocation2 + $0x99] sm:$0xff] %vm225_vm1, %v2198_v56  ;;  %v2168_v10 = vadd.f32 %v2086_v61, %v2035_v5  ;;  %v2201_v23 = vmax.f32 %v2169_v63, 0.0  ;;  %v1384_v1 = vadd.f32 %v8983_v49, %v1175_v22  ;;  %v8984_v28 = vld [vmem:[#allocation161_spill] sm:$0xff]  ;;  %v2037_v52 = vadd.f32 %v8985_v4, %v1903_v54  ;;  %v2092_v18 = vpop.permute.xlu0 %2091  ;;  %v8986_v21 = vld [vmem:[#allocation163_spill] sm:$0xff]  ;;  %v8987_v12 = vld [vmem:[#allocation48_spill] sm:$0xff] }
 0x34d   : > { %4590 = vmatmul.mubr.msk.f32.gmra.mrb[10].mxu1 %vm225_vm1, %v2262_v51  ;;  %v1778_v26 = vadd.f32 %v8984_v28, %v1645_v55  ;;  %v1646_v9 = vadd.f32 %v8986_v21, %v1512_v7  ;;  %v8988_v36 = vld [vmem:[#allocation38_spill] sm:$0xff]  ;;  %v2171_v60 = vadd.f32 %v2092_v18, %v2038_v62  ;;  %v8991_v15 = vld [vmem:[#allocation31_spill] sm:$0xff]  ;;  %v8992_v37 = vld [vmem:[#allocation20_spill] sm:$0xff] }
 0x34e   : > { %v2200_v31 = vmax.f32 %v2168_v10, 0.0  ;;  %4592 = vmatprep.mubr.msk.f32.mxu1 %vm225_vm1, %v2263_v41  ;;  %v1176_v30 = vadd.f32 %v8988_v36, %v8987_v12  ;;  %v8989_v20 = vld [vmem:[#allocation22_spill] sm:$0xff]  ;;  %2233 = vst.msk [vmem:[#allocation2 + $0xc1] sm:$0xff] %vm225_vm1, %v2201_v23  ;;  %v1513_v47 = vadd.f32 %v8991_v15, %v1383_v8  ;;  %v1905_v38 = vadd.f32 %v8992_v37, %v1775_v19  ;;  %v8993_v32 = vld [vmem:[#allocation36_spill] sm:$0xff]  ;;  %v8994_v50 = vld [vmem:[#allocation43_spill] sm:$0xff] }
 0x34f   : > { %v1906_v34 = vadd.f32 %v8989_v20, %v1776_v14  ;;  %v2090_v39 = vpop.permute.xlu1 %2089  ;;  %v8990_v3 = vld [vmem:[#allocation162_spill] sm:$0xff]  ;;  %v1779_v13 = vadd.f32 %v8993_v32, %v1646_v9  ;;  %v8995_v56 = vld [vmem:[#allocation200_spill] sm:$0xff]  ;;  %v2203_v25 = vmax.f32 %v2171_v60, 0.0  ;;  %v2265_v40 = vld [vmem:[#allocation2 + $0x70] sm:$0xff] }
 0x350   : > { %v1514_v59 = vadd.f32 %v8990_v3, %v1384_v1  ;;  %2232 = vst.msk [vmem:[#allocation2 + $0xb1] sm:$0xff] %vm225_vm1, %v2200_v31  ;;  %v2170_v33 = vadd.f32 %v2090_v39, %v2037_v52  ;;  %v2264_v2 = vld [vmem:[#allocation2 + $0x68] sm:$0xff]  ;;  %v1385_v5 = vadd.f32 %v8994_v50, %v1176_v30  ;;  %v8996_v45 = vld [vmem:[#allocation164_spill] sm:$0xff]  ;;  %v8997_v43 = vld [vmem:[#allocation167_spill] sm:$0xff]  ;;  %v2096_v61 = vpop.permute.xlu0 %2095 }
 0x351   : > { %v2040_v14 = vadd.f32 %v8995_v56, %v1906_v34  ;;  %4593 = vmatmul.mubr.msk.f32.gmra.mrb[12].mxu1 %vm225_vm1, %v2264_v2  ;;  %v1177_v16 = vadd.f32 %v8996_v45, %v6317_v29  ;;  %v1647_v53 = vadd.f32 %v8997_v43, %v1513_v47  ;;  %v8998_v19 = vld [vmem:[#allocation201_spill] sm:$0xff]  ;;  %v9000_v22 = vld [vmem:[#allocation168_spill] sm:$0xff]  ;;  %2235 = vst.msk [vmem:[#allocation2 + $0xd9] sm:$0xff] %vm225_vm1, %v2203_v25  ;;  %v9002_v51 = vld [vmem:[#allocation166_spill] sm:$0xff] }
 0x352   : > { %v2039_v58 = vadd.f32 %v8998_v19, %v1905_v38  ;;  %v2202_v63 = vmax.f32 %v2170_v33, 0.0  ;;  %4595 = vmatprep.mubr.msk.f32.mxu1 %vm225_vm1, %v2265_v40  ;;  %v8999_v46 = vld [vmem:[#allocation165_spill] sm:$0xff]  ;;  %v1648_v11 = vadd.f32 %v9000_v22, %v1514_v59  ;;  %v9001_v55 = vld [vmem:[#allocation28_spill] sm:$0xff]  ;;  %v9005_v23 = vld [vmem:[#allocation170_spill] sm:$0xff] }
 0x353   : > { %v1515_v35 = vadd.f32 %v8999_v46, %v1385_v5  ;;  %v1908_v6 = vadd.f32 %v9001_v55, %v1778_v26  ;;  %v2173_v54 = vadd.f32 %v2096_v61, %v2040_v14  ;;  %v2094_v10 = vpop.permute.xlu1 %2093  ;;  %v1386_v29 = vadd.f32 %v9002_v51, %v1177_v16  ;;  %v9003_v27 = vld [vmem:[#allocation169_spill] sm:$0xff]  ;;  %v9004_v24 = vld [vmem:[#allocation24_spill] sm:$0xff]  ;;  %v9006_v49 = vld [vmem:[#allocation171_spill] sm:$0xff] }
 0x354   : > { %v1780_v7 = vadd.f32 %v9003_v27, %v1647_v53  ;;  %v1907_v8 = vadd.f32 %v9004_v24, %v1777_v42  ;;  %2234 = vst.msk [vmem:[#allocation2 + $0xc9] sm:$0xff] %vm225_vm1, %v2202_v63  ;;  %v2172_v0 = vadd.f32 %v2094_v10, %v2039_v58  ;;  %v2266_v62 = vld [vmem:[#allocation2 + $0x78] sm:$0xff]  ;;  %v1781_v41 = vadd.f32 %v9005_v23, %v1648_v11  ;;  %v2267_v52 = vld [vmem:[#allocation2 + $0x80] sm:$0xff]  ;;  %v9009_v21 = vld [vmem:[#allocation26_spill] sm:$0xff]  ;;  %v2100_v20 = vpop.permute.xlu0 %2099 }
 0x355   : > { %v1178_v1 = vadd.f32 %v9006_v49, %v6326_v44  ;;  %v9007_v28 = vld [vmem:[#allocation204_spill] sm:$0xff]  ;;  %v2205_v4 = vmax.f32 %v2173_v54, 0.0  ;;  %4596 = vmatmul.mubr.msk.f32.gmra.mrb[14].mxu1 %vm225_vm1, %v2266_v62  ;;  %v9010_v9 = vld [vmem:[#allocation174_spill] sm:$0xff]  ;;  %v9011_v12 = vld [vmem:[#allocation205_spill] sm:$0xff] }
 0x356   : > { %v2042_v26 = vadd.f32 %v9007_v28, %v1908_v6  ;;  %v9008_v31 = vld [vmem:[#allocation172_spill] sm:$0xff]  ;;  %v1179_v42 = vadd.f32 %v9010_v9, %v9009_v21  ;;  %v2041_v36 = vadd.f32 %v9011_v12, %v1907_v8  ;;  %v2204_v30 = vmax.f32 %v2172_v0, 0.0  ;;  %4598 = vmatprep.mubr.msk.f32.mxu1 %vm225_vm1, %v2267_v52  ;;  %v9012_v34 = vld [vmem:[#allocation173_spill] sm:$0xff]  ;;  %v9013_v44 = vld [vmem:[#allocation175_spill] sm:$0xff] }
 0x357   : > { %v1516_v18 = vadd.f32 %v9008_v31, %v1386_v29  ;;  %v1387_v60 = vadd.f32 %v9012_v34, %v1178_v1  ;;  %v1649_v39 = vadd.f32 %v9013_v44, %v1515_v35  ;;  %v9014_v3 = vld [vmem:[#allocation33_spill] sm:$0xff]  ;;  %2237 = vst.msk [vmem:[#allocation2 + $0xf1] sm:$0xff] %vm225_vm1, %v2205_v4  ;;  %v2098_v47 = vpop.permute.xlu1 %2097  ;;  %v9015_v37 = vld [vmem:[#allocation176_spill] sm:$0xff]  ;;  %v9018_v50 = vld [vmem:[#allocation30_spill] sm:$0xff] }
 0x358   : > { %v1910_v59 = vadd.f32 %v9014_v3, %v1780_v7  ;;  %v2175_v15 = vadd.f32 %v2100_v20, %v2042_v26  ;;  %v1388_v38 = vadd.f32 %v9015_v37, %v1179_v42  ;;  %v9016_v33 = vld [vmem:[#allocation53_spill] sm:$0xff]  ;;  %v1909_v5 = vadd.f32 %v9018_v50, %v1779_v13  ;;  %2236 = vst.msk [vmem:[#allocation2 + $0xe1] sm:$0xff] %vm225_vm1, %v2204_v30  ;;  %v2268_v14 = vld [vmem:[#allocation2 + $0x88] sm:$0xff]  ;;  %v9021_v43 = vld [vmem:[#allocation3_spill] sm:$0xff]  ;;  %v2104_v55 = vpop.permute.xlu0 %2103 }
 0x359   : > { %v9017_v2 = vld [vmem:[#allocation13_spill] sm:$0xff]  ;;  %v2174_v56 = vadd.f32 %v2098_v47, %v2041_v36  ;;  %4599 = vmatmul.mubr.msk.f32.gmra.mrb[16].mxu1 %vm225_vm1, %v2268_v14  ;;  %v2269_v58 = vld [vmem:[#allocation2 + $0x90] sm:$0xff]  ;;  %v9024_v22 = vld [vmem:[#allocation52_spill] sm:$0xff] }
 0x35a   : > { %v1180_v32 = vadd.f32 %v9017_v2, %v9016_v33  ;;  %v9019_v25 = vld [vmem:[#allocation177_spill] sm:$0xff]  ;;  %v2044_v53 = vadd.f32 %v9021_v43, %v1910_v59  ;;  %v2207_v19 = vmax.f32 %v2175_v15, 0.0  ;;  %v9022_v63 = vld [vmem:[#allocation179_spill] sm:$0xff]  ;;  %v2043_v13 = vadd.f32 %v9024_v22, %v1909_v5  ;;  %4601 = vmatprep.mubr.msk.f32.mxu1 %vm225_vm1, %v2269_v58  ;;  %v9025_v6 = vld [vmem:[#allocation178_spill] sm:$0xff] }
 0x35b   : > { %v1782_v40 = vadd.f32 %v9019_v25, %v1649_v39  ;;  %v9020_v45 = vld [vmem:[#allocation9_spill] sm:$0xff]  ;;  %v1650_v61 = vadd.f32 %v9022_v63, %v1516_v18  ;;  %v2206_v11 = vmax.f32 %v2174_v56, 0.0  ;;  %v1518_v54 = vadd.f32 %v9025_v6, %v1388_v38  ;;  %v9026_v10 = vld [vmem:[#allocation27_spill] sm:$0xff]  ;;  %v9027_v29 = vld [vmem:[#allocation40_spill] sm:$0xff]  ;;  %v2102_v24 = vpop.permute.xlu1 %2101 }
 0x35c   : > { %v1517_v16 = vadd.f32 %v9020_v45, %v1387_v60  ;;  %v9023_v46 = vld [vmem:[#allocation17_spill] sm:$0xff]  ;;  %2239 = vst.msk [vmem:[#allocation2 + $0x109] sm:$0xff] %vm225_vm1, %v2207_v19  ;;  %v2177_v7 = vadd.f32 %v2104_v55, %v2044_v53  ;;  %v9028_v8 = vld [vmem:[#allocation11_spill] sm:$0xff]  ;;  %v2176_v28 = vadd.f32 %v2102_v24, %v2043_v13  ;;  %v2270_v26 = vld [vmem:[#allocation2 + $0x98] sm:$0xff]  ;;  %v2108_v3 = vpop.permute.xlu0 %2107 }
 0x35d   : > { %v1389_v35 = vadd.f32 %v9023_v46, %v1180_v32  ;;  %v1912_v27 = vadd.f32 %v9027_v29, %v1782_v40  ;;  %v1783_v0 = vadd.f32 %v9028_v8, %v1650_v61  ;;  %v9029_v62 = vld [vmem:[#allocation21_spill] sm:$0xff]  ;;  %v9030_v49 = vld [vmem:[#allocation35_spill] sm:$0xff]  ;;  %2238 = vst.msk [vmem:[#allocation2 + $0xf9] sm:$0xff] %vm225_vm1, %v2206_v11  ;;  %v9031_v4 = vld [vmem:[#allocation32_spill] sm:$0xff]  ;;  %4602 = vmatmul.mubr.msk.f32.gmra.mrb[18].mxu1 %vm225_vm1, %v2270_v26 }
 0x35e   : > { %v1651_v51 = vadd.f32 %v9026_v10, %v1517_v16  ;;  %v1911_v1 = vadd.f32 %v9030_v49, %v1781_v41  ;;  %v9032_v31 = vld [vmem:[#allocation39_spill] sm:$0xff]  ;;  %v9033_v21 = vld [vmem:[#allocation4_spill] sm:$0xff]  ;;  %v2209_v42 = vmax.f32 %v2177_v7, 0.0  ;;  %v2271_v12 = vld [vmem:[#allocation2 + $0xa0] sm:$0xff]  ;;  %v2208_v39 = vmax.f32 %v2176_v28, 0.0 }
 0x35f   : > { %v1519_v23 = vadd.f32 %v9029_v62, %v1389_v35  ;;  %v1182_v18 = vadd.f32 %v9032_v31, %v6358_v48  ;;  %v2046_v9 = vadd.f32 %v9033_v21, %v1912_v27  ;;  %v9034_v36 = vld [vmem:[#allocation50_spill] sm:$0xff]  ;;  %v9035_v30 = vld [vmem:[#allocation15_spill] sm:$0xff]  ;;  %v9037_v60 = vld [vmem:[#allocation5_spill] sm:$0xff]  ;;  %4604 = vmatprep.mubr.msk.f32.mxu1 %vm225_vm1, %v2271_v12  ;;  %v2106_v2 = vpop.permute.xlu1 %2105 }
 0x360   : > { %v1784_v52 = vadd.f32 %v9031_v4, %v1651_v51  ;;  %v1181_v20 = vadd.f32 %v9035_v30, %v9034_v36  ;;  %v9036_v34 = vld [vmem:[#allocation23_spill] sm:$0xff]  ;;  %v2045_v44 = vadd.f32 %v9037_v60, %v1911_v1  ;;  %v9038_v59 = vld [vmem:[#allocation41_spill] sm:$0xff]  ;;  %v9040_v37 = vld [vmem:[#allocation44_spill] sm:$0xff]  ;;  %2241 = vst.msk [vmem:[#allocation2 + $0x121] sm:$0xff] %vm225_vm1, %v2209_v42  ;;  %v2112_v10 = vpop.permute.xlu0 %2111 }
 0x361   : > { %v1652_v41 = vadd.f32 %v9036_v34, %v1518_v54  ;;  %v1391_v15 = vadd.f32 %v9038_v59, %v1182_v18  ;;  %v9039_v48 = vld [vmem:[#allocation45_spill] sm:$0xff]  ;;  %v2179_v33 = vadd.f32 %v2108_v3, %v2046_v9  ;;  %v9041_v32 = vld [vmem:[#allocation19_spill] sm:$0xff]  ;;  %v9043_v14 = vld [vmem:[#allocation42_spill] sm:$0xff]  ;;  %2240 = vst.msk [vmem:[#allocation2 + $0x111] sm:$0xff] %vm225_vm1, %v2208_v39 }
 0x362   : > { %v1653_v47 = vadd.f32 %v9039_v48, %v1519_v23  ;;  %v1914_v38 = vadd.f32 %v9040_v37, %v1784_v52  ;;  %v1390_v50 = vadd.f32 %v9041_v32, %v1181_v20  ;;  %v9042_v5 = vld [vmem:[#allocation29_spill] sm:$0xff]  ;;  %v1913_v25 = vadd.f32 %v9043_v14, %v1783_v0  ;;  %v2272_v45 = vld [vmem:[#allocation2 + $0xa8] sm:$0xff]  ;;  %v9045_v53 = vld [vmem:[#allocation184_spill] sm:$0xff] }
 0x363   : > { %v1785_v56 = vadd.f32 %v9042_v5, %v1652_v41  ;;  %v2178_v40 = vadd.f32 %v2106_v2, %v2045_v44  ;;  %v9044_v16 = vld [vmem:[#allocation182_spill] sm:$0xff]  ;;  %v1521_v19 = vadd.f32 %v9045_v53, %v1391_v15  ;;  %v9046_v58 = vld [vmem:[#allocation49_spill] sm:$0xff]  ;;  %v2211_v61 = vmax.f32 %v2179_v33, 0.0  ;;  %4605 = vmatmul.mubr.msk.f32.gmra.mrb[20].mxu1 %vm225_vm1, %v2272_v45  ;;  %v2273_v46 = vld [vmem:[#allocation2 + $0xb0] sm:$0xff]  ;;  %v2110_v8 = vpop.permute.xlu1 %2109 }
 0x364   : > { %v1786_v43 = vadd.f32 %v9044_v16, %v1653_v47  ;;  %v2048_v63 = vadd.f32 %v9046_v58, %v1914_v38  ;;  %v9047_v35 = vld [vmem:[#allocation34_spill] sm:$0xff]  ;;  %v9048_v13 = vld [vmem:[#allocation180_spill] sm:$0xff]  ;;  %v9049_v55 = vld [vmem:[#allocation25_spill] sm:$0xff]  ;;  %4607 = vmatprep.mubr.msk.f32.mxu1 %vm225_vm1, %v2273_v46  ;;  %v2116_v60 = vpop.permute.xlu0 %2115 }
 0x365   : > { %v1520_v22 = vadd.f32 %v9047_v35, %v1390_v50  ;;  %v1183_v11 = vadd.f32 %v9048_v13, %v6369_v17  ;;  %v2047_v6 = vadd.f32 %v9049_v55, %v1913_v25  ;;  %v2210_v54 = vmax.f32 %v2178_v40, 0.0  ;;  %v9050_v51 = vld [vmem:[#allocation186_spill] sm:$0xff]  ;;  %2243 = vst.msk [vmem:[#allocation2 + $0x139] sm:$0xff] %vm225_vm1, %v2211_v61  ;;  %v9052_v0 = vld [vmem:[#allocation181_spill] sm:$0xff]  ;;  %v9054_v1 = vld [vmem:[#allocation191_spill] sm:$0xff] }
 0x366   : > { %v1655_v29 = vadd.f32 %v9050_v51, %v1521_v19  ;;  %v9051_v27 = vld [vmem:[#allocation46_spill] sm:$0xff]  ;;  %v2181_v24 = vadd.f32 %v2112_v10, %v2048_v63  ;;  %v9053_v23 = vld [vmem:[#allocation185_spill] sm:$0xff]  ;;  %v1915_v17 = vadd.f32 %v9054_v1, %v1785_v56  ;;  %v2274_v26 = vld [vmem:[#allocation2 + $0xb8] sm:$0xff] }
 0x367   : > { %v1916_v7 = vadd.f32 %v9051_v27, %v1786_v43  ;;  %v1392_v62 = vadd.f32 %v9052_v0, %v1183_v11  ;;  %v1654_v49 = vadd.f32 %v9053_v23, %v1520_v22  ;;  %2242 = vst.msk [vmem:[#allocation2 + $0x129] sm:$0xff] %vm225_vm1, %v2210_v54  ;;  %v2180_v28 = vadd.f32 %v2110_v8, %v2047_v6  ;;  %v9055_v4 = vld [vmem:[#allocation188_spill] sm:$0xff]  ;;  %v9056_v31 = vld [vmem:[#allocation37_spill] sm:$0xff]  ;;  %v9057_v42 = vld [vmem:[#allocation183_spill] sm:$0xff]  ;;  %v2114_v59 = vpop.permute.xlu1 %2113 }
 0x368   : > { %v1788_v52 = vadd.f32 %v9055_v4, %v1655_v29  ;;  %v2213_v21 = vmax.f32 %v2181_v24, 0.0  ;;  %4608 = vmatmul.mubr.msk.f32.gmra.mrb[22].mxu1 %vm225_vm1, %v2274_v26  ;;  %v2275_v9 = vld [vmem:[#allocation2 + $0xc0] sm:$0xff]  ;;  %v9058_v36 = vld [vmem:[#allocation187_spill] sm:$0xff]  ;;  %v9060_v44 = vld [vmem:[#allocation192_spill] sm:$0xff]  ;;  %v2120_v16 = vpop.permute.xlu0 %2119 }
 0x369   : > { %v2050_v18 = vadd.f32 %v9056_v31, %v1916_v7  ;;  %v1522_v12 = vadd.f32 %v9057_v42, %v1392_v62  ;;  %v1787_v30 = vadd.f32 %v9058_v36, %v1654_v49  ;;  %v9059_v20 = vld [vmem:[#allocation55_spill] sm:$0xff]  ;;  %v2212_v41 = vmax.f32 %v2180_v28, 0.0  ;;  %4610 = vmatprep.mubr.msk.f32.mxu1 %vm225_vm1, %v2275_v9  ;;  %v9061_v15 = vld [vmem:[#allocation189_spill] sm:$0xff]  ;;  %v2276_v33 = vld [vmem:[#allocation2 + $0xc8] sm:$0xff] }
 0x36a   : > { %v2049_v34 = vadd.f32 %v9059_v20, %v1915_v17  ;;  %v1918_v39 = vadd.f32 %v9060_v44, %v1788_v52  ;;  %2245 = vst.msk [vmem:[#allocation2 + $0x151] sm:$0xff] %vm225_vm1, %v2213_v21  ;;  %v9062_v47 = vld [vmem:[#allocation193_spill] sm:$0xff]  ;;  %v9063_v2 = vld [vmem:[#allocation51_spill] sm:$0xff]  ;;  %v9064_v56 = vld [vmem:[#allocation190_spill] sm:$0xff] }
 0x36b   : > { %v2183_v3 = vadd.f32 %v2116_v60, %v2050_v18  ;;  %v1656_v48 = vadd.f32 %v9061_v15, %v1522_v12  ;;  %v1917_v37 = vadd.f32 %v9062_v47, %v1787_v30  ;;  %2244 = vst.msk [vmem:[#allocation2 + $0x141] sm:$0xff] %vm225_vm1, %v2212_v41  ;;  %v2277_v5 = vld [vmem:[#allocation2 + $0xd0] sm:$0xff]  ;;  %v9065_v25 = vld [vmem:[#allocation56_spill] sm:$0xff]  ;;  %v2118_v53 = vpop.permute.xlu1 %2117  ;;  %v9066_v19 = vld [vmem:[#allocation194_spill] sm:$0xff] }
 0x36c   : > { %v2182_v38 = vadd.f32 %v2114_v59, %v2049_v34  ;;  %v2052_v32 = vadd.f32 %v9063_v2, %v1918_v39  ;;  %4611 = vmatmul.mubr.msk.f32.gmra.mrb[24].mxu1 %vm225_vm1, %v2276_v33  ;;  %v2278_v61 = vld [vmem:[#allocation2 + $0xd8] sm:$0xff]  ;;  %v2279_v35 = vld [vmem:[#allocation2 + $0xe0] sm:$0xff]  ;;  %v2280_v6 = vld [vmem:[#allocation2 + $0xe8] sm:$0xff] }
 0x36d   : > { %v2215_v50 = vmax.f32 %v2183_v3, 0.0  ;;  %v1789_v14 = vadd.f32 %v9064_v56, %v1656_v48  ;;  %v2051_v40 = vadd.f32 %v9065_v25, %v1917_v37  ;;  %4613 = vmatprep.mubr.msk.f32.mxu1 %vm225_vm1, %v2277_v5  ;;  %v2281_v54 = vld [vmem:[#allocation2 + $0xf0] sm:$0xff]  ;;  %v2282_v51 = vld [vmem:[#allocation2 + $0xf8] sm:$0xff]  ;;  %v2284_v29 = vld [vmem:[#allocation2 + $0x108] sm:$0xff] }
 0x36e   : > { %v2214_v45 = vmax.f32 %v2182_v38, 0.0  ;;  %v2185_v43 = vadd.f32 %v2120_v16, %v2052_v32  ;;  %v2285_v27 = vld [vmem:[#allocation2 + $0x110] sm:$0xff]  ;;  %v2286_v7 = vld [vmem:[#allocation2 + $0x118] sm:$0xff]  ;;  %v2287_v24 = vld [vmem:[#allocation2 + $0x120] sm:$0xff] }
 0x36f   : > { %2247 = vst.msk [vmem:[#allocation2 + $0x169] sm:$0xff] %vm225_vm1, %v2215_v50  ;;  %v1919_v58 = vadd.f32 %v9066_v19, %v1789_v14  ;;  %v2184_v63 = vadd.f32 %v2118_v53, %v2051_v40  ;;  %v2122_v11 = vpop.permute.xlu1 %2121  ;;  %v2288_v8 = vld [vmem:[#allocation2 + $0x128] sm:$0xff]  ;;  %v2289_v0 = vld [vmem:[#allocation2 + $0x130] sm:$0xff]  ;;  %v2290_v62 = vld [vmem:[#allocation2 + $0x138] sm:$0xff] }
 0x370   : > { %2246 = vst.msk [vmem:[#allocation2 + $0x159] sm:$0xff] %vm225_vm1, %v2214_v45  ;;  %v2217_v46 = vmax.f32 %v2185_v43, 0.0  ;;  %4614 = vmatmul.mubr.msk.f32.gmra.mrb[26].mxu1 %vm225_vm1, %v2278_v61  ;;  %v2302_v9 = vld [vmem:[#allocation2 + $0x198] sm:$0xff]  ;;  %v2303_v42 = vld [vmem:[#allocation2 + $0x1a0] sm:$0xff]  ;;  %v2304_v12 = vld [vmem:[#allocation2 + $0x1a8] sm:$0xff] }
 0x371   : > { %v2053_v22 = vadd.f32 %v6397_v57, %v1919_v58  ;;  %v2216_v13 = vmax.f32 %v2184_v63, 0.0  ;;  %4616 = vmatprep.mubr.msk.f32.mxu1 %vm225_vm1, %v2279_v35  ;;  %v2283_v57 = vld [vmem:[#allocation2 + $0x100] sm:$0xff]  ;;  %v2293_v1 = vld [vmem:[#allocation2 + $0x150] sm:$0xff]  ;;  %v9068_v41 = vld [vmem:[#allocation202_spill] sm:$0xff] }
 0x372   : > { %2249 = vst.msk [vmem:[#allocation2 + $0x181] sm:$0xff] %vm225_vm1, %v2217_v46  ;;  %v2291_v23 = vld [vmem:[#allocation2 + $0x140] sm:$0xff]  ;;  %v2292_v49 = vld [vmem:[#allocation2 + $0x148] sm:$0xff]  ;;  %v9069_v60 = vrot.slane %v9068_v41, 1  ;;  %v9071_v33 = vrot.slane %v9068_v41, 2 }
 0x373   : > { %2248 = vst.msk [vmem:[#allocation2 + $0x171] sm:$0xff] %vm225_vm1, %v2216_v13  ;;  %v2186_v55 = vadd.f32 %v2122_v11, %v2053_v22 }
 0x374   : > { %4617 = vmatmul.mubr.msk.f32.gmra.mrb[28].mxu1 %vm225_vm1, %v2280_v6 }
 0x375   : > { %v2218_v10 = vmax.f32 %v2186_v55, 0.0  ;;  %4619 = vmatprep.mubr.msk.f32.mxu1 %vm225_vm1, %v2281_v54 }
 0x376   : > { %v2296_v26 = vld [vmem:[#allocation2 + $0x168] sm:$0xff] }
 0x377   : > { %2250 = vst.msk [vmem:[#allocation2 + $0x189] sm:$0xff] %vm225_vm1, %v2218_v10  ;;  %v2294_v17 = vld [vmem:[#allocation2 + $0x158] sm:$0xff]  ;;  %v2295_v28 = vld [vmem:[#allocation2 + $0x160] sm:$0xff] }
 0x378   : > { %4620 = vmatmul.mubr.msk.f32.gmra.mrb[30].mxu1 %vm225_vm1, %v2282_v51 }
 0x379   : > { %4622 = vmatprep.mubr.msk.f32.mxu1 %vm225_vm1, %v2283_v57  ;;  %v2299_v31 = vld [vmem:[#allocation2 + $0x180] sm:$0xff] }
 0x37a   : > { %v2297_v4 = vld [vmem:[#allocation2 + $0x170] sm:$0xff]  ;;  %v2298_v52 = vld [vmem:[#allocation2 + $0x178] sm:$0xff] }
 0x37c   : > { %4623 = vmatmul.mubr.msk.f32.gmra.mrb[32].mxu1 %vm225_vm1, %v2284_v29 }
 0x37d   : > { %4625 = vmatprep.mubr.msk.f32.mxu1 %vm225_vm1, %v2285_v27 }
 0x37e   : > { %v2300_v18 = vld [vmem:[#allocation2 + $0x188] sm:$0xff]  ;;  %v2301_v21 = vld [vmem:[#allocation2 + $0x190] sm:$0xff] }
 0x380   : > { %4626 = vmatmul.mubr.msk.f32.gmra.mrb[34].mxu1 %vm225_vm1, %v2286_v7 }
 0x381   : > { %4628 = vmatprep.mubr.msk.f32.mxu1 %vm225_vm1, %v2287_v24 }
 0x384   : > { %4629 = vmatmul.mubr.msk.f32.gmra.mrb[36].mxu1 %vm225_vm1, %v2288_v8 }
 0x385   : > { %4631 = vmatprep.mubr.msk.f32.mxu1 %vm225_vm1, %v2289_v0 }
 0x388   : > { %4632 = vmatmul.mubr.msk.f32.gmra.mrb[38].mxu1 %vm225_vm1, %v2290_v62 }
 0x389   : > { %4634 = vmatprep.mubr.msk.f32.mxu1 %vm225_vm1, %v2291_v23 }
 0x38c   : > { %4635 = vmatmul.mubr.msk.f32.gmra.mrb[40].mxu1 %vm225_vm1, %v2292_v49 }
 0x38d   : > { %4637 = vmatprep.mubr.msk.f32.mxu1 %vm225_vm1, %v2293_v1 }
 0x390   : > { %4638 = vmatmul.mubr.msk.f32.gmra.mrb[42].mxu1 %vm225_vm1, %v2294_v17 }
 0x391   : > { %4640 = vmatprep.mubr.msk.f32.mxu1 %vm225_vm1, %v2295_v28 }
 0x394   : > { %4641 = vmatmul.mubr.msk.f32.gmra.mrb[44].mxu1 %vm225_vm1, %v2296_v26 }
 0x395   : > { %4643 = vmatprep.mubr.msk.f32.mxu1 %vm225_vm1, %v2297_v4 }
 0x398   : > { %4644 = vmatmul.mubr.msk.f32.gmra.mrb[46].mxu1 %vm225_vm1, %v2298_v52 }
 0x399   : > { %4646 = vmatprep.mubr.msk.f32.mxu1 %vm225_vm1, %v2299_v31 }
 0x39c   : > { %4647 = vmatmul.mubr.msk.f32.gmra.mrb[48].mxu1 %vm225_vm1, %v2300_v18 }
 0x39d   : > { %4649 = vmatprep.mubr.msk.f32.mxu1 %vm225_vm1, %v2301_v21 }
 0x3a0   : > { %4650 = vmatmul.mubr.msk.f32.gmra.mrb[50].mxu1 %vm225_vm1, %v2302_v9 }
 0x3a1   : > { %4652 = vmatprep.mubr.msk.f32.mxu1 %vm225_vm1, %v2303_v42 }
 0x3a4   : > { %4653 = vmatmul.mubr.msk.f32.gmra.mrb[52].mxu1 %vm225_vm1, %v2304_v12 }
 0x40d   : > { %v6687_v36 = vpop.f32.mrb[2].mxu1 }
 0x40e   : > { %9067 = vst [vmem:[#allocation57_spill] sm:$0xff] %v6687_v36  ;;  %3311 = vrot.lane.b32.xlu0 %v6687_v36, %s4683_s28  ;;  %v2547_v30 = vpop.f32.mrb[3].mxu1  ;;  %v2898_v3 = vrot.slane %v6687_v36, 1  ;;  %v3106_v47 = vrot.slane %v6687_v36, 2 }
 0x40f   : > { %v2896_v20 = vrot.slane %v2547_v30, 1  ;;  %v3104_v34 = vrot.slane %v2547_v30, 2 }
 0x411   : > { %v2897_v44 = vsel %vm975_vm4, %v9069_v60, %v2896_v20  ;;  %v3105_v2 = vsel %vm1184_vm5, %v9071_v33, %v3104_v34 }
 0x412   : > { %2975 = vrot.lane.b32.xlu1 %v2897_v44, %s4681_s26 }
 0x414   : > { %v4582_v39 = vpop.f32.mrb[4].mxu1 }
 0x415   : > { %v2901_v59 = vrot.slane %v4582_v39, 1  ;;  %v3109_v15 = vrot.slane %v4582_v39, 2  ;;  %v6696_v48 = vpop.f32.mrb[5].mxu1 }
 0x416   : > { %9070 = vst [vmem:[#allocation54_spill] sm:$0xff] %v6696_v48  ;;  %v2899_v37 = vrot.slane %v6696_v48, 1  ;;  %v3107_v38 = vrot.slane %v6696_v48, 2  ;;  %3183 = vrot.lane.b32.xlu1 %v3105_v2, %s4682_s27 }
 0x418   : > { %v6705_v32 = vpop.f32.mrb[6].mxu1  ;;  %v6708_v50 = vsel %vm975_vm4, %v2898_v3, %v2899_v37  ;;  %v6711_v5 = vsel %vm1184_vm5, %v3106_v47, %v3107_v38  ;;  %v6714_v56 = vsel %vm975_vm4, %v2899_v37, %v2901_v59  ;;  %v6717_v14 = vsel %vm1184_vm5, %v3107_v38, %v3109_v15 }
 0x419   : > { %9072 = vst [vmem:[#allocation61_spill] sm:$0xff] %v6705_v32  ;;  %9073 = vst [vmem:[#allocation64_spill] sm:$0xff] %v6711_v5  ;;  %2977 = vrot.lane.b32.xlu0 %v6708_v50, %s4681_s26  ;;  %v6721_v25 = vpop.f32.mrb[7].mxu1  ;;  %v2904_v40 = vrot.slane %v6705_v32, 1  ;;  %v3112_v45 = vrot.slane %v6705_v32, 2 }
 0x41a   : > { %9074 = vst [vmem:[#allocation58_spill] sm:$0xff] %v6717_v14  ;;  %9075 = vst [vmem:[#allocation59_spill] sm:$0xff] %v6721_v25  ;;  %v2903_v16 = vrot.slane %v6721_v25, 1  ;;  %v3111_v43 = vrot.slane %v6721_v25, 2  ;;  %3313 = vrot.lane.b32.xlu1 %v6696_v48, %s4683_s28 }
 0x41c   : > { %v6729_v53 = vpop.f32.mrb[8].mxu1  ;;  %v6732_v19 = vsel %vm975_vm4, %v2903_v16, %v2904_v40  ;;  %v6735_v58 = vsel %vm1184_vm5, %v3111_v43, %v3112_v45 }
 0x41d   : > { %9076 = vst [vmem:[#allocation67_spill] sm:$0xff] %v6729_v53  ;;  %9077 = vst [vmem:[#allocation60_spill] sm:$0xff] %v6735_v58  ;;  %3185 = vrot.lane.b32.xlu0 %v6711_v5, %s4682_s27  ;;  %v2577_v63 = vpop.f32.mrb[9].mxu1  ;;  %v2908_v54 = vrot.slane %v6729_v53, 1  ;;  %v3116_v51 = vrot.slane %v6729_v53, 2 }
 0x41e   : > { %v2906_v61 = vrot.slane %v2577_v63, 1  ;;  %v3114_v46 = vrot.slane %v2577_v63, 2  ;;  %2979 = vrot.lane.b32.xlu1 %v6714_v56, %s4681_s26 }
 0x420   : > { %v4591_v35 = vpop.f32.mrb[10].mxu1  ;;  %v6742_v22 = vsel %vm975_vm4, %v2904_v40, %v2906_v61  ;;  %v6745_v13 = vsel %vm1184_vm5, %v3112_v45, %v3114_v46 }
 0x421   : > { %9078 = vst [vmem:[#allocation63_spill] sm:$0xff] %v6745_v13  ;;  %v2911_v11 = vrot.slane %v4591_v35, 1  ;;  %v3119_v55 = vrot.slane %v4591_v35, 2  ;;  %3315 = vrot.lane.b32.xlu0 %v6721_v25, %s4683_s28  ;;  %v6749_v6 = vpop.f32.mrb[11].mxu1 }
 0x422   : > { %9079 = vst [vmem:[#allocation66_spill] sm:$0xff] %v6749_v6  ;;  %v2909_v10 = vrot.slane %v6749_v6, 1  ;;  %v3117_v57 = vrot.slane %v6749_v6, 2  ;;  %3187 = vrot.lane.b32.xlu1 %v6717_v14, %s4682_s27 }
 0x424   : > { %v6757_v29 = vpop.f32.mrb[12].mxu1  ;;  %v6760_v27 = vsel %vm975_vm4, %v2908_v54, %v2909_v10  ;;  %v6763_v7 = vsel %vm1184_vm5, %v3116_v51, %v3117_v57  ;;  %v6766_v24 = vsel %vm975_vm4, %v2909_v10, %v2911_v11  ;;  %v6769_v8 = vsel %vm1184_vm5, %v3117_v57, %v3119_v55 }
 0x425   : > { %9080 = vst [vmem:[#allocation62_spill] sm:$0xff] %v6757_v29  ;;  %9081 = vst [vmem:[#allocation69_spill] sm:$0xff] %v6763_v7  ;;  %2981 = vrot.lane.b32.xlu0 %v6732_v19, %s4681_s26  ;;  %v6773_v0 = vpop.f32.mrb[13].mxu1  ;;  %v2914_v62 = vrot.slane %v6757_v29, 1  ;;  %v3122_v23 = vrot.slane %v6757_v29, 2 }
 0x426   : > { %9082 = vst [vmem:[#allocation74_spill] sm:$0xff] %v6766_v24  ;;  %9083 = vst [vmem:[#allocation65_spill] sm:$0xff] %v6769_v8  ;;  %v2913_v49 = vrot.slane %v6773_v0, 1  ;;  %v3121_v1 = vrot.slane %v6773_v0, 2  ;;  %3317 = vrot.lane.b32.xlu1 %v6705_v32, %s4683_s28 }
 0x427   : > { %9084 = vst [vmem:[#allocation68_spill] sm:$0xff] %v6773_v0 }
 0x428   : > { %v6781_v17 = vpop.f32.mrb[14].mxu1  ;;  %v6784_v28 = vsel %vm975_vm4, %v2913_v49, %v2914_v62  ;;  %v6787_v26 = vsel %vm1184_vm5, %v3121_v1, %v3122_v23 }
 0x429   : > { %9085 = vst [vmem:[#allocation77_spill] sm:$0xff] %v6781_v17  ;;  %9086 = vst [vmem:[#allocation70_spill] sm:$0xff] %v6784_v28  ;;  %3189 = vrot.lane.b32.xlu0 %v6735_v58, %s4682_s27  ;;  %v2607_v4 = vpop.f32.mrb[15].mxu1  ;;  %v2918_v20 = vrot.slane %v6781_v17, 1  ;;  %v3126_v60 = vrot.slane %v6781_v17, 2 }
 0x42a   : > { %9087 = vst [vmem:[#allocation71_spill] sm:$0xff] %v6787_v26  ;;  %v2916_v52 = vrot.slane %v2607_v4, 1  ;;  %v3124_v31 = vrot.slane %v2607_v4, 2  ;;  %2983 = vrot.lane.b32.xlu1 %v6742_v22, %s4681_s26 }
 0x42c   : > { %v4600_v18 = vpop.f32.mrb[16].mxu1  ;;  %v6794_v21 = vsel %vm975_vm4, %v2914_v62, %v2916_v52  ;;  %v6797_v9 = vsel %vm1184_vm5, %v3122_v23, %v3124_v31 }
 0x42d   : > { %9088 = vst [vmem:[#allocation75_spill] sm:$0xff] %v6794_v21  ;;  %9089 = vst [vmem:[#allocation76_spill] sm:$0xff] %v6797_v9  ;;  %v2921_v42 = vrot.slane %v4600_v18, 1  ;;  %v3129_v12 = vrot.slane %v4600_v18, 2  ;;  %3319 = vrot.lane.b32.xlu0 %v6729_v53, %s4683_s28  ;;  %v6801_v30 = vpop.f32.mrb[17].mxu1 }
 0x42e   : > { %9090 = vst [vmem:[#allocation78_spill] sm:$0xff] %v6801_v30  ;;  %v2919_v34 = vrot.slane %v6801_v30, 1  ;;  %v3127_v44 = vrot.slane %v6801_v30, 2  ;;  %3191 = vrot.lane.b32.xlu1 %v6745_v13, %s4682_s27 }
 0x430   : > { %v6809_v39 = vpop.f32.mrb[18].mxu1  ;;  %v6812_v3 = vsel %vm975_vm4, %v2918_v20, %v2919_v34  ;;  %v6815_v59 = vsel %vm1184_vm5, %v3126_v60, %v3127_v44  ;;  %v6818_v15 = vsel %vm975_vm4, %v2919_v34, %v2921_v42  ;;  %v6821_v47 = vsel %vm1184_vm5, %v3127_v44, %v3129_v12 }
 0x431   : > { %9091 = vst [vmem:[#allocation79_spill] sm:$0xff] %v6809_v39  ;;  %9092 = vst [vmem:[#allocation84_spill] sm:$0xff] %v6812_v3  ;;  %2985 = vrot.lane.b32.xlu0 %v6760_v27, %s4681_s26  ;;  %v6825_v37 = vpop.f32.mrb[19].mxu1  ;;  %v2924_v38 = vrot.slane %v6809_v39, 1  ;;  %v3132_v33 = vrot.slane %v6809_v39, 2 }
 0x432   : > { %9093 = vst [vmem:[#allocation72_spill] sm:$0xff] %v6815_v59  ;;  %9094 = vst [vmem:[#allocation82_spill] sm:$0xff] %v6818_v15  ;;  %v2923_v2 = vrot.slane %v6825_v37, 1  ;;  %v3131_v40 = vrot.slane %v6825_v37, 2  ;;  %3321 = vrot.lane.b32.xlu1 %v6749_v6, %s4683_s28 }
 0x433   : > { %9095 = vst [vmem:[#allocation83_spill] sm:$0xff] %v6821_v47  ;;  %9096 = vst [vmem:[#allocation87_spill] sm:$0xff] %v6825_v37 }
 0x434   : > { %v6836_v16 = vsel %vm975_vm4, %v2923_v2, %v2924_v38  ;;  %v6839_v43 = vsel %vm1184_vm5, %v3131_v40, %v3132_v33 }
 0x435   : > { %9098 = vst [vmem:[#allocation80_spill] sm:$0xff] %v6836_v16  ;;  %9099 = vst [vmem:[#allocation81_spill] sm:$0xff] %v6839_v43  ;;  %3193 = vrot.lane.b32.xlu0 %v6763_v7, %s4682_s27 }
 0x436   : > { %v6833_v45 = vpop.f32.mrb[20].mxu1  ;;  %2987 = vrot.lane.b32.xlu1 %v6766_v24, %s4681_s26 }
 0x437   : > { %9097 = vst [vmem:[#allocation73_spill] sm:$0xff] %v6833_v45  ;;  %v2637_v63 = vpop.f32.mrb[21].mxu1  ;;  %v2928_v57 = vrot.slane %v6833_v45, 1  ;;  %v3136_v23 = vrot.slane %v6833_v45, 2 }
 0x438   : > { %v2926_v61 = vrot.slane %v2637_v63, 1  ;;  %v3134_v46 = vrot.slane %v2637_v63, 2 }
 0x439   : > { %3323 = vrot.lane.b32.xlu0 %v6773_v0, %s4683_s28 }
 0x43a   : > { %v6846_v11 = vsel %vm975_vm4, %v2924_v38, %v2926_v61  ;;  %v6849_v55 = vsel %vm1184_vm5, %v3132_v33, %v3134_v46  ;;  %3195 = vrot.lane.b32.xlu1 %v6769_v8, %s4682_s27 }
 0x43b   : > { %v4609_v35 = vpop.f32.mrb[22].mxu1  ;;  %9100 = vst [vmem:[#allocation86_spill] sm:$0xff] %v6846_v11  ;;  %9101 = vst [vmem:[#allocation85_spill] sm:$0xff] %v6849_v55 }
 0x43c   : > { %v2931_v54 = vrot.slane %v4609_v35, 1  ;;  %v3139_v10 = vrot.slane %v4609_v35, 2  ;;  %v6853_v51 = vpop.f32.mrb[23].mxu1 }
 0x43d   : > { %9102 = vst [vmem:[#allocation89_spill] sm:$0xff] %v6853_v51  ;;  %v2929_v62 = vrot.slane %v6853_v51, 1  ;;  %v3137_v49 = vrot.slane %v6853_v51, 2  ;;  %2989 = vrot.lane.b32.xlu0 %v6784_v28, %s4681_s26 }
 0x43e   : > { %3325 = vrot.lane.b32.xlu1 %v6757_v29, %s4683_s28 }
 0x43f   : > { %v6861_v1 = vpop.f32.mrb[24].mxu1  ;;  %v6864_v4 = vsel %vm975_vm4, %v2928_v57, %v2929_v62  ;;  %v6867_v52 = vsel %vm1184_vm5, %v3136_v23, %v3137_v49  ;;  %v6870_v31 = vsel %vm975_vm4, %v2929_v62, %v2931_v54  ;;  %v6873_v18 = vsel %vm1184_vm5, %v3137_v49, %v3139_v10 }
 0x440   : > { %9103 = vst [vmem:[#allocation91_spill] sm:$0xff] %v6861_v1  ;;  %9104 = vst [vmem:[#allocation88_spill] sm:$0xff] %v6864_v4  ;;  %v6877_v42 = vpop.f32.mrb[25].mxu1  ;;  %v2934_v12 = vrot.slane %v6861_v1, 1  ;;  %v3142_v20 = vrot.slane %v6861_v1, 2 }
 0x441   : > { %9105 = vst [vmem:[#allocation92_spill] sm:$0xff] %v6867_v52  ;;  %9106 = vst [vmem:[#allocation95_spill] sm:$0xff] %v6870_v31  ;;  %v2933_v34 = vrot.slane %v6877_v42, 1  ;;  %v3141_v60 = vrot.slane %v6877_v42, 2  ;;  %3197 = vrot.lane.b32.xlu0 %v6787_v26, %s4682_s27 }
 0x442   : > { %9107 = vst [vmem:[#allocation98_spill] sm:$0xff] %v6873_v18  ;;  %9108 = vst [vmem:[#allocation93_spill] sm:$0xff] %v6877_v42  ;;  %2991 = vrot.lane.b32.xlu1 %v6794_v21, %s4681_s26 }
 0x443   : > { %v6885_v44 = vpop.f32.mrb[26].mxu1  ;;  %v6888_v38 = vsel %vm975_vm4, %v2933_v34, %v2934_v12  ;;  %v6891_v33 = vsel %vm1184_vm5, %v3141_v60, %v3142_v20 }
 0x444   : > { %9109 = vst [vmem:[#allocation96_spill] sm:$0xff] %v6885_v44  ;;  %9110 = vst [vmem:[#allocation94_spill] sm:$0xff] %v6888_v38  ;;  %v2667_v2 = vpop.f32.mrb[27].mxu1  ;;  %v2938_v62 = vrot.slane %v6885_v44, 1  ;;  %v3146_v49 = vrot.slane %v6885_v44, 2 }
 0x445   : > { %9111 = vst [vmem:[#allocation97_spill] sm:$0xff] %v6891_v33  ;;  %v2936_v40 = vrot.slane %v2667_v2, 1  ;;  %v3144_v63 = vrot.slane %v2667_v2, 2  ;;  %3327 = vrot.lane.b32.xlu0 %v6781_v17, %s4683_s28 }
 0x446   : > { %3199 = vrot.lane.b32.xlu1 %v6797_v9, %s4682_s27 }
 0x447   : > { %v4618_v61 = vpop.f32.mrb[28].mxu1  ;;  %v6898_v46 = vsel %vm975_vm4, %v2934_v12, %v2936_v40  ;;  %v6901_v35 = vsel %vm1184_vm5, %v3142_v20, %v3144_v63 }
 0x448   : > { %9112 = vst [vmem:[#allocation99_spill] sm:$0xff] %v6901_v35  ;;  %v2941_v54 = vrot.slane %v4618_v61, 1  ;;  %v3149_v10 = vrot.slane %v4618_v61, 2  ;;  %v6905_v57 = vpop.f32.mrb[29].mxu1 }
 0x449   : > { %9113 = vst [vmem:[#allocation100_spill] sm:$0xff] %v6905_v57  ;;  %v2939_v23 = vrot.slane %v6905_v57, 1  ;;  %v3147_v34 = vrot.slane %v6905_v57, 2  ;;  %2993 = vrot.lane.b32.xlu0 %v6812_v3, %s4681_s26 }
 0x44a   : > { %3329 = vrot.lane.b32.xlu1 %v6801_v30, %s4683_s28 }
 0x44b   : > { %v6913_v12 = vpop.f32.mrb[30].mxu1  ;;  %v6916_v20 = vsel %vm975_vm4, %v2938_v62, %v2939_v23  ;;  %v6919_v60 = vsel %vm1184_vm5, %v3146_v49, %v3147_v34  ;;  %v6922_v2 = vsel %vm975_vm4, %v2939_v23, %v2941_v54  ;;  %v6925_v40 = vsel %vm1184_vm5, %v3147_v34, %v3149_v10 }
 0x44c   : > { %9114 = vst [vmem:[#allocation104_spill] sm:$0xff] %v6913_v12  ;;  %9115 = vst [vmem:[#allocation105_spill] sm:$0xff] %v6919_v60  ;;  %v6929_v63 = vpop.f32.mrb[31].mxu1  ;;  %v2944_v61 = vrot.slane %v6913_v12, 1  ;;  %v3152_v48 = vrot.slane %v6913_v12, 2 }
 0x44d   : > { %9116 = vst [vmem:[#allocation101_spill] sm:$0xff] %v6925_v40  ;;  %v2943_v62 = vrot.slane %v6929_v63, 1  ;;  %v3151_v49 = vrot.slane %v6929_v63, 2  ;;  %3201 = vrot.lane.b32.xlu0 %v6815_v59, %s4682_s27 }
 0x44e   : > { %2995 = vrot.lane.b32.xlu1 %v6818_v15, %s4681_s26 }
 0x44f   : > { %v6937_v54 = vpop.f32.mrb[32].mxu1  ;;  %v6940_v10 = vsel %vm975_vm4, %v2943_v62, %v2944_v61  ;;  %v6943_v23 = vsel %vm1184_vm5, %v3151_v49, %v3152_v48 }
 0x450   : > { %9117 = vst [vmem:[#allocation102_spill] sm:$0xff] %v6937_v54  ;;  %9118 = vst [vmem:[#allocation103_spill] sm:$0xff] %v6943_v23  ;;  %v2697_v34 = vpop.f32.mrb[33].mxu1  ;;  %v2948_v0 = vrot.slane %v6937_v54, 1  ;;  %v3156_v32 = vrot.slane %v6937_v54, 2 }
 0x451   : > { %v2946_v41 = vrot.slane %v2697_v34, 1  ;;  %v3154_v36 = vrot.slane %v2697_v34, 2  ;;  %3331 = vrot.lane.b32.xlu0 %v6825_v37, %s4683_s28 }
 0x452   : > { %3203 = vrot.lane.b32.xlu1 %v6821_v47, %s4682_s27 }
 0x453   : > { %v4627_v29 = vpop.f32.mrb[34].mxu1  ;;  %v6950_v30 = vsel %vm975_vm4, %v2944_v61, %v2946_v41  ;;  %v6953_v17 = vsel %vm1184_vm5, %v3152_v48, %v3154_v36 }
 0x454   : > { %9119 = vst [vmem:[#allocation106_spill] sm:$0xff] %v6953_v17  ;;  %v2951_v62 = vrot.slane %v4627_v29, 1  ;;  %v3159_v6 = vrot.slane %v4627_v29, 2  ;;  %v6957_v49 = vpop.f32.mrb[35].mxu1 }
 0x455   : > { %9120 = vst [vmem:[#allocation107_spill] sm:$0xff] %v6957_v49  ;;  %v2949_v34 = vrot.slane %v6957_v49, 1  ;;  %v3157_v53 = vrot.slane %v6957_v49, 2  ;;  %2997 = vrot.lane.b32.xlu0 %v6836_v16, %s4681_s26 }
 0x456   : > { %3333 = vrot.lane.b32.xlu1 %v6809_v39, %s4683_s28 }
 0x457   : > { %v6965_v36 = vpop.f32.mrb[36].mxu1  ;;  %v6968_v41 = vsel %vm975_vm4, %v2948_v0, %v2949_v34  ;;  %v6971_v48 = vsel %vm1184_vm5, %v3156_v32, %v3157_v53  ;;  %v6974_v29 = vsel %vm975_vm4, %v2949_v34, %v2951_v62  ;;  %v6977_v61 = vsel %vm1184_vm5, %v3157_v53, %v3159_v6 }
 0x458   : > { %9121 = vst [vmem:[#allocation108_spill] sm:$0xff] %v6965_v36  ;;  %9122 = vst [vmem:[#allocation111_spill] sm:$0xff] %v6971_v48  ;;  %v6981_v37 = vpop.f32.mrb[37].mxu1  ;;  %v2954_v25 = vrot.slane %v6965_v36, 1  ;;  %v3162_v47 = vrot.slane %v6965_v36, 2 }
 0x459   : > { %9123 = vst [vmem:[#allocation109_spill] sm:$0xff] %v6977_v61  ;;  %9124 = vst [vmem:[#allocation112_spill] sm:$0xff] %v6981_v37  ;;  %v2953_v0 = vrot.slane %v6981_v37, 1  ;;  %v3161_v32 = vrot.slane %v6981_v37, 2  ;;  %3205 = vrot.lane.b32.xlu0 %v6839_v43, %s4682_s27 }
 0x45a   : > { %2999 = vrot.lane.b32.xlu1 %v6846_v11, %s4681_s26 }
 0x45b   : > { %v6989_v62 = vpop.f32.mrb[38].mxu1  ;;  %v6992_v53 = vsel %vm975_vm4, %v2953_v0, %v2954_v25  ;;  %v6995_v6 = vsel %vm1184_vm5, %v3161_v32, %v3162_v47 }
 0x45c   : > { %9125 = vst [vmem:[#allocation110_spill] sm:$0xff] %v6989_v62  ;;  %9126 = vst [vmem:[#allocation113_spill] sm:$0xff] %v6995_v6  ;;  %v2727_v34 = vpop.f32.mrb[39].mxu1  ;;  %v2958_v43 = vrot.slane %v6989_v62, 1  ;;  %v3166_v7 = vrot.slane %v6989_v62, 2 }
 0x45d   : > { %v2956_v9 = vrot.slane %v2727_v34, 1  ;;  %v3164_v59 = vrot.slane %v2727_v34, 2  ;;  %3335 = vrot.lane.b32.xlu0 %v6833_v45, %s4683_s28 }
 0x45e   : > { %3207 = vrot.lane.b32.xlu1 %v6849_v55, %s4682_s27 }
 0x45f   : > { %v4636_v8 = vpop.f32.mrb[40].mxu1  ;;  %v7002_v39 = vsel %vm975_vm4, %v2954_v25, %v2956_v9  ;;  %v7005_v26 = vsel %vm1184_vm5, %v3162_v47, %v3164_v59 }
 0x460   : > { %9127 = vst [vmem:[#allocation114_spill] sm:$0xff] %v7005_v26  ;;  %v2961_v0 = vrot.slane %v4636_v8, 1  ;;  %v3169_v13 = vrot.slane %v4636_v8, 2  ;;  %v7009_v32 = vpop.f32.mrb[41].mxu1 }
 0x461   : > { %9128 = vst [vmem:[#allocation115_spill] sm:$0xff] %v7009_v32  ;;  %v2959_v34 = vrot.slane %v7009_v32, 1  ;;  %v3167_v14 = vrot.slane %v7009_v32, 2  ;;  %3001 = vrot.lane.b32.xlu0 %v6864_v4, %s4681_s26 }
 0x462   : > { %3337 = vrot.lane.b32.xlu1 %v6853_v51, %s4683_s28 }
 0x463   : > { %v7017_v25 = vpop.f32.mrb[42].mxu1  ;;  %v7020_v8 = vsel %vm975_vm4, %v2958_v43, %v2959_v34  ;;  %v7023_v9 = vsel %vm1184_vm5, %v3166_v7, %v3167_v14  ;;  %v7026_v59 = vsel %vm975_vm4, %v2959_v34, %v2961_v0  ;;  %v7029_v47 = vsel %vm1184_vm5, %v3167_v14, %v3169_v13 }
 0x464   : > { %9129 = vst [vmem:[#allocation118_spill] sm:$0xff] %v7017_v25  ;;  %9130 = vst [vmem:[#allocation119_spill] sm:$0xff] %v7023_v9  ;;  %v7033_v45 = vpop.f32.mrb[43].mxu1  ;;  %v2964_v55 = vrot.slane %v7017_v25, 1  ;;  %v3172_v58 = vrot.slane %v7017_v25, 2 }
 0x465   : > { %9131 = vst [vmem:[#allocation116_spill] sm:$0xff] %v7029_v47  ;;  %9132 = vst [vmem:[#allocation117_spill] sm:$0xff] %v7033_v45  ;;  %v2963_v43 = vrot.slane %v7033_v45, 1  ;;  %v3171_v7 = vrot.slane %v7033_v45, 2  ;;  %3209 = vrot.lane.b32.xlu0 %v6867_v52, %s4682_s27 }
 0x466   : > { %3003 = vrot.lane.b32.xlu1 %v6870_v31, %s4681_s26 }
 0x467   : > { %v7041_v0 = vpop.f32.mrb[44].mxu1  ;;  %v7044_v14 = vsel %vm975_vm4, %v2963_v43, %v2964_v55  ;;  %v7047_v13 = vsel %vm1184_vm5, %v3171_v7, %v3172_v58 }
 0x468   : > { %9133 = vst [vmem:[#allocation120_spill] sm:$0xff] %v7047_v13  ;;  %v2757_v34 = vpop.f32.mrb[45].mxu1  ;;  %v2968_v52 = vrot.slane %v7041_v0, 1  ;;  %v3176_v31 = vrot.slane %v7041_v0, 2 }
 0x469   : > { %v2966_v5 = vrot.slane %v2757_v34, 1  ;;  %v3174_v11 = vrot.slane %v2757_v34, 2  ;;  %3339 = vrot.lane.b32.xlu0 %v6877_v42, %s4683_s28 }
 0x46a   : > { %3211 = vrot.lane.b32.xlu1 %v6873_v18, %s4682_s27 }
 0x46b   : > { %v4645_v4 = vpop.f32.mrb[46].mxu1  ;;  %v7054_v51 = vsel %vm975_vm4, %v2964_v55, %v2966_v5  ;;  %v7057_v15 = vsel %vm1184_vm5, %v3172_v58, %v3174_v11 }
 0x46c   : > { %9134 = vst [vmem:[#allocation121_spill] sm:$0xff] %v7054_v51  ;;  %9135 = vst [vmem:[#allocation124_spill] sm:$0xff] %v7057_v15  ;;  %v2971_v43 = vrot.slane %v4645_v4, 1  ;;  %v3179_v16 = vrot.slane %v4645_v4, 2  ;;  %v7061_v7 = vpop.f32.mrb[47].mxu1 }
 0x46d   : > { %v2969_v34 = vrot.slane %v7061_v7, 1  ;;  %v3177_v21 = vrot.slane %v7061_v7, 2  ;;  %3005 = vrot.lane.b32.xlu0 %v6888_v38, %s4681_s26 }
 0x46e   : > { %3341 = vrot.lane.b32.xlu1 %v6861_v1, %s4683_s28 }
 0x46f   : > { %v7069_v5 = vpop.f32.mrb[48].mxu1  ;;  %v7072_v58 = vsel %vm975_vm4, %v2968_v52, %v2969_v34  ;;  %v7075_v11 = vsel %vm1184_vm5, %v3176_v31, %v3177_v21  ;;  %v7078_v55 = vsel %vm975_vm4, %v2969_v34, %v2971_v43  ;;  %v7081_v4 = vsel %vm1184_vm5, %v3177_v21, %v3179_v16 }
 0x470   : > { %9136 = vst [vmem:[#allocation125_spill] sm:$0xff] %v7072_v58  ;;  %9137 = vst [vmem:[#allocation122_spill] sm:$0xff] %v7075_v11  ;;  %v3441_v42 = vrot.slane %v7069_v5, 1  ;;  %v3574_v3 = vrot.slane %v7069_v5, 2  ;;  %v7087_v18 = vpop.f32.mrb[49].mxu1 }
 0x471   : > { %9138 = vst [vmem:[#allocation123_spill] sm:$0xff] %v7078_v55  ;;  %9139 = vst [vmem:[#allocation126_spill] sm:$0xff] %v7081_v4  ;;  %v3440_v52 = vrot.slane %v7087_v18, 1  ;;  %v3573_v31 = vrot.slane %v7087_v18, 2  ;;  %3213 = vrot.lane.b32.xlu0 %v6891_v33, %s4682_s27 }
 0x472   : > { %3007 = vrot.lane.b32.xlu1 %v6898_v46, %s4681_s26 }
 0x473   : > { %v7093_v43 = vpop.f32.mrb[50].mxu1  ;;  %v7096_v21 = vsel %vm975_vm4, %v3440_v52, %v3441_v42  ;;  %v7099_v16 = vsel %vm1184_vm5, %v3573_v31, %v3574_v3  ;;  %v7119_v52 = vpop.permute.xlu0 %2973 }
 0x474   : > { %9140 = vst [vmem:[#allocation127_spill] sm:$0xff] %v7093_v43  ;;  %9141 = vst [vmem:[#allocation128_spill] sm:$0xff] %v7096_v21  ;;  %v2787_v34 = vpop.f32.mrb[51].mxu1  ;;  %v3970_v31 = vrot.slane %v7093_v43, 2 }
 0x475   : > { %9142 = vst [vmem:[#allocation131_spill] sm:$0xff] %v7099_v16  ;;  %v3443_v38 = vrot.slane %v2787_v34, 1  ;;  %v3576_v24 = vrot.slane %v2787_v34, 2  ;;  %3343 = vrot.lane.b32.xlu0 %v6885_v44, %s4683_s28  ;;  %9145 = vst [vmem:[#allocation130_spill] sm:$0xff] %v7119_v52 }
 0x476   : > { %3215 = vrot.lane.b32.xlu1 %v6901_v35, %s4682_s27 }
 0x477   : > { %v7106_v28 = vsel %vm975_vm4, %v3441_v42, %v3443_v38  ;;  %v7109_v1 = vsel %vm1184_vm5, %v3574_v3, %v3576_v24  ;;  %v7127_v24 = vpop.permute.xlu0 %3181  ;;  %v3837_v38 = vrot.slane %v7093_v43, 1 }
 0x478   : > { %9143 = vst [vmem:[#allocation129_spill] sm:$0xff] %v7106_v28  ;;  %9144 = vst [vmem:[#allocation132_spill] sm:$0xff] %v7109_v1 }
 0x479   : > { %3009 = vrot.lane.b32.xlu0 %v6916_v20, %s4681_s26  ;;  %9146 = vst [vmem:[#allocation133_spill] sm:$0xff] %v7127_v24  ;;  %v7145_v24 = vpop.f32.mrb[52].mxu1 }
 0x47a   : > { %3345 = vrot.lane.b32.xlu1 %v6905_v57, %s4683_s28 }
 0x47d   : > { %3217 = vrot.lane.b32.xlu0 %v6919_v60, %s4682_s27 }
 0x47e   : > { %3011 = vrot.lane.b32.xlu1 %v6922_v2, %s4681_s26 }
 0x480   : > { %v7135_v42 = vpop.permute.xlu0 %3311 }
 0x481   : > { %3013 = vrot.lane.b32.xlu0 %v6940_v10, %s4681_s26  ;;  %9148 = vst [vmem:[#allocation135_spill] sm:$0xff] %v7135_v42 }
 0x482   : > { %3219 = vrot.lane.b32.xlu1 %v6925_v40, %s4682_s27 }
 0x484   : > { %v7131_v3 = vpop.permute.xlu1 %2975 }
 0x485   : > { %9147 = vst [vmem:[#allocation134_spill] sm:$0xff] %v7131_v3  ;;  %3221 = vrot.lane.b32.xlu0 %v6943_v23, %s4682_s27  ;;  %v7147_v3 = vpop.f32.mrb[53].mxu1 }
 0x486   : > { %3015 = vrot.lane.b32.xlu1 %v6950_v30, %s4681_s26  ;;  %v8519_v52 = vrot.slane %v7147_v3, 1  ;;  %v8520_v57 = vrot.slane %v7147_v3, 2 }
 0x488   : > { %v7141_v34 = vpop.permute.xlu1 %3183  ;;  %v7167_v43 = vsel %vm1184_vm5, %v3970_v31, %v8520_v57 }
 0x489   : > { %9149 = vst [vmem:[#allocation138_spill] sm:$0xff] %v7141_v34  ;;  %3017 = vrot.lane.b32.xlu0 %v6968_v41, %s4681_s26  ;;  %v7162_v34 = vsel %vm975_vm4, %v3837_v38, %v8519_v52  ;;  %9153 = vst [vmem:[#allocation140_spill] sm:$0xff] %v7167_v43 }
 0x48a   : > { %3223 = vrot.lane.b32.xlu1 %v6953_v17, %s4682_s27  ;;  %9152 = vst [vmem:[#allocation137_spill] sm:$0xff] %v7162_v34 }
 0x48b   : > { %v7151_v42 = vpop.permute.xlu0 %2977 }
 0x48c   : > { %9150 = vst [vmem:[#allocation139_spill] sm:$0xff] %v7151_v42  ;;  %v7155_v44 = vpop.permute.xlu1 %3313 }
 0x48d   : > { %9151 = vst [vmem:[#allocation136_spill] sm:$0xff] %v7155_v44  ;;  %3225 = vrot.lane.b32.xlu0 %v6971_v48, %s4682_s27 }
 0x48e   : > { %3019 = vrot.lane.b32.xlu1 %v6974_v29, %s4681_s26 }
 0x48f   : > { %v7171_v42 = vpop.permute.xlu0 %3185 }
 0x490   : > { %9154 = vst [vmem:[#allocation141_spill] sm:$0xff] %v7171_v42  ;;  %v7173_v1 = vpop.permute.xlu1 %2979 }
 0x491   : > { %9155 = vst [vmem:[#allocation10_spill] sm:$0xff] %v7173_v1  ;;  %3021 = vrot.lane.b32.xlu0 %v6992_v53, %s4681_s26  ;;  %v9197_v1 = vld [vmem:[#allocation75_spill] sm:$0xff] }
 0x492   : > { %3227 = vrot.lane.b32.xlu1 %v6977_v61, %s4682_s27 }
 0x493   : > { %v7179_v38 = vpop.permute.xlu0 %3315 }
 0x494   : > { %9156 = vst [vmem:[#allocation144_spill] sm:$0xff] %v7179_v38  ;;  %v7181_v52 = vpop.permute.xlu1 %3187 }
 0x495   : > { %9157 = vst [vmem:[#allocation6_spill] sm:$0xff] %v7181_v52  ;;  %3229 = vrot.lane.b32.xlu0 %v6995_v6, %s4682_s27 }
 0x496   : > { %3023 = vrot.lane.b32.xlu1 %v7002_v39, %s4681_s26 }
 0x497   : > { %v7187_v31 = vpop.permute.xlu0 %2981 }
 0x498   : > { %9158 = vst [vmem:[#allocation145_spill] sm:$0xff] %v7187_v31  ;;  %v7189_v57 = vpop.permute.xlu1 %3317  ;;  %v9201_v31 = vld [vmem:[#allocation82_spill] sm:$0xff] }
 0x499   : > { %9159 = vst [vmem:[#allocation90_spill] sm:$0xff] %v7189_v57  ;;  %3025 = vrot.lane.b32.xlu0 %v7020_v8, %s4681_s26 }
 0x49a   : > { %3231 = vrot.lane.b32.xlu1 %v7005_v26, %s4682_s27 }
 0x49b   : > { %v7195_v43 = vpop.permute.xlu0 %3189 }
 0x49c   : > { %9160 = vst [vmem:[#allocation142_spill] sm:$0xff] %v7195_v43  ;;  %v7197_v34 = vpop.permute.xlu1 %2983 }
 0x49d   : > { %9161 = vst [vmem:[#allocation143_spill] sm:$0xff] %v7197_v34  ;;  %3233 = vrot.lane.b32.xlu0 %v7023_v9, %s4682_s27 }
 0x49e   : > { %3027 = vrot.lane.b32.xlu1 %v7026_v59, %s4681_s26 }
 0x49f   : > { %v7203_v52 = vpop.permute.xlu0 %3319 }
 0x4a0   : > { %9162 = vst [vmem:[#allocation195_spill] sm:$0xff] %v7203_v52  ;;  %v7205_v44 = vpop.permute.xlu1 %3191 }
 0x4a1   : > { %9163 = vst [vmem:[#allocation146_spill] sm:$0xff] %v7205_v44  ;;  %3029 = vrot.lane.b32.xlu0 %v7044_v14, %s4681_s26 }
 0x4a2   : > { %3235 = vrot.lane.b32.xlu1 %v7029_v47, %s4682_s27 }
 0x4a3   : > { %v7211_v57 = vpop.permute.xlu0 %2985 }
 0x4a4   : > { %9164 = vst [vmem:[#allocation147_spill] sm:$0xff] %v7211_v57  ;;  %v7213_v43 = vpop.permute.xlu1 %3321 }
 0x4a5   : > { %9165 = vst [vmem:[#allocation14_spill] sm:$0xff] %v7213_v43  ;;  %3237 = vrot.lane.b32.xlu0 %v7047_v13, %s4682_s27 }
 0x4a6   : > { %3031 = vrot.lane.b32.xlu1 %v7054_v51, %s4681_s26 }
 0x4a7   : > { %v7219_v34 = vpop.permute.xlu0 %3193 }
 0x4a8   : > { %9166 = vst [vmem:[#allocation8_spill] sm:$0xff] %v7219_v34  ;;  %v7221_v52 = vpop.permute.xlu1 %2987 }
 0x4a9   : > { %9167 = vst [vmem:[#allocation148_spill] sm:$0xff] %v7221_v52  ;;  %3033 = vrot.lane.b32.xlu0 %v7072_v58, %s4681_s26 }
 0x4aa   : > { %3239 = vrot.lane.b32.xlu1 %v7057_v15, %s4682_s27 }
 0x4ab   : > { %v7227_v44 = vpop.permute.xlu0 %3323 }
 0x4ac   : > { %9168 = vst [vmem:[#allocation151_spill] sm:$0xff] %v7227_v44  ;;  %v7229_v57 = vpop.permute.xlu1 %3195 }
 0x4ad   : > { %9169 = vst [vmem:[#allocation12_spill] sm:$0xff] %v7229_v57  ;;  %3241 = vrot.lane.b32.xlu0 %v7075_v11, %s4682_s27 }
 0x4ae   : > { %3035 = vrot.lane.b32.xlu1 %v7078_v55, %s4681_s26 }
 0x4af   : > { %v7235_v43 = vpop.permute.xlu0 %2989 }
 0x4b0   : > { %9170 = vst [vmem:[#allocation149_spill] sm:$0xff] %v7235_v43  ;;  %v7237_v34 = vpop.permute.xlu1 %3325 }
 0x4b1   : > { %9171 = vst [vmem:[#allocation152_spill] sm:$0xff] %v7237_v34  ;;  %3347 = vrot.lane.b32.xlu0 %v6929_v63, %s4683_s28 }
 0x4b2   : > { %3243 = vrot.lane.b32.xlu1 %v7081_v4, %s4682_s27 }
 0x4b3   : > { %v7243_v52 = vpop.permute.xlu0 %3197 }
 0x4b4   : > { %9172 = vst [vmem:[#allocation196_spill] sm:$0xff] %v7243_v52  ;;  %v7245_v44 = vpop.permute.xlu1 %2991 }
 0x4b5   : > { %9173 = vst [vmem:[#allocation150_spill] sm:$0xff] %v7245_v44  ;;  %3351 = vrot.lane.b32.xlu0 %v6937_v54, %s4683_s28 }
 0x4b6   : > { %3349 = vrot.lane.b32.xlu1 %v6913_v12, %s4683_s28 }
 0x4b7   : > { %v7251_v57 = vpop.permute.xlu0 %3327 }
 0x4b8   : > { %9174 = vst [vmem:[#allocation153_spill] sm:$0xff] %v7251_v57  ;;  %v7253_v43 = vpop.permute.xlu1 %3199 }
 0x4b9   : > { %9175 = vst [vmem:[#allocation197_spill] sm:$0xff] %v7253_v43  ;;  %3355 = vrot.lane.b32.xlu0 %v6981_v37, %s4683_s28 }
 0x4ba   : > { %3353 = vrot.lane.b32.xlu1 %v6957_v49, %s4683_s28 }
 0x4bb   : > { %v7259_v34 = vpop.permute.xlu0 %2993 }
 0x4bc   : > { %9176 = vst [vmem:[#allocation154_spill] sm:$0xff] %v7259_v34  ;;  %v7261_v52 = vpop.permute.xlu1 %3329 }
 0x4bd   : > { %9177 = vst [vmem:[#allocation7_spill] sm:$0xff] %v7261_v52  ;;  %3359 = vrot.lane.b32.xlu0 %v6989_v62, %s4683_s28 }
 0x4be   : > { %3357 = vrot.lane.b32.xlu1 %v6965_v36, %s4683_s28 }
 0x4bf   : > { %v7267_v44 = vpop.permute.xlu0 %3201 }
 0x4c0   : > { %9178 = vst [vmem:[#allocation155_spill] sm:$0xff] %v7267_v44  ;;  %v7269_v57 = vpop.permute.xlu1 %2995 }
 0x4c1   : > { %9179 = vst [vmem:[#allocation18_spill] sm:$0xff] %v7269_v57  ;;  %3363 = vrot.lane.b32.xlu0 %v7033_v45, %s4683_s28 }
 0x4c2   : > { %3361 = vrot.lane.b32.xlu1 %v7009_v32, %s4683_s28 }
 0x4c3   : > { %v7275_v43 = vpop.permute.xlu0 %3331 }
 0x4c4   : > { %9180 = vst [vmem:[#allocation47_spill] sm:$0xff] %v7275_v43  ;;  %v7277_v34 = vpop.permute.xlu1 %3203 }
 0x4c5   : > { %9181 = vst [vmem:[#allocation158_spill] sm:$0xff] %v7277_v34  ;;  %3367 = vrot.lane.b32.xlu0 %v7041_v0, %s4683_s28 }
 0x4c6   : > { %3365 = vrot.lane.b32.xlu1 %v7017_v25, %s4683_s28 }
 0x4c7   : > { %v7283_v52 = vpop.permute.xlu0 %2997 }
 0x4c8   : > { %9182 = vst [vmem:[#allocation159_spill] sm:$0xff] %v7283_v52  ;;  %v7285_v44 = vpop.permute.xlu1 %3333 }
 0x4c9   : > { %9183 = vst [vmem:[#allocation16_spill] sm:$0xff] %v7285_v44  ;;  %3371 = vrot.lane.b32.xlu0 %v7087_v18, %s4683_s28 }
 0x4ca   : > { %3369 = vrot.lane.b32.xlu1 %v7061_v7, %s4683_s28 }
 0x4cb   : > { %v7291_v57 = vpop.permute.xlu0 %3205 }
 0x4cc   : > { %9184 = vst [vmem:[#allocation156_spill] sm:$0xff] %v7291_v57  ;;  %v7293_v43 = vpop.permute.xlu1 %2999 }
 0x4cd   : > { %9185 = vst [vmem:[#allocation157_spill] sm:$0xff] %v7293_v43  ;;  %3445 = vrot.lane.b32.xlu0 %v6708_v50, %s4684_s29 }
 0x4ce   : > { %3373 = vrot.lane.b32.xlu1 %v7069_v5, %s4683_s28 }
 0x4cf   : > { %v7299_v34 = vpop.permute.xlu0 %3335 }
 0x4d0   : > { %9186 = vst [vmem:[#allocation198_spill] sm:$0xff] %v7299_v34  ;;  %v7301_v52 = vpop.permute.xlu1 %3207  ;;  %v9193_v34 = vld [vmem:[#allocation74_spill] sm:$0xff] }
 0x4d1   : > { %9187 = vst [vmem:[#allocation160_spill] sm:$0xff] %v7301_v52  ;;  %3449 = vrot.lane.b32.xlu0 %v6732_v19, %s4684_s29  ;;  %v9192_v52 = vld [vmem:[#allocation70_spill] sm:$0xff] }
 0x4d2   : > { %3447 = vrot.lane.b32.xlu1 %v6714_v56, %s4684_s29 }
 0x4d3   : > { %v7307_v44 = vpop.permute.xlu0 %3001 }
 0x4d4   : > { %9188 = vst [vmem:[#allocation161_spill] sm:$0xff] %v7307_v44  ;;  %v7309_v57 = vpop.permute.xlu1 %3337 }
 0x4d5   : > { %9189 = vst [vmem:[#allocation199_spill] sm:$0xff] %v7309_v57  ;;  %3453 = vrot.lane.b32.xlu0 %v6760_v27, %s4684_s29  ;;  %v9196_v57 = vld [vmem:[#allocation84_spill] sm:$0xff] }
 0x4d6   : > { %3451 = vrot.lane.b32.xlu1 %v6742_v22, %s4684_s29 }
 0x4d7   : > { %v7315_v50 = vpop.permute.xlu0 %3209 }
 0x4d8   : > { %9190 = vst [vmem:[#allocation163_spill] sm:$0xff] %v7315_v50  ;;  %v7317_v43 = vpop.permute.xlu1 %3003 }
 0x4d9   : > { %9191 = vst [vmem:[#allocation48_spill] sm:$0xff] %v7317_v43  ;;  %3457 = vrot.lane.b32.xlu0 %v9192_v52, %s4684_s29  ;;  %v9200_v43 = vld [vmem:[#allocation80_spill] sm:$0xff] }
 0x4da   : > { %3455 = vrot.lane.b32.xlu1 %v9193_v34, %s4684_s29 }
 0x4db   : > { %v7323_v56 = vpop.permute.xlu0 %3339 }
 0x4dc   : > { %9194 = vst [vmem:[#allocation38_spill] sm:$0xff] %v7323_v56  ;;  %v7325_v44 = vpop.permute.xlu1 %3211 }
 0x4dd   : > { %9195 = vst [vmem:[#allocation22_spill] sm:$0xff] %v7325_v44  ;;  %3461 = vrot.lane.b32.xlu0 %v9196_v57, %s4684_s29  ;;  %v9204_v44 = vld [vmem:[#allocation88_spill] sm:$0xff]  ;;  %v9205_v57 = vld [vmem:[#allocation86_spill] sm:$0xff] }
 0x4de   : > { %3459 = vrot.lane.b32.xlu1 %v9197_v1, %s4684_s29 }
 0x4df   : > { %v7331_v38 = vpop.permute.xlu0 %3005 }
 0x4e0   : > { %9198 = vst [vmem:[#allocation162_spill] sm:$0xff] %v7331_v38  ;;  %v7333_v50 = vpop.permute.xlu1 %3341 }
 0x4e1   : > { %9199 = vst [vmem:[#allocation31_spill] sm:$0xff] %v7333_v50  ;;  %3465 = vrot.lane.b32.xlu0 %v9200_v43, %s4684_s29  ;;  %v9208_v50 = vld [vmem:[#allocation94_spill] sm:$0xff]  ;;  %v9209_v43 = vld [vmem:[#allocation95_spill] sm:$0xff] }
 0x4e2   : > { %3463 = vrot.lane.b32.xlu1 %v9201_v31, %s4684_s29 }
 0x4e3   : > { %v7339_v42 = vpop.permute.xlu0 %3213 }
 0x4e4   : > { %9202 = vst [vmem:[#allocation20_spill] sm:$0xff] %v7339_v42  ;;  %v7341_v56 = vpop.permute.xlu1 %3007 }
 0x4e5   : > { %9203 = vst [vmem:[#allocation36_spill] sm:$0xff] %v7341_v56  ;;  %3469 = vrot.lane.b32.xlu0 %v9204_v44, %s4684_s29 }
 0x4e6   : > { %3467 = vrot.lane.b32.xlu1 %v9205_v57, %s4684_s29 }
 0x4e7   : > { %v7347_v1 = vpop.permute.xlu0 %3343 }
 0x4e8   : > { %9206 = vst [vmem:[#allocation43_spill] sm:$0xff] %v7347_v1  ;;  %v7349_v38 = vpop.permute.xlu1 %3215 }
 0x4e9   : > { %9207 = vst [vmem:[#allocation200_spill] sm:$0xff] %v7349_v38  ;;  %3473 = vrot.lane.b32.xlu0 %v9208_v50, %s4684_s29 }
 0x4ea   : > { %3471 = vrot.lane.b32.xlu1 %v9209_v43, %s4684_s29 }
 0x4eb   : > { %v7355_v31 = vpop.permute.xlu0 %3009 }
 0x4ec   : > { %9210 = vst [vmem:[#allocation164_spill] sm:$0xff] %v7355_v31  ;;  %v7357_v42 = vpop.permute.xlu1 %3345 }
 0x4ed   : > { %9211 = vst [vmem:[#allocation167_spill] sm:$0xff] %v7357_v42  ;;  %3477 = vrot.lane.b32.xlu0 %v6916_v20, %s4684_s29 }
 0x4ee   : > { %3475 = vrot.lane.b32.xlu1 %v6898_v46, %s4684_s29 }
 0x4ef   : > { %v7363_v56 = vpop.permute.xlu0 %3217 }
 0x4f0   : > { %9212 = vst [vmem:[#allocation201_spill] sm:$0xff] %v7363_v56  ;;  %v7365_v1 = vpop.permute.xlu1 %3011 }
 0x4f1   : > { %9213 = vst [vmem:[#allocation165_spill] sm:$0xff] %v7365_v1  ;;  %3481 = vrot.lane.b32.xlu0 %v6940_v10, %s4684_s29 }
 0x4f2   : > { %3479 = vrot.lane.b32.xlu1 %v6922_v2, %s4684_s29 }
 0x4f3   : > { %v7371_v38 = vpop.permute.xlu0 %3013 }
 0x4f4   : > { %9214 = vst [vmem:[#allocation168_spill] sm:$0xff] %v7371_v38  ;;  %v7373_v31 = vpop.permute.xlu1 %3219 }
 0x4f5   : > { %9215 = vst [vmem:[#allocation28_spill] sm:$0xff] %v7373_v31  ;;  %3485 = vrot.lane.b32.xlu0 %v6968_v41, %s4684_s29 }
 0x4f6   : > { %3483 = vrot.lane.b32.xlu1 %v6950_v30, %s4684_s29 }
 0x4f7   : > { %v7379_v42 = vpop.permute.xlu0 %3221 }
 0x4f8   : > { %9216 = vst [vmem:[#allocation166_spill] sm:$0xff] %v7379_v42  ;;  %v7381_v56 = vpop.permute.xlu1 %3015 }
 0x4f9   : > { %9217 = vst [vmem:[#allocation169_spill] sm:$0xff] %v7381_v56  ;;  %3489 = vrot.lane.b32.xlu0 %v6992_v53, %s4684_s29 }
 0x4fa   : > { %3487 = vrot.lane.b32.xlu1 %v6974_v29, %s4684_s29 }
 0x4fb   : > { %v7387_v1 = vpop.permute.xlu0 %3017 }
 0x4fc   : > { %9218 = vst [vmem:[#allocation24_spill] sm:$0xff] %v7387_v1  ;;  %v7389_v38 = vpop.permute.xlu1 %3223 }
 0x4fd   : > { %9219 = vst [vmem:[#allocation170_spill] sm:$0xff] %v7389_v38  ;;  %3493 = vrot.lane.b32.xlu0 %v7020_v8, %s4684_s29 }
 0x4fe   : > { %3491 = vrot.lane.b32.xlu1 %v7002_v39, %s4684_s29 }
 0x4ff   : > { %v7395_v31 = vpop.permute.xlu0 %3225 }
 0x500   : > { %9220 = vst [vmem:[#allocation171_spill] sm:$0xff] %v7395_v31  ;;  %v7397_v42 = vpop.permute.xlu1 %3019 }
 0x501   : > { %9221 = vst [vmem:[#allocation204_spill] sm:$0xff] %v7397_v42  ;;  %3497 = vrot.lane.b32.xlu0 %v7044_v14, %s4684_s29 }
 0x502   : > { %3495 = vrot.lane.b32.xlu1 %v7026_v59, %s4684_s29 }
 0x503   : > { %v7403_v56 = vpop.permute.xlu0 %3021 }
 0x504   : > { %9222 = vst [vmem:[#allocation172_spill] sm:$0xff] %v7403_v56  ;;  %v7405_v1 = vpop.permute.xlu1 %3227  ;;  %v3973_v56 = vrot.slane %v7145_v24, 2 }
 0x505   : > { %9223 = vst [vmem:[#allocation26_spill] sm:$0xff] %v7405_v1  ;;  %3501 = vrot.lane.b32.xlu0 %v7072_v58, %s4684_s29  ;;  %v3840_v1 = vrot.slane %v7145_v24, 1 }
 0x506   : > { %3499 = vrot.lane.b32.xlu1 %v7054_v51, %s4684_s29  ;;  %v9228_v51 = vld [vmem:[#allocation64_spill] sm:$0xff] }
 0x507   : > { %v7411_v38 = vpop.permute.xlu0 %3229 }
 0x508   : > { %9224 = vst [vmem:[#allocation174_spill] sm:$0xff] %v7411_v38  ;;  %v7413_v31 = vpop.permute.xlu1 %3023  ;;  %v9230_v38 = vrot.slane %v7147_v3, 1 }
 0x509   : > { %9225 = vst [vmem:[#allocation205_spill] sm:$0xff] %v7413_v31  ;;  %3505 = vrot.lane.b32.xlu0 %v7096_v21, %s4684_s29 }
 0x50a   : > { %3503 = vrot.lane.b32.xlu1 %v7078_v55, %s4684_s29  ;;  %v7434_v55 = vsel %vm975_vm4, %v9230_v38, %v3840_v1  ;;  %v9239_v1 = vld [vmem:[#allocation69_spill] sm:$0xff]  ;;  %v9240_v38 = vld [vmem:[#allocation63_spill] sm:$0xff] }
 0x50b   : > { %v7419_v42 = vpop.permute.xlu0 %3025  ;;  %9231 = vst [vmem:[#allocation176_spill] sm:$0xff] %v7434_v55 }
 0x50c   : > { %9226 = vst [vmem:[#allocation173_spill] sm:$0xff] %v7419_v42  ;;  %v7423_v58 = vpop.permute.xlu1 %3231  ;;  %v9232_v42 = vrot.slane %v7147_v3, 2 }
 0x50d   : > { %9227 = vst [vmem:[#allocation175_spill] sm:$0xff] %v7423_v58  ;;  %3578 = vrot.lane.b32.xlu0 %v9228_v51, %s4685_s30  ;;  %v9235_v58 = vld [vmem:[#allocation60_spill] sm:$0xff]  ;;  %v9236_v51 = vld [vmem:[#allocation58_spill] sm:$0xff] }
 0x50e   : > { %3507 = vrot.lane.b32.xlu1 %v7106_v28, %s4684_s29  ;;  %v7439_v21 = vsel %vm1184_vm5, %v9232_v42, %v3973_v56 }
 0x50f   : > { %v7429_v31 = vpop.permute.xlu0 %3233  ;;  %9233 = vst [vmem:[#allocation53_spill] sm:$0xff] %v7439_v21  ;;  %v9243_v21 = vld [vmem:[#allocation71_spill] sm:$0xff] }
 0x510   : > { %9229 = vst [vmem:[#allocation33_spill] sm:$0xff] %v7429_v31  ;;  %v7441_v24 = vpop.permute.xlu1 %3027 }
 0x511   : > { %9234 = vst [vmem:[#allocation13_spill] sm:$0xff] %v7441_v24  ;;  %3582 = vrot.lane.b32.xlu0 %v9235_v58, %s4685_s30  ;;  %v9244_v24 = vld [vmem:[#allocation65_spill] sm:$0xff] }
 0x512   : > { %3580 = vrot.lane.b32.xlu1 %v9236_v51, %s4685_s30 }
 0x513   : > { %v7447_v28 = vpop.permute.xlu0 %3029 }
 0x514   : > { %9237 = vst [vmem:[#allocation30_spill] sm:$0xff] %v7447_v28  ;;  %v7449_v31 = vpop.permute.xlu1 %3235 }
 0x515   : > { %9238 = vst [vmem:[#allocation177_spill] sm:$0xff] %v7449_v31  ;;  %3586 = vrot.lane.b32.xlu0 %v9239_v1, %s4685_s30  ;;  %v9246_v31 = vld [vmem:[#allocation72_spill] sm:$0xff] }
 0x516   : > { %3584 = vrot.lane.b32.xlu1 %v9240_v38, %s4685_s30  ;;  %v9247_v1 = vld [vmem:[#allocation76_spill] sm:$0xff] }
 0x517   : > { %v7455_v42 = vpop.permute.xlu0 %3237 }
 0x518   : > { %9241 = vst [vmem:[#allocation9_spill] sm:$0xff] %v7455_v42  ;;  %v7457_v56 = vpop.permute.xlu1 %3031 }
 0x519   : > { %9242 = vst [vmem:[#allocation3_spill] sm:$0xff] %v7457_v56  ;;  %3590 = vrot.lane.b32.xlu0 %v9243_v21, %s4685_s30  ;;  %v9248_v56 = vld [vmem:[#allocation81_spill] sm:$0xff]  ;;  %v9249_v21 = vld [vmem:[#allocation83_spill] sm:$0xff] }
 0x51a   : > { %3588 = vrot.lane.b32.xlu1 %v9244_v24, %s4685_s30 }
 0x51b   : > { %v7463_v51 = vpop.permute.xlu0 %3033 }
 0x51c   : > { %v7465_v28 = vpop.permute.xlu1 %3239 }
 0x51d   : > { %9245 = vst [vmem:[#allocation179_spill] sm:$0xff] %v7465_v28  ;;  %3594 = vrot.lane.b32.xlu0 %v9246_v31, %s4685_s30  ;;  %v9251_v28 = vld [vmem:[#allocation92_spill] sm:$0xff]  ;;  %v9252_v31 = vld [vmem:[#allocation85_spill] sm:$0xff] }
 0x51e   : > { %3592 = vrot.lane.b32.xlu1 %v9247_v1, %s4685_s30 }
 0x51f   : > { %v7471_v38 = vpop.permute.xlu0 %3241 }
 0x520   : > { %v7473_v42 = vpop.permute.xlu1 %3035 }
 0x521   : > { %3598 = vrot.lane.b32.xlu0 %v9248_v56, %s4685_s30  ;;  %v9255_v56 = vld [vmem:[#allocation98_spill] sm:$0xff] }
 0x522   : > { %3596 = vrot.lane.b32.xlu1 %v9249_v21, %s4685_s30 }
 0x523   : > { %v7479_v24 = vpop.permute.xlu0 %3347 }
 0x524   : > { %9250 = vst [vmem:[#allocation17_spill] sm:$0xff] %v7479_v24  ;;  %v7481_v55 = vpop.permute.xlu1 %3243 }
 0x525   : > { %3602 = vrot.lane.b32.xlu0 %v9251_v28, %s4685_s30 }
 0x526   : > { %3600 = vrot.lane.b32.xlu1 %v9252_v31, %s4685_s30 }
 0x527   : > { %v7487_v1 = vpop.permute.xlu0 %3351 }
 0x528   : > { %9253 = vst [vmem:[#allocation52_spill] sm:$0xff] %v7487_v1  ;;  %v7489_v58 = vpop.permute.xlu1 %3349 }
 0x529   : > { %9254 = vst [vmem:[#allocation178_spill] sm:$0xff] %v7489_v58  ;;  %3606 = vrot.lane.b32.xlu0 %v6891_v33, %s4685_s30  ;;  %v9279_v33 = vld [vmem:[#allocation62_spill] sm:$0xff] }
 0x52a   : > { %3604 = vrot.lane.b32.xlu1 %v9255_v56, %s4685_s30 }
 0x52b   : > { %v7495_v21 = vpop.permute.xlu0 %3355 }
 0x52c   : > { %9256 = vst [vmem:[#allocation27_spill] sm:$0xff] %v7495_v21  ;;  %v7497_v24 = vpop.permute.xlu1 %3353 }
 0x52d   : > { %9257 = vst [vmem:[#allocation40_spill] sm:$0xff] %v7497_v24  ;;  %3610 = vrot.lane.b32.xlu0 %v6919_v60, %s4685_s30  ;;  %v9278_v24 = vld [vmem:[#allocation77_spill] sm:$0xff] }
 0x52e   : > { %3608 = vrot.lane.b32.xlu1 %v6901_v35, %s4685_s30 }
 0x52f   : > { %v7503_v31 = vpop.permute.xlu0 %3359 }
 0x530   : > { %9258 = vst [vmem:[#allocation11_spill] sm:$0xff] %v7503_v31  ;;  %v7505_v1 = vpop.permute.xlu1 %3357 }
 0x531   : > { %9259 = vst [vmem:[#allocation21_spill] sm:$0xff] %v7505_v1  ;;  %3614 = vrot.lane.b32.xlu0 %v6943_v23, %s4685_s30  ;;  %v9274_v23 = vld [vmem:[#allocation68_spill] sm:$0xff]  ;;  %v9275_v1 = vld [vmem:[#allocation66_spill] sm:$0xff] }
 0x532   : > { %3612 = vrot.lane.b32.xlu1 %v6925_v40, %s4685_s30 }
 0x533   : > { %v7511_v56 = vpop.permute.xlu0 %3363 }
 0x534   : > { %9260 = vst [vmem:[#allocation35_spill] sm:$0xff] %v7511_v56  ;;  %v7513_v21 = vpop.permute.xlu1 %3361 }
 0x535   : > { %9261 = vst [vmem:[#allocation32_spill] sm:$0xff] %v7513_v21  ;;  %3618 = vrot.lane.b32.xlu0 %v6971_v48, %s4685_s30  ;;  %v9270_v48 = vld [vmem:[#allocation67_spill] sm:$0xff] }
 0x536   : > { %3616 = vrot.lane.b32.xlu1 %v6953_v17, %s4685_s30 }
 0x537   : > { %v7519_v35 = vpop.permute.xlu0 %3367 }
 0x538   : > { %9262 = vst [vmem:[#allocation39_spill] sm:$0xff] %v7519_v35  ;;  %v7521_v31 = vpop.permute.xlu1 %3365 }
 0x539   : > { %9263 = vst [vmem:[#allocation4_spill] sm:$0xff] %v7521_v31  ;;  %3622 = vrot.lane.b32.xlu0 %v6995_v6, %s4685_s30 }
 0x53a   : > { %3620 = vrot.lane.b32.xlu1 %v6977_v61, %s4685_s30 }
 0x53b   : > { %v7527_v40 = vpop.permute.xlu0 %3371 }
 0x53c   : > { %v7529_v56 = vpop.permute.xlu1 %3369 }
 0x53d   : > { %9264 = vst [vmem:[#allocation50_spill] sm:$0xff] %v7529_v56  ;;  %3626 = vrot.lane.b32.xlu0 %v7023_v9, %s4685_s30  ;;  %v9266_v56 = vld [vmem:[#allocation59_spill] sm:$0xff] }
 0x53e   : > { %3624 = vrot.lane.b32.xlu1 %v7005_v26, %s4685_s30 }
 0x53f   : > { %v7535_v17 = vpop.permute.xlu0 %3445 }
 0x540   : > { %v7537_v35 = vpop.permute.xlu1 %3373 }
 0x541   : > { %3630 = vrot.lane.b32.xlu0 %v7047_v13, %s4685_s30 }
 0x542   : > { %3628 = vrot.lane.b32.xlu1 %v7029_v47, %s4685_s30 }
 0x543   : > { %v7543_v61 = vpop.permute.xlu0 %3449 }
 0x544   : > { %v7545_v6 = vpop.permute.xlu1 %3447 }
 0x545   : > { %3634 = vrot.lane.b32.xlu0 %v7075_v11, %s4685_s30  ;;  %v9267_v11 = vld [vmem:[#allocation132_spill] sm:$0xff] }
 0x546   : > { %3632 = vrot.lane.b32.xlu1 %v7057_v15, %s4685_s30 }
 0x547   : > { %v7551_v26 = vpop.permute.xlu0 %3453 }
 0x548   : > { %v7553_v9 = vpop.permute.xlu1 %3451 }
 0x549   : > { %3638 = vrot.lane.b32.xlu0 %v7099_v16, %s4685_s30  ;;  %v9271_v16 = vld [vmem:[#allocation61_spill] sm:$0xff] }
 0x54a   : > { %3636 = vrot.lane.b32.xlu1 %v7081_v4, %s4685_s30 }
 0x54b   : > { %v7559_v47 = vpop.permute.xlu0 %3457 }
 0x54c   : > { %v7561_v13 = vpop.permute.xlu1 %3455 }
 0x54d   : > { %9265 = vst [vmem:[#allocation15_spill] sm:$0xff] %v7561_v13  ;;  %3708 = vrot.lane.b32.xlu0 %v9266_v56, %s4686_s6 }
 0x54e   : > { %3640 = vrot.lane.b32.xlu1 %v9267_v11, %s4685_s30 }
 0x54f   : > { %v7567_v15 = vpop.permute.xlu0 %3461 }
 0x550   : > { %9268 = vst [vmem:[#allocation23_spill] sm:$0xff] %v7567_v15  ;;  %v7569_v31 = vpop.permute.xlu1 %3459  ;;  %v9287_v15 = vld [vmem:[#allocation79_spill] sm:$0xff] }
 0x551   : > { %9269 = vst [vmem:[#allocation5_spill] sm:$0xff] %v7569_v31  ;;  %3712 = vrot.lane.b32.xlu0 %v9270_v48, %s4686_s6 }
 0x552   : > { %3710 = vrot.lane.b32.xlu1 %v9271_v16, %s4686_s6 }
 0x553   : > { %v7575_v4 = vpop.permute.xlu0 %3465 }
 0x554   : > { %9272 = vst [vmem:[#allocation41_spill] sm:$0xff] %v7575_v4  ;;  %v7577_v21 = vpop.permute.xlu1 %3463  ;;  %v9283_v4 = vld [vmem:[#allocation78_spill] sm:$0xff] }
 0x555   : > { %9273 = vst [vmem:[#allocation45_spill] sm:$0xff] %v7577_v21  ;;  %3716 = vrot.lane.b32.xlu0 %v9274_v23, %s4686_s6  ;;  %v9282_v21 = vld [vmem:[#allocation87_spill] sm:$0xff] }
 0x556   : > { %3714 = vrot.lane.b32.xlu1 %v9275_v1, %s4686_s6 }
 0x557   : > { %v7583_v11 = vpop.permute.xlu0 %3469 }
 0x558   : > { %9276 = vst [vmem:[#allocation44_spill] sm:$0xff] %v7583_v11  ;;  %v7585_v60 = vpop.permute.xlu1 %3467 }
 0x559   : > { %9277 = vst [vmem:[#allocation19_spill] sm:$0xff] %v7585_v60  ;;  %3720 = vrot.lane.b32.xlu0 %v9278_v24, %s4686_s6  ;;  %v9286_v60 = vld [vmem:[#allocation73_spill] sm:$0xff] }
 0x55a   : > { %3718 = vrot.lane.b32.xlu1 %v9279_v33, %s4686_s6 }
 0x55b   : > { %v7591_v58 = vpop.permute.xlu0 %3473 }
 0x55c   : > { %9280 = vst [vmem:[#allocation29_spill] sm:$0xff] %v7591_v58  ;;  %v7593_v28 = vpop.permute.xlu1 %3471 }
 0x55d   : > { %9281 = vst [vmem:[#allocation42_spill] sm:$0xff] %v7593_v28  ;;  %3724 = vrot.lane.b32.xlu0 %v9282_v21, %s4686_s6  ;;  %v9290_v28 = vld [vmem:[#allocation93_spill] sm:$0xff] }
 0x55e   : > { %3722 = vrot.lane.b32.xlu1 %v9283_v4, %s4686_s6  ;;  %v9291_v21 = vld [vmem:[#allocation89_spill] sm:$0xff] }
 0x55f   : > { %v7599_v31 = vpop.permute.xlu0 %3477 }
 0x560   : > { %9284 = vst [vmem:[#allocation182_spill] sm:$0xff] %v7599_v31  ;;  %v7601_v11 = vpop.permute.xlu1 %3475 }
 0x561   : > { %9285 = vst [vmem:[#allocation184_spill] sm:$0xff] %v7601_v11  ;;  %3728 = vrot.lane.b32.xlu0 %v9286_v60, %s4686_s6  ;;  %v9294_v11 = vld [vmem:[#allocation96_spill] sm:$0xff]  ;;  %v9295_v60 = vld [vmem:[#allocation91_spill] sm:$0xff] }
 0x562   : > { %3726 = vrot.lane.b32.xlu1 %v9287_v15, %s4686_s6 }
 0x563   : > { %v7607_v13 = vpop.permute.xlu0 %3481 }
 0x564   : > { %9288 = vst [vmem:[#allocation49_spill] sm:$0xff] %v7607_v13  ;;  %v7609_v58 = vpop.permute.xlu1 %3479 }
 0x565   : > { %9289 = vst [vmem:[#allocation34_spill] sm:$0xff] %v7609_v58  ;;  %3732 = vrot.lane.b32.xlu0 %v9290_v28, %s4686_s6  ;;  %v9298_v58 = vld [vmem:[#allocation100_spill] sm:$0xff] }
 0x566   : > { %3730 = vrot.lane.b32.xlu1 %v9291_v21, %s4686_s6 }
 0x567   : > { %v7615_v4 = vpop.permute.xlu0 %3485 }
 0x568   : > { %9292 = vst [vmem:[#allocation180_spill] sm:$0xff] %v7615_v4  ;;  %v7617_v31 = vpop.permute.xlu1 %3483 }
 0x569   : > { %9293 = vst [vmem:[#allocation25_spill] sm:$0xff] %v7617_v31  ;;  %3736 = vrot.lane.b32.xlu0 %v9294_v11, %s4686_s6 }
 0x56a   : > { %3734 = vrot.lane.b32.xlu1 %v9295_v60, %s4686_s6 }
 0x56b   : > { %v7623_v15 = vpop.permute.xlu0 %3489 }
 0x56c   : > { %9296 = vst [vmem:[#allocation186_spill] sm:$0xff] %v7623_v15  ;;  %v7625_v13 = vpop.permute.xlu1 %3487 }
 0x56d   : > { %9297 = vst [vmem:[#allocation46_spill] sm:$0xff] %v7625_v13  ;;  %3740 = vrot.lane.b32.xlu0 %v6929_v63, %s4686_s6 }
 0x56e   : > { %3738 = vrot.lane.b32.xlu1 %v9298_v58, %s4686_s6 }
 0x56f   : > { %v7631_v21 = vpop.permute.xlu0 %3493 }
 0x570   : > { %9299 = vst [vmem:[#allocation181_spill] sm:$0xff] %v7631_v21  ;;  %v7633_v4 = vpop.permute.xlu1 %3491 }
 0x571   : > { %9300 = vst [vmem:[#allocation185_spill] sm:$0xff] %v7633_v4  ;;  %3744 = vrot.lane.b32.xlu0 %v6937_v54, %s4686_s6  ;;  %v9309_v54 = vld [vmem:[#allocation80_spill] sm:$0xff] }
 0x572   : > { %3742 = vrot.lane.b32.xlu1 %v6913_v12, %s4686_s6 }
 0x573   : > { %v7639_v31 = vpop.permute.xlu0 %3497 }
 0x574   : > { %9301 = vst [vmem:[#allocation191_spill] sm:$0xff] %v7639_v31  ;;  %v7641_v15 = vpop.permute.xlu1 %3495 }
 0x575   : > { %9302 = vst [vmem:[#allocation188_spill] sm:$0xff] %v7641_v15  ;;  %3748 = vrot.lane.b32.xlu0 %v6981_v37, %s4686_s6  ;;  %v9307_v37 = vld [vmem:[#allocation84_spill] sm:$0xff] }
 0x576   : > { %3746 = vrot.lane.b32.xlu1 %v6957_v49, %s4686_s6 }
 0x577   : > { %v7647_v13 = vpop.permute.xlu0 %3501 }
 0x578   : > { %9303 = vst [vmem:[#allocation37_spill] sm:$0xff] %v7647_v13  ;;  %v7649_v21 = vpop.permute.xlu1 %3499 }
 0x579   : > { %9304 = vst [vmem:[#allocation183_spill] sm:$0xff] %v7649_v21  ;;  %3752 = vrot.lane.b32.xlu0 %v6989_v62, %s4686_s6 }
 0x57a   : > { %3750 = vrot.lane.b32.xlu1 %v6965_v36, %s4686_s6 }
 0x57b   : > { %v7655_v4 = vpop.permute.xlu0 %3505 }
 0x57c   : > { %v7657_v31 = vpop.permute.xlu1 %3503 }
 0x57d   : > { %9305 = vst [vmem:[#allocation187_spill] sm:$0xff] %v7657_v31  ;;  %3756 = vrot.lane.b32.xlu0 %v7033_v45, %s4686_s6  ;;  %v9306_v45 = vld [vmem:[#allocation127_spill] sm:$0xff] }
 0x57e   : > { %3754 = vrot.lane.b32.xlu1 %v7009_v32, %s4686_s6 }
 0x57f   : > { %v7663_v15 = vpop.permute.xlu0 %3578 }
 0x580   : > { %v7665_v13 = vpop.permute.xlu1 %3507 }
 0x581   : > { %3760 = vrot.lane.b32.xlu0 %v7041_v0, %s4686_s6 }
 0x582   : > { %3758 = vrot.lane.b32.xlu1 %v7017_v25, %s4686_s6 }
 0x583   : > { %v7671_v21 = vpop.permute.xlu0 %3582 }
 0x584   : > { %v7673_v36 = vpop.permute.xlu1 %3580 }
 0x585   : > { %3764 = vrot.lane.b32.xlu0 %v7087_v18, %s4686_s6 }
 0x586   : > { %3762 = vrot.lane.b32.xlu1 %v7061_v7, %s4686_s6 }
 0x587   : > { %v7679_v31 = vpop.permute.xlu0 %3586 }
 0x588   : > { %v7681_v32 = vpop.permute.xlu1 %3584 }
 0x589   : > { %3768 = vrot.lane.b32.xlu0 %v9306_v45, %s4686_s6 }
 0x58a   : > { %3766 = vrot.lane.b32.xlu1 %v7069_v5, %s4686_s6 }
 0x58b   : > { %v7687_v25 = vpop.permute.xlu0 %3590 }
 0x58c   : > { %v7689_v62 = vpop.permute.xlu1 %3588 }
 0x58d   : > { %3842 = vrot.lane.b32.xlu0 %v6732_v19, %s4687_s9 }
 0x58e   : > { %3770 = vrot.lane.b32.xlu1 %v7147_v3, %s4686_s6 }
 0x58f   : > { %v7695_v18 = vpop.permute.xlu0 %3594 }
 0x590   : > { %v7697_v49 = vpop.permute.xlu1 %3592 }
 0x591   : > { %3846 = vrot.lane.b32.xlu0 %v6760_v27, %s4687_s9  ;;  %v9308_v27 = vld [vmem:[#allocation75_spill] sm:$0xff] }
 0x592   : > { %3844 = vrot.lane.b32.xlu1 %v6742_v22, %s4687_s9 }
 0x593   : > { %v7703_v45 = vpop.permute.xlu0 %3598 }
 0x594   : > { %v7705_v5 = vpop.permute.xlu1 %3596 }
 0x595   : > { %3850 = vrot.lane.b32.xlu0 %v9192_v52, %s4687_s9  ;;  %v9310_v52 = vld [vmem:[#allocation82_spill] sm:$0xff] }
 0x596   : > { %3848 = vrot.lane.b32.xlu1 %v9193_v34, %s4687_s9 }
 0x597   : > { %v7711_v19 = vpop.permute.xlu0 %3602 }
 0x598   : > { %v7713_v3 = vpop.permute.xlu1 %3600 }
 0x599   : > { %3854 = vrot.lane.b32.xlu0 %v9307_v37, %s4687_s9 }
 0x59a   : > { %3852 = vrot.lane.b32.xlu1 %v9308_v27, %s4687_s9 }
 0x59b   : > { %v7719_v22 = vpop.permute.xlu0 %3606 }
 0x59c   : > { %v7721_v12 = vpop.permute.xlu1 %3604 }
 0x59d   : > { %3858 = vrot.lane.b32.xlu0 %v9309_v54, %s4687_s9 }
 0x59e   : > { %3856 = vrot.lane.b32.xlu1 %v9310_v52, %s4687_s9 }
 0x59f   : > { %v7727_v34 = vpop.permute.xlu0 %3610 }
 0x5a0   : > { %v7729_v58 = vpop.permute.xlu1 %3608 }
 0x5a1   : > { %3862 = vrot.lane.b32.xlu0 %v9204_v44, %s4687_s9 }
 0x5a2   : > { %3860 = vrot.lane.b32.xlu1 %v9205_v57, %s4687_s9  ;;  %v7756_v57 = vld [vmem:[%s8378_s4] ss:$0 sm:$0xff] }
 0x5a3   : > { %v7735_v37 = vpop.permute.xlu0 %3614 }
 0x5a4   : > { %v7737_v27 = vpop.permute.xlu1 %3612 }
 0x5a5   : > { %3866 = vrot.lane.b32.xlu0 %v9208_v50, %s4687_s9 }
 0x5a6   : > { %3864 = vrot.lane.b32.xlu1 %v9209_v43, %s4687_s9 }
 0x5a7   : > { %v7743_v54 = vpop.permute.xlu0 %3618 }
 0x5a8   : > { %9311 = vst [vmem:[#allocation55_spill] sm:$0xff] %v7743_v54  ;;  %v7745_v52 = vpop.permute.xlu1 %3616 }
 0x5a9   : > { %9312 = vst [vmem:[#allocation192_spill] sm:$0xff] %v7745_v52  ;;  %3870 = vrot.lane.b32.xlu0 %v6916_v20, %s4687_s9  ;;  %v9316_v20 = vld [vmem:[#allocation203_spill] sm:$0xff] }
 0x5aa   : > { %3868 = vrot.lane.b32.xlu1 %v6898_v46, %s4687_s9  ;;  %v2813_v46 = vadd.f32 %v7756_v57, %v9316_v20 }
 0x5ab   : > { %v7751_v44 = vpop.permute.xlu0 %3622 }
 0x5ac   : > { %9313 = vst [vmem:[#allocation189_spill] sm:$0xff] %v7751_v44  ;;  %v7758_v50 = vpop.permute.xlu1 %3620  ;;  %v2843_v44 = vadd.f32 %v7041_v0, %v7756_v57  ;;  %v9321_v0 = vld [vmem:[#allocation133_spill] sm:$0xff] }
 0x5ad   : > { %9314 = vst [vmem:[#allocation193_spill] sm:$0xff] %v7758_v50  ;;  %3874 = vrot.lane.b32.xlu0 %v6940_v10, %s4687_s9  ;;  %v9319_v50 = vld [vmem:[#allocation130_spill] sm:$0xff] }
 0x5ae   : > { %3872 = vrot.lane.b32.xlu1 %v6922_v2, %s4687_s9  ;;  %v3069_v2 = vadd.f32 %v9319_v50, %v2813_v46  ;;  %v9323_v50 = vld [vmem:[#allocation202_spill] sm:$0xff] }
 0x5af   : > { %v7764_v43 = vpop.permute.xlu0 %3626 }
 0x5b0   : > { %9315 = vst [vmem:[#allocation51_spill] sm:$0xff] %v7764_v43  ;;  %v7768_v52 = vpop.permute.xlu1 %3624  ;;  %v3099_v43 = vadd.f32 %v7463_v51, %v2843_v44  ;;  %v2844_v51 = vadd.f32 %v7756_v57, %v7061_v7 }
 0x5b1   : > { %9317 = vst [vmem:[#allocation190_spill] sm:$0xff] %v7768_v52  ;;  %3878 = vrot.lane.b32.xlu0 %v6968_v41, %s4687_s9 }
 0x5b2   : > { %3876 = vrot.lane.b32.xlu1 %v6950_v30, %s4687_s9  ;;  %v3307_v20 = vadd.f32 %v7471_v38, %v3099_v43  ;;  %v3277_v30 = vadd.f32 %v9321_v0, %v3069_v2  ;;  %v9326_v43 = vld [vmem:[#allocation139_spill] sm:$0xff]  ;;  %v3100_v0 = vadd.f32 %v7473_v42, %v2844_v51  ;;  %v9329_v42 = vld [vmem:[#allocation54_spill] sm:$0xff]  ;;  %v9330_v51 = vld [vmem:[#allocation145_spill] sm:$0xff] }
 0x5b3   : > { %v7776_v10 = vpop.permute.xlu0 %3630 }
 0x5b4   : > { %9318 = vst [vmem:[#allocation56_spill] sm:$0xff] %v7776_v10  ;;  %v7780_v54 = vpop.permute.xlu1 %3628  ;;  %v9322_v10 = vld [vmem:[#allocation57_spill] sm:$0xff]  ;;  %v3437_v44 = vadd.f32 %v7527_v40, %v3307_v20  ;;  %v2817_v40 = vadd.f32 %v7756_v57, %v9266_v56 }
 0x5b5   : > { %3882 = vrot.lane.b32.xlu0 %v6992_v53, %s4687_s9  ;;  %v2815_v52 = vadd.f32 %v9322_v10, %v7756_v57  ;;  %v2814_v53 = vadd.f32 %v9323_v50, %v7756_v57  ;;  %v9328_v50 = vld [vmem:[#allocation141_spill] sm:$0xff] }
 0x5b6   : > { %3880 = vrot.lane.b32.xlu1 %v6974_v29, %s4687_s9  ;;  %v9325_v29 = vld [vmem:[#allocation135_spill] sm:$0xff]  ;;  %v3571_v10 = vadd.f32 %v7655_v4, %v3437_v44  ;;  %v2816_v4 = vadd.f32 %v7756_v57, %v9329_v42 }
 0x5b7   : > { %v7787_v41 = vpop.permute.xlu0 %3634  ;;  %v3407_v38 = vadd.f32 %v9325_v29, %v3277_v30  ;;  %v3071_v2 = vadd.f32 %v9326_v43, %v2815_v52 }
 0x5b8   : > { %9320 = vst [vmem:[#allocation194_spill] sm:$0xff] %v7787_v41  ;;  %v7797_v46 = vpop.permute.xlu1 %3632  ;;  %v9327_v41 = vld [vmem:[#allocation134_spill] sm:$0xff] }
 0x5b9   : > { %9324 = vst [vmem:[#allocation70_spill] sm:$0xff] %v7797_v46  ;;  %3886 = vrot.lane.b32.xlu0 %v7020_v8, %s4687_s9  ;;  %v3070_v7 = vadd.f32 %v9327_v41, %v2814_v53  ;;  %v3279_v46 = vadd.f32 %v9328_v50, %v3071_v2  ;;  %v3308_v8 = vadd.f32 %v7481_v55, %v3100_v0  ;;  %v9332_v53 = vld [vmem:[#allocation144_spill] sm:$0xff]  ;;  %v9334_v2 = vld [vmem:[#allocation142_spill] sm:$0xff] }
 0x5ba   : > { %3884 = vrot.lane.b32.xlu1 %v7002_v39, %s4687_s9  ;;  %v3541_v30 = vadd.f32 %v7535_v17, %v3407_v38  ;;  %v3073_v41 = vadd.f32 %v9330_v51, %v2817_v40  ;;  %v9331_v39 = vld [vmem:[#allocation138_spill] sm:$0xff] }
 0x5bb   : > { %v3639_v20 = vpop.permute.xlu0 %3638  ;;  %v3278_v56 = vadd.f32 %v9331_v39, %v3070_v7  ;;  %v3409_v29 = vadd.f32 %v9332_v53, %v3279_v46  ;;  %v3438_v55 = vadd.f32 %v7537_v35, %v3308_v8  ;;  %v9333_v38 = vld [vmem:[#allocation10_spill] sm:$0xff]  ;;  %v2818_v8 = vadd.f32 %v9271_v16, %v7756_v57  ;;  %v9341_v53 = vld [vmem:[#allocation143_spill] sm:$0xff] }
 0x5bc   : > { %v7813_v52 = vadd.f32 %v3639_v20, %v3571_v10  ;;  %v7818_v44 = vpop.permute.xlu1 %3636  ;;  %v3674_v17 = vadd.f32 %v7663_v15, %v3541_v30  ;;  %v3072_v43 = vadd.f32 %v9333_v38, %v2816_v4  ;;  %v3281_v0 = vadd.f32 %v9334_v2, %v3073_v41  ;;  %v9336_v15 = vld [vmem:[#allocation6_spill] sm:$0xff]  ;;  %v9337_v30 = vld [vmem:[#allocation195_spill] sm:$0xff]  ;;  %v9338_v4 = vld [vmem:[#allocation125_spill] sm:$0xff] }
 0x5bd   : > { %3890 = vrot.lane.b32.xlu0 %v7044_v14, %s4687_s9  ;;  %v2819_v10 = vadd.f32 %v9270_v48, %v7756_v57  ;;  %v9335_v14 = vld [vmem:[#allocation136_spill] sm:$0xff]  ;;  %v3543_v7 = vadd.f32 %v7543_v61, %v3409_v29  ;;  %v3572_v46 = vadd.f32 %v7665_v13, %v3438_v55  ;;  %v9340_v39 = vld [vmem:[#allocation90_spill] sm:$0xff]  ;;  %v3074_v29 = vadd.f32 %v9341_v53, %v2818_v8  ;;  %v9342_v55 = vld [vmem:[#allocation121_spill] sm:$0xff] }
 0x5be   : > { %3888 = vrot.lane.b32.xlu1 %v7026_v59, %s4687_s9  ;;  %v3408_v20 = vadd.f32 %v9335_v14, %v3278_v56  ;;  %v3280_v50 = vadd.f32 %v9336_v15, %v3072_v43  ;;  %v3411_v42 = vadd.f32 %v9337_v30, %v3281_v0  ;;  %v9339_v59 = vld [vmem:[#allocation147_spill] sm:$0xff]  ;;  %v2821_v16 = vadd.f32 %v7756_v57, %v9274_v23  ;;  %v9343_v38 = vld [vmem:[#allocation8_spill] sm:$0xff]  ;;  %v9344_v0 = vld [vmem:[#allocation146_spill] sm:$0xff] }
 0x5bf   : > { %v3709_v40 = vpop.permute.xlu0 %3708  ;;  %v3075_v51 = vadd.f32 %v9339_v59, %v2819_v10  ;;  %v3676_v61 = vadd.f32 %v7671_v21, %v3543_v7  ;;  %v3282_v10 = vadd.f32 %v9344_v0, %v3074_v29  ;;  %v9345_v14 = vld [vmem:[#allocation149_spill] sm:$0xff]  ;;  %v9346_v7 = vld [vmem:[#allocation128_spill] sm:$0xff]  ;;  %v2822_v53 = vadd.f32 %v9279_v33, %v7756_v57 }
 0x5c0   : > { %v7835_v35 = vadd.f32 %v3709_v40, %v3674_v17  ;;  %v3641_v48 = vpop.permute.xlu1 %3640  ;;  %v3542_v41 = vadd.f32 %v7545_v6, %v3408_v20  ;;  %v3410_v56 = vadd.f32 %v9340_v39, %v3280_v50  ;;  %v3545_v2 = vadd.f32 %v7551_v26, %v3411_v42  ;;  %v9348_v8 = vld [vmem:[#allocation148_spill] sm:$0xff]  ;;  %v9353_v29 = vld [vmem:[#allocation153_spill] sm:$0xff] }
 0x5c1   : > { %3894 = vrot.lane.b32.xlu0 %v9338_v4, %s4687_s9  ;;  %v7846_v13 = vadd.f32 %v3641_v48, %v3572_v46  ;;  %v3283_v43 = vadd.f32 %v9343_v38, %v3075_v51  ;;  %v2820_v40 = vadd.f32 %v7756_v57, %v9275_v1  ;;  %v3077_v20 = vadd.f32 %v9345_v14, %v2821_v16  ;;  %v9347_v46 = vld [vmem:[#allocation151_spill] sm:$0xff]  ;;  %v9349_v42 = vld [vmem:[#allocation196_spill] sm:$0xff]  ;;  %v9351_v51 = vld [vmem:[#allocation14_spill] sm:$0xff] }
 0x5c2   : > { %3892 = vrot.lane.b32.xlu1 %v9342_v55, %s4687_s9  ;;  %v3675_v6 = vadd.f32 %v7673_v36, %v3542_v41  ;;  %v3544_v50 = vadd.f32 %v7553_v9, %v3410_v56  ;;  %v3678_v26 = vadd.f32 %v7679_v31, %v3545_v2  ;;  %v2823_v1 = vadd.f32 %v9278_v24, %v7756_v57  ;;  %v9350_v4 = vld [vmem:[#allocation123_spill] sm:$0xff]  ;;  %v9352_v39 = vld [vmem:[#allocation12_spill] sm:$0xff]  ;;  %v9354_v55 = vld [vmem:[#allocation137_spill] sm:$0xff] }
 0x5c3   : > { %v3713_v17 = vpop.permute.xlu0 %3712  ;;  %v3413_v15 = vadd.f32 %v9347_v46, %v3283_v43  ;;  %v3076_v30 = vadd.f32 %v9348_v8, %v2820_v40  ;;  %v3285_v48 = vadd.f32 %v9349_v42, %v3077_v20  ;;  %v3412_v41 = vadd.f32 %v9351_v51, %v3282_v10  ;;  %v9356_v43 = vld [vmem:[#allocation15_spill] sm:$0xff]  ;;  %v9358_v10 = vld [vmem:[#allocation150_spill] sm:$0xff]  ;;  %v9360_v20 = vld [vmem:[#allocation129_spill] sm:$0xff] }
 0x5c4   : > { %v7857_v21 = vadd.f32 %v3713_v17, %v3676_v61  ;;  %v3711_v23 = vpop.permute.xlu1 %3710  ;;  %v3677_v9 = vadd.f32 %v7681_v32, %v3544_v50  ;;  %v9355_v17 = vld [vmem:[#allocation154_spill] sm:$0xff]  ;;  %v3078_v40 = vadd.f32 %v9358_v10, %v2822_v53  ;;  %v9359_v14 = vld [vmem:[#allocation87_spill] sm:$0xff]  ;;  %v9363_v8 = vld [vmem:[#allocation197_spill] sm:$0xff] }
 0x5c5   : > { %3898 = vrot.lane.b32.xlu0 %v9346_v7, %s4687_s9  ;;  %v7868_v36 = vadd.f32 %v3711_v23, %v3675_v6  ;;  %v3547_v61 = vadd.f32 %v7559_v47, %v3413_v15  ;;  %v3284_v56 = vadd.f32 %v9352_v39, %v3076_v30  ;;  %v3415_v16 = vadd.f32 %v9353_v29, %v3285_v48  ;;  %v9357_v6 = vld [vmem:[#allocation152_spill] sm:$0xff]  ;;  %v9361_v7 = vld [vmem:[#allocation155_spill] sm:$0xff]  ;;  %v9364_v42 = vld [vmem:[#allocation78_spill] sm:$0xff] }
 0x5c6   : > { %3896 = vrot.lane.b32.xlu1 %v9350_v4, %s4687_s9  ;;  %v3079_v38 = vadd.f32 %v9355_v17, %v2823_v1  ;;  %v3546_v2 = vadd.f32 %v9356_v43, %v3412_v41  ;;  %v2825_v33 = vadd.f32 %v7756_v57, %v9359_v14  ;;  %v9362_v15 = vld [vmem:[#allocation23_spill] sm:$0xff]  ;;  %v3286_v30 = vadd.f32 %v9363_v8, %v3078_v40  ;;  %v9366_v51 = vld [vmem:[#allocation60_spill] sm:$0xff]  ;;  %v9369_v53 = vld [vmem:[#allocation18_spill] sm:$0xff] }
 0x5c7   : > { %v3717_v59 = vpop.permute.xlu0 %3716  ;;  %v3680_v47 = vadd.f32 %v7687_v25, %v3547_v61  ;;  %v3414_v0 = vadd.f32 %v9357_v6, %v3284_v56  ;;  %v3549_v50 = vadd.f32 %v9362_v15, %v3415_v16  ;;  %v2824_v48 = vadd.f32 %v7756_v57, %v9364_v42  ;;  %v9365_v1 = vld [vmem:[#allocation159_spill] sm:$0xff]  ;;  %v9370_v16 = vld [vmem:[#allocation156_spill] sm:$0xff]  ;;  %v9374_v6 = vld [vmem:[#allocation41_spill] sm:$0xff] }
 0x5c8   : > { %v7879_v31 = vadd.f32 %v3717_v59, %v3678_v26  ;;  %v3715_v24 = vpop.permute.xlu1 %3714  ;;  %v3287_v46 = vadd.f32 %v9361_v7, %v3079_v38  ;;  %v3679_v26 = vadd.f32 %v7689_v62, %v3546_v2  ;;  %v3081_v4 = vadd.f32 %v9365_v1, %v2825_v33  ;;  %v9367_v41 = vld [vmem:[#allocation47_spill] sm:$0xff]  ;;  %v9372_v38 = vld [vmem:[#allocation176_spill] sm:$0xff]  ;;  %v9375_v40 = vld [vmem:[#allocation158_spill] sm:$0xff] }
 0x5c9   : > { %3902 = vrot.lane.b32.xlu0 %v9354_v55, %s4687_s9  ;;  %v7890_v32 = vadd.f32 %v3715_v24, %v3677_v9  ;;  %v9368_v9 = vld [vmem:[#allocation5_spill] sm:$0xff]  ;;  %v3682_v56 = vadd.f32 %v7695_v18, %v3549_v50  ;;  %v3080_v29 = vadd.f32 %v9369_v53, %v2824_v48  ;;  %v9373_v2 = vld [vmem:[#allocation7_spill] sm:$0xff]  ;;  %v9381_v48 = vld [vmem:[#allocation16_spill] sm:$0xff] }
 0x5ca   : > { %3900 = vrot.lane.b32.xlu1 %v9360_v20, %s4687_s9  ;;  %v3417_v61 = vadd.f32 %v9367_v41, %v3287_v46  ;;  %v3548_v39 = vadd.f32 %v9368_v9, %v3414_v0  ;;  %v3289_v24 = vadd.f32 %v9370_v16, %v3081_v4  ;;  %v9371_v55 = vld [vmem:[#allocation73_spill] sm:$0xff]  ;;  %v9376_v33 = vld [vmem:[#allocation79_spill] sm:$0xff]  ;;  %v9386_v16 = vld [vmem:[#allocation160_spill] sm:$0xff] }
 0x5cb   : > { %v3721_v23 = vpop.permute.xlu0 %3720  ;;  %v2827_v17 = vadd.f32 %v9371_v55, %v7756_v57  ;;  %v3288_v14 = vadd.f32 %v9375_v40, %v3080_v29  ;;  %v2826_v20 = vadd.f32 %v9376_v33, %v7756_v57  ;;  %v9378_v15 = vld [vmem:[#allocation69_spill] sm:$0xff]  ;;  %v9383_v41 = vld [vmem:[#allocation63_spill] sm:$0xff] }
 0x5cc   : > { %v7901_v25 = vadd.f32 %v3721_v23, %v3680_v47  ;;  %v3719_v59 = vpop.permute.xlu1 %3718  ;;  %v3416_v47 = vadd.f32 %v9373_v2, %v3286_v30  ;;  %v3551_v10 = vadd.f32 %v9374_v6, %v3417_v61  ;;  %v3681_v0 = vadd.f32 %v7697_v49, %v3548_v39  ;;  %v9377_v23 = vld [vmem:[#allocation198_spill] sm:$0xff]  ;;  %v9379_v50 = vld [vmem:[#allocation161_spill] sm:$0xff]  ;;  %v9384_v9 = vld [vmem:[#allocation163_spill] sm:$0xff] }
 0x5cd   : > { %3975 = vrot.lane.b32.xlu0 %v9366_v51, %s4688_s10  ;;  %v7912_v62 = vadd.f32 %v3719_v59, %v3679_v26  ;;  %v3419_v7 = vadd.f32 %v9377_v23, %v3289_v24  ;;  %v3083_v26 = vadd.f32 %v9379_v50, %v2827_v17  ;;  %v9380_v8 = vld [vmem:[#allocation45_spill] sm:$0xff]  ;;  %v3418_v1 = vadd.f32 %v9381_v48, %v3288_v14  ;;  %v9389_v2 = vld [vmem:[#allocation71_spill] sm:$0xff]  ;;  %v9392_v14 = vld [vmem:[#allocation48_spill] sm:$0xff] }
 0x5ce   : > { %3904 = vrot.lane.b32.xlu1 %v9372_v38, %s4687_s9  ;;  %v3550_v30 = vadd.f32 %v9380_v8, %v3416_v47  ;;  %v3684_v42 = vadd.f32 %v7703_v45, %v3551_v10  ;;  %v9382_v4 = vld [vmem:[#allocation157_spill] sm:$0xff]  ;;  %v2829_v51 = vadd.f32 %v7756_v57, %v9290_v28  ;;  %v9388_v38 = vld [vmem:[#allocation162_spill] sm:$0xff]  ;;  %v9391_v10 = vld [vmem:[#allocation19_spill] sm:$0xff] }
 0x5cf   : > { %v3725_v43 = vpop.permute.xlu0 %3724  ;;  %v3082_v59 = vadd.f32 %v9382_v4, %v2826_v20  ;;  %v3291_v39 = vadd.f32 %v9384_v9, %v3083_v26  ;;  %v9387_v55 = vld [vmem:[#allocation89_spill] sm:$0xff]  ;;  %v9390_v47 = vld [vmem:[#allocation38_spill] sm:$0xff]  ;;  %v9393_v20 = vld [vmem:[#allocation20_spill] sm:$0xff]  ;;  %v2830_v4 = vadd.f32 %v9295_v60, %v7756_v57  ;;  %v2833_v60 = vadd.f32 %v7756_v57, %v6929_v63 }
 0x5d0   : > { %v7923_v18 = vadd.f32 %v3725_v43, %v3682_v56  ;;  %v3723_v46 = vpop.permute.xlu1 %3722  ;;  %v9385_v56 = vld [vmem:[#allocation44_spill] sm:$0xff]  ;;  %v3683_v29 = vadd.f32 %v7705_v5, %v3550_v30  ;;  %v2828_v17 = vadd.f32 %v7756_v57, %v9387_v55  ;;  %v3085_v43 = vadd.f32 %v9388_v38, %v2829_v51  ;;  %v9395_v50 = vld [vmem:[#allocation199_spill] sm:$0xff]  ;;  %v9396_v8 = vld [vmem:[#allocation29_spill] sm:$0xff] }
 0x5d1   : > { %3979 = vrot.lane.b32.xlu0 %v9378_v15, %s4688_s10  ;;  %v7934_v49 = vadd.f32 %v3723_v46, %v3681_v0  ;;  %v3553_v53 = vadd.f32 %v9385_v56, %v3419_v7  ;;  %v3290_v24 = vadd.f32 %v9386_v16, %v3082_v59  ;;  %v3421_v6 = vadd.f32 %v9390_v47, %v3291_v39  ;;  %v9394_v46 = vld [vmem:[#allocation65_spill] sm:$0xff]  ;;  %v9397_v48 = vld [vmem:[#allocation22_spill] sm:$0xff]  ;;  %v9398_v59 = vld [vmem:[#allocation43_spill] sm:$0xff] }
 0x5d2   : > { %3977 = vrot.lane.b32.xlu1 %v9383_v41, %s4688_s10  ;;  %v3552_v0 = vadd.f32 %v9391_v10, %v3418_v1  ;;  %v3084_v33 = vadd.f32 %v9392_v14, %v2828_v17  ;;  %v3293_v23 = vadd.f32 %v9393_v20, %v3085_v43  ;;  %v2831_v7 = vadd.f32 %v9294_v11, %v7756_v57  ;;  %v9399_v41 = vld [vmem:[#allocation72_spill] sm:$0xff]  ;;  %v9401_v39 = vld [vmem:[#allocation42_spill] sm:$0xff]  ;;  %v9405_v43 = vld [vmem:[#allocation201_spill] sm:$0xff] }
 0x5d3   : > { %v3729_v61 = vpop.permute.xlu0 %3728  ;;  %v3686_v40 = vadd.f32 %v7711_v19, %v3553_v53  ;;  %v3420_v26 = vadd.f32 %v9395_v50, %v3290_v24  ;;  %v3555_v30 = vadd.f32 %v9396_v8, %v3421_v6  ;;  %v9403_v24 = vld [vmem:[#allocation36_spill] sm:$0xff]  ;;  %v9413_v8 = vld [vmem:[#allocation167_spill] sm:$0xff] }
 0x5d4   : > { %v7945_v45 = vadd.f32 %v3729_v61, %v3684_v42  ;;  %v3727_v28 = vpop.permute.xlu1 %3726  ;;  %v3685_v42 = vadd.f32 %v7713_v3, %v3552_v0  ;;  %v3292_v1 = vadd.f32 %v9397_v48, %v3084_v33  ;;  %v3423_v51 = vadd.f32 %v9398_v59, %v3293_v23  ;;  %v9400_v61 = vld [vmem:[#allocation164_spill] sm:$0xff]  ;;  %v9410_v23 = vld [vmem:[#allocation81_spill] sm:$0xff]  ;;  %v9416_v59 = vld [vmem:[#allocation83_spill] sm:$0xff] }
 0x5d5   : > { %3983 = vrot.lane.b32.xlu0 %v9389_v2, %s4688_s10  ;;  %v7956_v5 = vadd.f32 %v3727_v28, %v3683_v29  ;;  %v3087_v9 = vadd.f32 %v9400_v61, %v2831_v7  ;;  %v3554_v56 = vadd.f32 %v9401_v39, %v3420_v26  ;;  %v3688_v53 = vadd.f32 %v7719_v22, %v3555_v30  ;;  %v9402_v29 = vld [vmem:[#allocation31_spill] sm:$0xff]  ;;  %v9404_v17 = vld [vmem:[#allocation76_spill] sm:$0xff]  ;;  %v9406_v2 = vld [vmem:[#allocation182_spill] sm:$0xff] }
 0x5d6   : > { %3981 = vrot.lane.b32.xlu1 %v9394_v46, %s4688_s10  ;;  %v3422_v16 = vadd.f32 %v9402_v29, %v3292_v1  ;;  %v3086_v55 = vadd.f32 %v9403_v24, %v2830_v4  ;;  %v3557_v47 = vadd.f32 %v9406_v2, %v3423_v51  ;;  %v9407_v10 = vld [vmem:[#allocation200_spill] sm:$0xff]  ;;  %v9411_v7 = vld [vmem:[#allocation17_spill] sm:$0xff]  ;;  %v9415_v1 = vld [vmem:[#allocation102_spill] sm:$0xff] }
 0x5d7   : > { %v3733_v15 = vpop.permute.xlu0 %3732  ;;  %v3295_v28 = vadd.f32 %v9405_v43, %v3087_v9  ;;  %v3687_v6 = vadd.f32 %v7721_v12, %v3554_v56  ;;  %v9409_v33 = vld [vmem:[#allocation168_spill] sm:$0xff]  ;;  %v2835_v4 = vadd.f32 %v9415_v1, %v7756_v57  ;;  %v9418_v61 = vld [vmem:[#allocation49_spill] sm:$0xff] }
 0x5d8   : > { %v7967_v19 = vadd.f32 %v3733_v15, %v3686_v40  ;;  %v3731_v11 = vpop.permute.xlu1 %3730  ;;  %v3294_v0 = vadd.f32 %v9407_v10, %v3086_v55  ;;  %v9408_v40 = vld [vmem:[#allocation100_spill] sm:$0xff]  ;;  %v3089_v20 = vadd.f32 %v9409_v33, %v2833_v60  ;;  %v3690_v26 = vadd.f32 %v7727_v34, %v3557_v47 }
 0x5d9   : > { %3987 = vrot.lane.b32.xlu0 %v9399_v41, %s4688_s10  ;;  %v7978_v3 = vadd.f32 %v3731_v11, %v3685_v42  ;;  %v2832_v14 = vadd.f32 %v7756_v57, %v9408_v40  ;;  %v3425_v46 = vadd.f32 %v9411_v7, %v3295_v28  ;;  %v9412_v15 = vld [vmem:[#allocation184_spill] sm:$0xff]  ;;  %v9414_v42 = vld [vmem:[#allocation165_spill] sm:$0xff]  ;;  %v9417_v11 = vld [vmem:[#allocation166_spill] sm:$0xff] }
 0x5da   : > { %3985 = vrot.lane.b32.xlu1 %v9404_v17, %s4688_s10  ;;  %v3556_v50 = vadd.f32 %v9412_v15, %v3422_v16  ;;  %v3424_v30 = vadd.f32 %v9413_v8, %v3294_v0  ;;  %v3297_v41 = vadd.f32 %v9417_v11, %v3089_v20  ;;  %v9419_v56 = vld [vmem:[#allocation28_spill] sm:$0xff]  ;;  %v9424_v28 = vld [vmem:[#allocation34_spill] sm:$0xff]  ;;  %v9426_v0 = vld [vmem:[#allocation171_spill] sm:$0xff] }
 0x5db   : > { %v3737_v38 = vpop.permute.xlu0 %3736  ;;  %v3088_v48 = vadd.f32 %v9414_v42, %v2832_v14  ;;  %v3559_v9 = vadd.f32 %v9418_v61, %v3425_v46  ;;  %v9420_v29 = vld [vmem:[#allocation104_spill] sm:$0xff]  ;;  %v9428_v20 = vld [vmem:[#allocation85_spill] sm:$0xff] }
 0x5dc   : > { %v7989_v22 = vadd.f32 %v3737_v38, %v3688_v53  ;;  %v3735_v63 = vpop.permute.xlu1 %3734  ;;  %v3689_v39 = vadd.f32 %v7729_v58, %v3556_v50  ;;  %v2834_v16 = vadd.f32 %v9420_v29, %v7756_v57  ;;  %v9421_v24 = vld [vmem:[#allocation24_spill] sm:$0xff]  ;;  %v3558_v2 = vadd.f32 %v9424_v28, %v3424_v30  ;;  %v9432_v30 = vld [vmem:[#allocation107_spill] sm:$0xff]  ;;  %v9439_v29 = vld [vmem:[#allocation174_spill] sm:$0xff] }
 0x5dd   : > { %3991 = vrot.lane.b32.xlu0 %v9410_v23, %s4688_s10  ;;  %v8000_v12 = vadd.f32 %v3735_v63, %v3687_v6  ;;  %v3296_v53 = vadd.f32 %v9419_v56, %v3088_v48  ;;  %v3091_v55 = vadd.f32 %v9421_v24, %v2835_v4  ;;  %v9422_v17 = vld [vmem:[#allocation92_spill] sm:$0xff]  ;;  %v3692_v47 = vadd.f32 %v7735_v37, %v3559_v9  ;;  %v9425_v6 = vld [vmem:[#allocation169_spill] sm:$0xff]  ;;  %v9429_v23 = vld [vmem:[#allocation178_spill] sm:$0xff] }
 0x5de   : > { %3989 = vrot.lane.b32.xlu1 %v9416_v59, %s4688_s10  ;;  %v9423_v38 = vld [vmem:[#allocation52_spill] sm:$0xff]  ;;  %v3090_v10 = vadd.f32 %v9425_v6, %v2834_v16  ;;  %v3691_v50 = vadd.f32 %v7737_v27, %v3558_v2  ;;  %v2836_v42 = vadd.f32 %v7756_v57, %v9432_v30  ;;  %v9434_v59 = vld [vmem:[#allocation97_spill] sm:$0xff]  ;;  %v9437_v9 = vld [vmem:[#allocation55_spill] sm:$0xff] }
 0x5df   : > { %v3741_v51 = vpop.permute.xlu0 %3740  ;;  %v3427_v43 = vadd.f32 %v9423_v38, %v3297_v41  ;;  %v3299_v40 = vadd.f32 %v9426_v0, %v3091_v55  ;;  %v9427_v14 = vld [vmem:[#allocation112_spill] sm:$0xff]  ;;  %v3426_v7 = vadd.f32 %v9429_v23, %v3296_v53  ;;  %v9436_v41 = vld [vmem:[#allocation25_spill] sm:$0xff]  ;;  %v9440_v24 = vld [vmem:[#allocation110_spill] sm:$0xff] }
 0x5e0   : > { %v8011_v34 = vadd.f32 %v3741_v51, %v3690_v26  ;;  %v3739_v60 = vpop.permute.xlu1 %3738  ;;  %v2837_v33 = vadd.f32 %v7756_v57, %v9427_v14  ;;  %v9430_v46 = vld [vmem:[#allocation180_spill] sm:$0xff]  ;;  %v9431_v26 = vld [vmem:[#allocation170_spill] sm:$0xff]  ;;  %v9435_v51 = vld [vmem:[#allocation27_spill] sm:$0xff]  ;;  %v2839_v55 = vadd.f32 %v9440_v24, %v7756_v57 }
 0x5e1   : > { %3995 = vrot.lane.b32.xlu0 %v9422_v17, %s4688_s10  ;;  %v8022_v58 = vadd.f32 %v3739_v60, %v3689_v39  ;;  %v3561_v15 = vadd.f32 %v9430_v46, %v3427_v43  ;;  %v3298_v8 = vadd.f32 %v9431_v26, %v3090_v10  ;;  %v9433_v48 = vld [vmem:[#allocation172_spill] sm:$0xff]  ;;  %v3429_v11 = vadd.f32 %v9435_v51, %v3299_v40  ;;  %v9441_v60 = vld [vmem:[#allocation98_spill] sm:$0xff]  ;;  %v9449_v46 = vld [vmem:[#allocation11_spill] sm:$0xff] }
 0x5e2   : > { %3993 = vrot.lane.b32.xlu1 %v9428_v20, %s4688_s10  ;;  %v3093_v1 = vadd.f32 %v9433_v48, %v2837_v33  ;;  %v3560_v61 = vadd.f32 %v9436_v41, %v3426_v7  ;;  %v9438_v56 = vld [vmem:[#allocation204_spill] sm:$0xff]  ;;  %v9443_v28 = vld [vmem:[#allocation186_spill] sm:$0xff]  ;;  %v9447_v20 = vld [vmem:[#allocation173_spill] sm:$0xff] }
 0x5e3   : > { %v3745_v63 = vpop.permute.xlu0 %3744  ;;  %v3694_v39 = vadd.f32 %v9437_v9, %v3561_v15  ;;  %v3092_v53 = vadd.f32 %v9438_v56, %v2836_v42  ;;  %v9442_v38 = vld [vmem:[#allocation40_spill] sm:$0xff]  ;;  %v3563_v2 = vadd.f32 %v9443_v28, %v3429_v11  ;;  %v9445_v0 = vld [vmem:[#allocation26_spill] sm:$0xff]  ;;  %v9448_v7 = vld [vmem:[#allocation105_spill] sm:$0xff] }
 0x5e4   : > { %v8033_v37 = vadd.f32 %v3745_v63, %v3692_v47  ;;  %v3743_v4 = vpop.permute.xlu1 %3742  ;;  %v3301_v16 = vadd.f32 %v9439_v29, %v3093_v1  ;;  %v3428_v43 = vadd.f32 %v9442_v38, %v3298_v8  ;;  %v9444_v47 = vld [vmem:[#allocation192_spill] sm:$0xff]  ;;  %v3095_v63 = vadd.f32 %v9447_v20, %v2839_v55  ;;  %v9451_v8 = vld [vmem:[#allocation189_spill] sm:$0xff]  ;;  %v9455_v41 = vld [vmem:[#allocation99_spill] sm:$0xff] }
 0x5e5   : > { %3999 = vrot.lane.b32.xlu0 %v9434_v59, %s4688_s10  ;;  %v8044_v27 = vadd.f32 %v3743_v4, %v3691_v50  ;;  %v3693_v6 = vadd.f32 %v9444_v47, %v3560_v61  ;;  %v3300_v40 = vadd.f32 %v9445_v0, %v3092_v53  ;;  %v9446_v14 = vld [vmem:[#allocation108_spill] sm:$0xff]  ;;  %v9450_v50 = vld [vmem:[#allocation46_spill] sm:$0xff]  ;;  %v3696_v30 = vadd.f32 %v9451_v8, %v3563_v2  ;;  %v9452_v48 = vld [vmem:[#allocation205_spill] sm:$0xff] }
 0x5e6   : > { %3997 = vrot.lane.b32.xlu1 %v9441_v60, %s4688_s10  ;;  %v2838_v33 = vadd.f32 %v9446_v14, %v7756_v57  ;;  %v3431_v15 = vadd.f32 %v9449_v46, %v3301_v16  ;;  %v3562_v26 = vadd.f32 %v9450_v50, %v3428_v43  ;;  %v9453_v4 = vld [vmem:[#allocation33_spill] sm:$0xff]  ;;  %v9459_v55 = vld [vmem:[#allocation175_spill] sm:$0xff]  ;;  %v9461_v43 = vld [vmem:[#allocation30_spill] sm:$0xff] }
 0x5e7   : > { %v3749_v17 = vpop.permute.xlu0 %3748  ;;  %v3303_v59 = vadd.f32 %v9453_v4, %v3095_v63  ;;  %v9454_v51 = vld [vmem:[#allocation117_spill] sm:$0xff]  ;;  %v9462_v47 = vld [vmem:[#allocation103_spill] sm:$0xff]  ;;  %v9469_v8 = vld [vmem:[#allocation32_spill] sm:$0xff] }
 0x5e8   : > { %v8055_v10 = vadd.f32 %v3749_v17, %v3694_v39  ;;  %v3747_v23 = vpop.permute.xlu1 %3746  ;;  %v3094_v1 = vadd.f32 %v9452_v48, %v2838_v33  ;;  %v2841_v11 = vadd.f32 %v7756_v57, %v9454_v51  ;;  %v9456_v9 = vld [vmem:[#allocation21_spill] sm:$0xff]  ;;  %v9460_v17 = vld [vmem:[#allocation115_spill] sm:$0xff]  ;;  %v9471_v4 = vld [vmem:[#allocation190_spill] sm:$0xff] }
 0x5e9   : > { %4003 = vrot.lane.b32.xlu0 %v9448_v7, %s4688_s10  ;;  %v8066_v42 = vadd.f32 %v3747_v23, %v3693_v6  ;;  %v3430_v39 = vadd.f32 %v9456_v9, %v3300_v40  ;;  %v9457_v56 = vld [vmem:[#allocation181_spill] sm:$0xff]  ;;  %v2840_v38 = vadd.f32 %v7756_v57, %v9460_v17  ;;  %v9463_v6 = vld [vmem:[#allocation35_spill] sm:$0xff] }
 0x5ea   : > { %4001 = vrot.lane.b32.xlu1 %v9455_v41, %s4688_s10  ;;  %v3565_v53 = vadd.f32 %v9457_v56, %v3431_v15  ;;  %v9458_v29 = vld [vmem:[#allocation193_spill] sm:$0xff]  ;;  %v3302_v60 = vadd.f32 %v9459_v55, %v3094_v1  ;;  %v3097_v28 = vadd.f32 %v9461_v43, %v2841_v11  ;;  %v3433_v0 = vadd.f32 %v9463_v6, %v3303_v59  ;;  %v9465_v33 = vld [vmem:[#allocation51_spill] sm:$0xff]  ;;  %v9480_v6 = vld [vmem:[#allocation4_spill] sm:$0xff] }
 0x5eb   : > { %v3753_v61 = vpop.permute.xlu0 %3752  ;;  %v3695_v16 = vadd.f32 %v9458_v29, %v3562_v26  ;;  %v9464_v40 = vld [vmem:[#allocation185_spill] sm:$0xff]  ;;  %v9470_v48 = vld [vmem:[#allocation191_spill] sm:$0xff] }
 0x5ec   : > { %v8077_v24 = vadd.f32 %v3753_v61, %v3696_v30  ;;  %v3751_v2 = vpop.permute.xlu1 %3750  ;;  %v3564_v14 = vadd.f32 %v9464_v40, %v3430_v39  ;;  %v3698_v20 = vadd.f32 %v9465_v33, %v3565_v53  ;;  %v9466_v23 = vld [vmem:[#allocation13_spill] sm:$0xff]  ;;  %v3432_v30 = vadd.f32 %v9469_v8, %v3302_v60  ;;  %v9473_v61 = vld [vmem:[#allocation118_spill] sm:$0xff]  ;;  %v9474_v56 = vld [vmem:[#allocation111_spill] sm:$0xff] }
 0x5ed   : > { %4007 = vrot.lane.b32.xlu0 %v9462_v47, %s4688_s10  ;;  %v8088_v63 = vadd.f32 %v3751_v2, %v3695_v16  ;;  %v3096_v7 = vadd.f32 %v9466_v23, %v2840_v38  ;;  %v9467_v46 = vld [vmem:[#allocation9_spill] sm:$0xff]  ;;  %v3567_v1 = vadd.f32 %v9470_v48, %v3433_v0  ;;  %v2842_v9 = vadd.f32 %v9473_v61, %v7756_v57  ;;  %v9475_v53 = vld [vmem:[#allocation39_spill] sm:$0xff]  ;;  %v9476_v16 = vld [vmem:[#allocation188_spill] sm:$0xff] }
 0x5ee   : > { %v3305_v15 = vadd.f32 %v9467_v46, %v3097_v28  ;;  %v9468_v50 = vld [vmem:[#allocation101_spill] sm:$0xff]  ;;  %v3697_v59 = vadd.f32 %v9471_v4, %v3564_v14  ;;  %v3566_v55 = vadd.f32 %v9476_v16, %v3432_v30  ;;  %v9477_v60 = vld [vmem:[#allocation56_spill] sm:$0xff]  ;;  %v9478_v43 = vld [vmem:[#allocation3_spill] sm:$0xff] }
 0x5ef   : > { %4005 = vrot.lane.b32.xlu1 %v9468_v50, %s4688_s10  ;;  %v3757_v26 = vpop.permute.xlu0 %3756  ;;  %v9472_v11 = vld [vmem:[#allocation177_spill] sm:$0xff]  ;;  %v3700_v17 = vadd.f32 %v9477_v60, %v3567_v1  ;;  %v3098_v28 = vadd.f32 %v9478_v43, %v2842_v9  ;;  %v9479_v2 = vld [vmem:[#allocation106_spill] sm:$0xff]  ;;  %v9491_v9 = vld [vmem:[#allocation119_spill] sm:$0xff] }
 0x5f0   : > { %v8097_v51 = vadd.f32 %v3757_v26, %v3698_v20  ;;  %v3304_v41 = vadd.f32 %v9472_v11, %v3096_v7  ;;  %v3755_v39 = vpop.permute.xlu1 %3754  ;;  %v3435_v29 = vadd.f32 %v9475_v53, %v3305_v15  ;;  %v9481_v0 = vld [vmem:[#allocation37_spill] sm:$0xff]  ;;  %v3699_v14 = vadd.f32 %v7780_v54, %v3566_v55  ;;  %v9483_v7 = vld [vmem:[#allocation179_spill] sm:$0xff]  ;;  %v9485_v26 = vld [vmem:[#allocation194_spill] sm:$0xff] }
 0x5f1   : > { %4011 = vrot.lane.b32.xlu0 %v9474_v56, %s4688_s10  ;;  %v8107_v38 = vadd.f32 %v3755_v39, %v3697_v59  ;;  %v9482_v23 = vld [vmem:[#allocation113_spill] sm:$0xff]  ;;  %v3306_v46 = vadd.f32 %v9483_v7, %v3098_v28  ;;  %v9484_v15 = vld [vmem:[#allocation183_spill] sm:$0xff]  ;;  %v9488_v4 = vld [vmem:[#allocation50_spill] sm:$0xff] }
 0x5f2   : > { %v3434_v57 = vadd.f32 %v9480_v6, %v3304_v41  ;;  %v3569_v40 = vadd.f32 %v9481_v0, %v3435_v29  ;;  %v9487_v48 = vld [vmem:[#allocation109_spill] sm:$0xff]  ;;  %v9489_v59 = vld [vmem:[#allocation70_spill] sm:$0xff]  ;;  %v9492_v39 = vld [vmem:[#allocation187_spill] sm:$0xff] }
 0x5f3   : > { %4009 = vrot.lane.b32.xlu1 %v9479_v2, %s4688_s10  ;;  %v3761_v47 = vpop.permute.xlu0 %3760  ;;  %v3436_v54 = vadd.f32 %v9488_v4, %v3306_v46  ;;  %v9494_v29 = vld [vmem:[#allocation114_spill] sm:$0xff]  ;;  %v9496_v43 = vld [vmem:[#allocation120_spill] sm:$0xff] }
 0x5f4   : > { %v8115_v33 = vadd.f32 %v3761_v47, %v3700_v17  ;;  %v3759_v20 = vpop.permute.xlu1 %3758  ;;  %v3568_v50 = vadd.f32 %v9484_v15, %v3434_v57  ;;  %v3702_v8 = vadd.f32 %v9485_v26, %v3569_v40  ;;  %v9498_v2 = vld [vmem:[#allocation116_spill] sm:$0xff]  ;;  %v9499_v57 = vld [vmem:[#allocation122_spill] sm:$0xff]  ;;  %v9506_v26 = vld [vmem:[#allocation53_spill] sm:$0xff] }
 0x5f5   : > { %4015 = vrot.lane.b32.xlu0 %v9482_v23, %s4688_s10  ;;  %v8122_v30 = vadd.f32 %v3759_v20, %v3699_v14  ;;  %v3570_v56 = vadd.f32 %v9492_v39, %v3436_v54  ;;  %v9502_v14 = vld [vmem:[#allocation131_spill] sm:$0xff]  ;;  %v9503_v20 = vld [vmem:[#allocation126_spill] sm:$0xff]  ;;  %v9504_v46 = vld [vmem:[#allocation140_spill] sm:$0xff] }
 0x5f6   : > { %v3701_v11 = vadd.f32 %v9489_v59, %v3568_v50  ;;  %v9505_v15 = vld [vmem:[#allocation132_spill] sm:$0xff] }
 0x5f7   : > { %9486 = vst [vmem:[#allocation74_spill] sm:$0xff] %v8122_v30  ;;  %4013 = vrot.lane.b32.xlu1 %v9487_v48, %s4688_s10  ;;  %v3765_v1 = vpop.permute.xlu0 %3764  ;;  %v3703_v55 = vadd.f32 %v7818_v44, %v3570_v56  ;;  %v4107_v30 = vld [vmem:[%s4778_s25 + $0x20] sm:$0xff] }
 0x5f8   : > { %v8128_v41 = vadd.f32 %v3765_v1, %v3702_v8  ;;  %v3763_v61 = vpop.permute.xlu1 %3762 }
 0x5f9   : > { %4019 = vrot.lane.b32.xlu0 %v9491_v9, %s4688_s10  ;;  %v8133_v53 = vadd.f32 %v3763_v61, %v3701_v11 }
 0x5fa   : > { %9490 = vst [vmem:[#allocation88_spill] sm:$0xff] %v8128_v41 }
 0x5fb   : > { %9493 = vst [vmem:[#allocation86_spill] sm:$0xff] %v8133_v53  ;;  %4017 = vrot.lane.b32.xlu1 %v9494_v29, %s4688_s10  ;;  %v3769_v16 = vpop.permute.xlu0 %3768 }
 0x5fc   : > { %v8139_v60 = vadd.f32 %v3769_v16, %v7813_v52  ;;  %v3767_v17 = vpop.permute.xlu1 %3766  ;;  %v9501_v52 = vld [vmem:[#allocation124_spill] sm:$0xff] }
 0x5fd   : > { %4023 = vrot.lane.b32.xlu0 %v9496_v43, %s4688_s10  ;;  %v8143_v28 = vadd.f32 %v3767_v17, %v3703_v55 }
 0x5fe   : > { %9495 = vst [vmem:[#allocation94_spill] sm:$0xff] %v8139_v60 }
 0x5ff   : > { %9497 = vst [vmem:[#allocation95_spill] sm:$0xff] %v8143_v28  ;;  %4021 = vrot.lane.b32.xlu1 %v9498_v2, %s4688_s10  ;;  %v3843_v47 = vpop.permute.xlu0 %3842 }
 0x600   : > { %v3771_v6 = vpop.permute.xlu1 %3770 }
 0x601   : > { %4027 = vrot.lane.b32.xlu0 %v9499_v57, %s4688_s10  ;;  %v8150_v0 = vadd.f32 %v3771_v6, %v7846_v13 }
 0x603   : > { %9500 = vst [vmem:[#allocation64_spill] sm:$0xff] %v8150_v0  ;;  %4025 = vrot.lane.b32.xlu1 %v9501_v52, %s4688_s10  ;;  %v3847_v44 = vpop.permute.xlu0 %3846  ;;  %v4103_v0 = vld [vmem:[%s4778_s25] sm:$0xff] }
 0x604   : > { %v3845_v40 = vpop.permute.xlu1 %3844 }
 0x605   : > { %4031 = vrot.lane.b32.xlu0 %v9502_v14, %s4688_s10 }
 0x607   : > { %4029 = vrot.lane.b32.xlu1 %v9503_v20, %s4688_s10  ;;  %v3851_v23 = vpop.permute.xlu0 %3850 }
 0x608   : > { %v3849_v7 = vpop.permute.xlu1 %3848  ;;  %v3942_v41 = vadd.f32 %v3851_v23, %v7879_v31 }
 0x609   : > { %4035 = vrot.lane.b32.xlu0 %v9504_v46, %s4688_s10 }
 0x60b   : > { %4033 = vrot.lane.b32.xlu1 %v9505_v15, %s4688_s10  ;;  %v3855_v13 = vpop.permute.xlu0 %3854 }
 0x60c   : > { %v3853_v50 = vpop.permute.xlu1 %3852 }
 0x60f   : > { %4037 = vrot.lane.b32.xlu1 %v9506_v26, %s4688_s10  ;;  %v3859_v8 = vpop.permute.xlu0 %3858  ;;  %v3938_v26 = vadd.f32 %v3843_v47, %v7835_v35  ;;  %v3939_v47 = vadd.f32 %v3845_v40, %v7868_v36 }
 0x610   : > { %v8164_v48 = vpop.permute.xlu1 %3856 }
 0x613   : > { %v8166_v1 = vpop.permute.xlu0 %3862 }
 0x614   : > { %v8168_v4 = vpop.permute.xlu1 %3860 }
 0x617   : > { %v8170_v54 = vpop.permute.xlu0 %3866 }
 0x618   : > { %v8172_v59 = vpop.permute.xlu1 %3864 }
 0x61b   : > { %v8174_v11 = vpop.permute.xlu0 %3870 }
 0x61c   : > { %v8176_v61 = vpop.permute.xlu1 %3868 }
 0x61f   : > { %v8178_v9 = vpop.permute.xlu0 %3874 }
 0x620   : > { %v8180_v39 = vpop.permute.xlu1 %3872 }
 0x623   : > { %v8182_v56 = vpop.permute.xlu0 %3878 }
 0x624   : > { %v8184_v29 = vpop.permute.xlu1 %3876 }
 0x627   : > { %v8186_v16 = vpop.permute.xlu0 %3882 }
 0x628   : > { %v8188_v55 = vpop.permute.xlu1 %3880 }
 0x62b   : > { %v8190_v17 = vpop.permute.xlu0 %3886 }
 0x62c   : > { %v8192_v43 = vpop.permute.xlu1 %3884 }
 0x62f   : > { %v8194_v2 = vpop.permute.xlu0 %3890 }
 0x630   : > { %v8196_v6 = vpop.permute.xlu1 %3888 }
 0x633   : > { %v8198_v57 = vpop.permute.xlu0 %3894 }
 0x634   : > { %v8200_v52 = vpop.permute.xlu1 %3892 }
 0x635   : > { %9507 = vst [vmem:[#allocation58_spill] sm:$0xff] %v8200_v52 }
 0x637   : > { %v8202_v14 = vpop.permute.xlu0 %3898 }
 0x638   : > { %9508 = vst [vmem:[#allocation59_spill] sm:$0xff] %v8202_v14  ;;  %v8204_v20 = vpop.permute.xlu1 %3896 }
 0x639   : > { %9509 = vst [vmem:[#allocation67_spill] sm:$0xff] %v8204_v20 }
 0x63b   : > { %v8206_v46 = vpop.permute.xlu0 %3902 }
 0x63c   : > { %9510 = vst [vmem:[#allocation61_spill] sm:$0xff] %v8206_v46  ;;  %v8208_v15 = vpop.permute.xlu1 %3900  ;;  %v3940_v46 = vadd.f32 %v3847_v44, %v7857_v21  ;;  %v4106_v44 = vld [vmem:[%s4778_s25 + $0x18] sm:$0xff] }
 0x63d   : > { %9511 = vst [vmem:[#allocation68_spill] sm:$0xff] %v8208_v15  ;;  %v4105_v15 = vld [vmem:[%s4778_s25 + $0x10] sm:$0xff] }
 0x63f   : > { %v3976_v28 = vpop.permute.xlu0 %3975 }
 0x640   : > { %v4071_v60 = vadd.f32 %v3976_v28, %v3938_v26  ;;  %v8219_v53 = vpop.permute.xlu1 %3904  ;;  %v4104_v26 = vld [vmem:[%s4778_s25 + $0x8] sm:$0xff] }
 0x641   : > { %9512 = vst [vmem:[#allocation66_spill] sm:$0xff] %v8219_v53 }
 0x642   : > { %v4135_v20 = vadd.f32 %v4103_v0, %v4071_v60  ;;  %v3941_v60 = vadd.f32 %v3849_v7, %v7890_v32  ;;  %v3943_v32 = vadd.f32 %v3853_v50, %v7912_v62  ;;  %v4108_v7 = vld [vmem:[%s4778_s25 + $0x28] sm:$0xff]  ;;  %v3945_v62 = vadd.f32 %v8164_v48, %v7934_v49 }
 0x643   : > { %v3980_v35 = vpop.permute.xlu0 %3979  ;;  %v3947_v49 = vadd.f32 %v8168_v4, %v7956_v5  ;;  %v3949_v5 = vadd.f32 %v8172_v59, %v7978_v3  ;;  %v3951_v3 = vadd.f32 %v8176_v61, %v8000_v12  ;;  %v3953_v12 = vadd.f32 %v8180_v39, %v8022_v58 }
 0x644   : > { %4167 = vst.msk [vmem:[%s8217_s17] sm:$0xff] %vm225_vm1, %v4135_v20  ;;  %v4073_v28 = vadd.f32 %v3980_v35, %v3940_v46  ;;  %v3978_v14 = vpop.permute.xlu1 %3977  ;;  %v3944_v20 = vadd.f32 %v3855_v13, %v7901_v25  ;;  %v3946_v25 = vadd.f32 %v3859_v8, %v7923_v18  ;;  %v3948_v18 = vadd.f32 %v8166_v1, %v7945_v45 }
 0x645   : > { %v4072_v53 = vadd.f32 %v3978_v14, %v3939_v47  ;;  %v4109_v14 = vld [vmem:[%s4778_s25 + $0x30] sm:$0xff]  ;;  %v3950_v45 = vadd.f32 %v8170_v54, %v7967_v19  ;;  %v3952_v19 = vadd.f32 %v8174_v11, %v7989_v22  ;;  %v3954_v22 = vadd.f32 %v8178_v9, %v8011_v34 }
 0x646   : > { %v4137_v52 = vadd.f32 %v4105_v15, %v4073_v28  ;;  %v4111_v15 = vld [vmem:[%s4778_s25 + $0x40] sm:$0xff]  ;;  %v4110_v28 = vld [vmem:[%s4778_s25 + $0x38] sm:$0xff]  ;;  %v3956_v34 = vadd.f32 %v8182_v56, %v8033_v37  ;;  %v3955_v58 = vadd.f32 %v8184_v29, %v8044_v27  ;;  %v3958_v37 = vadd.f32 %v8186_v16, %v8055_v10 }
 0x647   : > { %v3984_v21 = vpop.permute.xlu0 %3983  ;;  %v4136_v36 = vadd.f32 %v4104_v26, %v4072_v53  ;;  %v3957_v27 = vadd.f32 %v8188_v55, %v8066_v42  ;;  %v3960_v10 = vadd.f32 %v8190_v17, %v8077_v24  ;;  %v3959_v42 = vadd.f32 %v8192_v43, %v8088_v63 }
 0x648   : > { %4169 = vst.msk [vmem:[%s8217_s17 + $0x10] sm:$0xff] %vm225_vm1, %v4137_v52  ;;  %v4075_v0 = vadd.f32 %v3984_v21, %v3942_v41  ;;  %v3982_v40 = vpop.permute.xlu1 %3981  ;;  %v3962_v24 = vadd.f32 %v8194_v2, %v8097_v51  ;;  %v3961_v63 = vadd.f32 %v8196_v6, %v8107_v38  ;;  %v3964_v51 = vadd.f32 %v8198_v57, %v8115_v33  ;;  %v9513_v38 = vld [vmem:[#allocation74_spill] sm:$0xff]  ;;  %v9515_v33 = vld [vmem:[#allocation88_spill] sm:$0xff]  ;;  %v9516_v57 = vld [vmem:[#allocation59_spill] sm:$0xff] }
 0x649   : > { %4168 = vst.msk [vmem:[%s8217_s17 + $0x8] sm:$0xff] %vm225_vm1, %v4136_v36  ;;  %v4074_v23 = vadd.f32 %v3982_v40, %v3941_v60  ;;  %v4113_v60 = vld [vmem:[%s4778_s25 + $0x50] sm:$0xff]  ;;  %v9514_v6 = vld [vmem:[#allocation58_spill] sm:$0xff] }
 0x64a   : > { %v4139_v31 = vadd.f32 %v4107_v30, %v4075_v0 }
 0x64b   : > { %v3988_v46 = vpop.permute.xlu0 %3987  ;;  %v4138_v53 = vadd.f32 %v4106_v44, %v4074_v23  ;;  %v4112_v44 = vld [vmem:[%s4778_s25 + $0x48] sm:$0xff] }
 0x64c   : > { %4171 = vst.msk [vmem:[%s8217_s17 + $0x20] sm:$0xff] %vm225_vm1, %v4139_v31  ;;  %v4077_v41 = vadd.f32 %v3988_v46, %v3944_v20  ;;  %v3986_v52 = vpop.permute.xlu1 %3985  ;;  %v4115_v31 = vld [vmem:[%s4778_s25 + $0x60] sm:$0xff]  ;;  %v4114_v46 = vld [vmem:[%s4778_s25 + $0x58] sm:$0xff] }
 0x64d   : > { %4170 = vst.msk [vmem:[%s8217_s17 + $0x18] sm:$0xff] %vm225_vm1, %v4138_v53  ;;  %v4076_v13 = vadd.f32 %v3986_v52, %v3943_v32 }
 0x64e   : > { %v4141_v30 = vadd.f32 %v4109_v14, %v4077_v41  ;;  %v4117_v41 = vld [vmem:[%s4778_s25 + $0x70] sm:$0xff] }
 0x64f   : > { %v3992_v35 = vpop.permute.xlu0 %3991  ;;  %v4140_v50 = vadd.f32 %v4108_v7, %v4076_v13 }
 0x650   : > { %4173 = vst.msk [vmem:[%s8217_s17 + $0x30] sm:$0xff] %vm225_vm1, %v4141_v30  ;;  %v4079_v47 = vadd.f32 %v3992_v35, %v3946_v25  ;;  %v3990_v26 = vpop.permute.xlu1 %3989  ;;  %v4116_v25 = vld [vmem:[%s4778_s25 + $0x68] sm:$0xff] }
 0x651   : > { %4172 = vst.msk [vmem:[%s8217_s17 + $0x28] sm:$0xff] %vm225_vm1, %v4140_v50  ;;  %v4078_v21 = vadd.f32 %v3990_v26, %v3945_v62  ;;  %v4118_v50 = vld [vmem:[%s4778_s25 + $0x78] sm:$0xff]  ;;  %v4121_v26 = vld [vmem:[%s4778_s25 + $0x90] sm:$0xff] }
 0x652   : > { %v4143_v8 = vadd.f32 %v4111_v15, %v4079_v47  ;;  %v4119_v15 = vld [vmem:[%s4778_s25 + $0x80] sm:$0xff] }
 0x653   : > { %v3996_v36 = vpop.permute.xlu0 %3995  ;;  %v4142_v48 = vadd.f32 %v4110_v28, %v4078_v21  ;;  %v4120_v21 = vld [vmem:[%s4778_s25 + $0x88] sm:$0xff] }
 0x654   : > { %4175 = vst.msk [vmem:[%s8217_s17 + $0x40] sm:$0xff] %vm225_vm1, %v4143_v8  ;;  %v4081_v0 = vadd.f32 %v3996_v36, %v3948_v18  ;;  %v3994_v40 = vpop.permute.xlu1 %3993 }
 0x655   : > { %4174 = vst.msk [vmem:[%s8217_s17 + $0x38] sm:$0xff] %vm225_vm1, %v4142_v48  ;;  %v4080_v20 = vadd.f32 %v3994_v40, %v3947_v49  ;;  %v4123_v49 = vld [vmem:[%s4778_s25 + $0xa0] sm:$0xff] }
 0x656   : > { %v4145_v1 = vadd.f32 %v4113_v60, %v4081_v0 }
 0x657   : > { %v4000_v23 = vpop.permute.xlu0 %3999  ;;  %v4144_v4 = vadd.f32 %v4112_v44, %v4080_v20  ;;  %v4122_v44 = vld [vmem:[%s4778_s25 + $0x98] sm:$0xff] }
 0x658   : > { %4177 = vst.msk [vmem:[%s8217_s17 + $0x50] sm:$0xff] %vm225_vm1, %v4145_v1  ;;  %v4083_v14 = vadd.f32 %v4000_v23, %v3950_v45  ;;  %v3998_v32 = vpop.permute.xlu1 %3997  ;;  %v4125_v1 = vld [vmem:[%s4778_s25 + $0xb0] sm:$0xff]  ;;  %v4124_v23 = vld [vmem:[%s4778_s25 + $0xa8] sm:$0xff] }
 0x659   : > { %4176 = vst.msk [vmem:[%s8217_s17 + $0x48] sm:$0xff] %vm225_vm1, %v4144_v4  ;;  %v4082_v53 = vadd.f32 %v3998_v32, %v3949_v5 }
 0x65a   : > { %v4147_v54 = vadd.f32 %v4115_v31, %v4083_v14  ;;  %v4127_v14 = vld [vmem:[%s4778_s25 + $0xc0] sm:$0xff] }
 0x65b   : > { %v4004_v7 = vpop.permute.xlu0 %4003  ;;  %v4146_v59 = vadd.f32 %v4114_v46, %v4082_v53 }
 0x65c   : > { %4179 = vst.msk [vmem:[%s8217_s17 + $0x60] sm:$0xff] %vm225_vm1, %v4147_v54  ;;  %v4085_v52 = vadd.f32 %v4004_v7, %v3952_v19  ;;  %v4002_v30 = vpop.permute.xlu1 %4001  ;;  %v4126_v19 = vld [vmem:[%s4778_s25 + $0xb8] sm:$0xff] }
 0x65d   : > { %4178 = vst.msk [vmem:[%s8217_s17 + $0x58] sm:$0xff] %vm225_vm1, %v4146_v59  ;;  %v4084_v13 = vadd.f32 %v4002_v30, %v3951_v3  ;;  %v3963_v3 = vadd.f32 %v9514_v6, %v9513_v38 }
 0x65e   : > { %v4149_v11 = vadd.f32 %v4117_v41, %v4085_v52  ;;  %v4129_v41 = vld [vmem:[%s4778_s25 + $0xd0] sm:$0xff] }
 0x65f   : > { %v4008_v35 = vpop.permute.xlu0 %4007  ;;  %v4148_v61 = vadd.f32 %v4116_v25, %v4084_v13  ;;  %v4128_v25 = vld [vmem:[%s4778_s25 + $0xc8] sm:$0xff] }
 0x660   : > { %4181 = vst.msk [vmem:[%s8217_s17 + $0x70] sm:$0xff] %vm225_vm1, %v4149_v11  ;;  %v4087_v62 = vadd.f32 %v4008_v35, %v3954_v22  ;;  %v3966_v22 = vadd.f32 %v9516_v57, %v9515_v33 }
 0x661   : > { %v4006_v47 = vpop.permute.xlu1 %4005  ;;  %4180 = vst.msk [vmem:[%s8217_s17 + $0x68] sm:$0xff] %vm225_vm1, %v4148_v61  ;;  %v9518_v61 = vld [vmem:[#allocation67_spill] sm:$0xff] }
 0x662   : > { %v4151_v9 = vadd.f32 %v4119_v15, %v4087_v62  ;;  %v4086_v28 = vadd.f32 %v4006_v47, %v3953_v12  ;;  %v4131_v15 = vld [vmem:[%s4778_s25 + $0xe0] sm:$0xff]  ;;  %v9517_v12 = vld [vmem:[#allocation86_spill] sm:$0xff] }
 0x663   : > { %v4012_v18 = vpop.permute.xlu0 %4011  ;;  %v3965_v62 = vadd.f32 %v9518_v61, %v9517_v12 }
 0x664   : > { %4183 = vst.msk [vmem:[%s8217_s17 + $0x80] sm:$0xff] %vm225_vm1, %v4151_v9  ;;  %v4150_v39 = vadd.f32 %v4118_v50, %v4086_v28  ;;  %v4089_v8 = vadd.f32 %v4012_v18, %v3956_v34  ;;  %v4130_v34 = vld [vmem:[%s4778_s25 + $0xd8] sm:$0xff]  ;;  %v9519_v28 = vld [vmem:[#allocation94_spill] sm:$0xff] }
 0x665   : > { %v4010_v60 = vpop.permute.xlu1 %4009 }
 0x666   : > { %4182 = vst.msk [vmem:[%s8217_s17 + $0x78] sm:$0xff] %vm225_vm1, %v4150_v39  ;;  %v4153_v56 = vadd.f32 %v4121_v26, %v4089_v8  ;;  %v4088_v36 = vadd.f32 %v4010_v60, %v3955_v58  ;;  %v9520_v26 = vld [vmem:[#allocation61_spill] sm:$0xff]  ;;  %v4133_v8 = vld [vmem:[%s4778_s25 + $0xf0] sm:$0xff] }
 0x667   : > { %v4016_v48 = vpop.permute.xlu0 %4015  ;;  %v3968_v18 = vadd.f32 %v9520_v26, %v9519_v28  ;;  %v9521_v60 = vld [vmem:[#allocation95_spill] sm:$0xff] }
 0x668   : > { %4185 = vst.msk [vmem:[%s8217_s17 + $0x90] sm:$0xff] %vm225_vm1, %v4153_v56  ;;  %v4152_v29 = vadd.f32 %v4120_v21, %v4088_v36  ;;  %v4091_v0 = vadd.f32 %v4016_v48, %v3958_v37  ;;  %v9522_v37 = vld [vmem:[#allocation68_spill] sm:$0xff]  ;;  %v4132_v48 = vld [vmem:[%s4778_s25 + $0xe8] sm:$0xff] }
 0x669   : > { %v4014_v40 = vpop.permute.xlu1 %4013  ;;  %v3967_v56 = vadd.f32 %v9522_v37, %v9521_v60 }
 0x66a   : > { %4184 = vst.msk [vmem:[%s8217_s17 + $0x88] sm:$0xff] %vm225_vm1, %v4152_v29  ;;  %v4155_v16 = vadd.f32 %v4123_v49, %v4091_v0  ;;  %v4090_v45 = vadd.f32 %v4014_v40, %v3957_v27  ;;  %v9524_v40 = vld [vmem:[#allocation66_spill] sm:$0xff] }
 0x66b   : > { %v4020_v20 = vpop.permute.xlu0 %4019 }
 0x66c   : > { %4187 = vst.msk [vmem:[%s8217_s17 + $0xa0] sm:$0xff] %vm225_vm1, %v4155_v16  ;;  %v4154_v55 = vadd.f32 %v4122_v44, %v4090_v45  ;;  %v4093_v31 = vadd.f32 %v4020_v20, %v3960_v10  ;;  %v9523_v44 = vld [vmem:[#allocation64_spill] sm:$0xff] }
 0x66d   : > { %v4018_v5 = vpop.permute.xlu1 %4017  ;;  %v3969_v10 = vadd.f32 %v9524_v40, %v9523_v44  ;;  %v4134_v45 = vld [vmem:[%s4778_s25 + $0xf8] sm:$0xff] }
 0x66e   : > { %4186 = vst.msk [vmem:[%s8217_s17 + $0x98] sm:$0xff] %vm225_vm1, %v4154_v55  ;;  %v4157_v17 = vadd.f32 %v4125_v1, %v4093_v31  ;;  %v4092_v4 = vadd.f32 %v4018_v5, %v3959_v42 }
 0x66f   : > { %v4024_v46 = vpop.permute.xlu0 %4023 }
 0x670   : > { %4189 = vst.msk [vmem:[%s8217_s17 + $0xb0] sm:$0xff] %vm225_vm1, %v4157_v17  ;;  %v4156_v43 = vadd.f32 %v4124_v23, %v4092_v4  ;;  %v4095_v32 = vadd.f32 %v4024_v46, %v3962_v24 }
 0x671   : > { %v4022_v54 = vpop.permute.xlu1 %4021 }
 0x672   : > { %4188 = vst.msk [vmem:[%s8217_s17 + $0xa8] sm:$0xff] %vm225_vm1, %v4156_v43  ;;  %v4159_v2 = vadd.f32 %v4127_v14, %v4095_v32  ;;  %v4094_v53 = vadd.f32 %v4022_v54, %v3961_v63 }
 0x673   : > { %v4028_v7 = vpop.permute.xlu0 %4027 }
 0x674   : > { %4191 = vst.msk [vmem:[%s8217_s17 + $0xc0] sm:$0xff] %vm225_vm1, %v4159_v2  ;;  %v4158_v59 = vadd.f32 %v4126_v19, %v4094_v53  ;;  %v4097_v52 = vadd.f32 %v4028_v7, %v3964_v51 }
 0x675   : > { %v4026_v30 = vpop.permute.xlu1 %4025 }
 0x676   : > { %4190 = vst.msk [vmem:[%s8217_s17 + $0xb8] sm:$0xff] %vm225_vm1, %v4158_v59  ;;  %v4161_v11 = vadd.f32 %v4129_v41, %v4097_v52  ;;  %v4096_v13 = vadd.f32 %v4026_v30, %v3963_v3 }
 0x677   : > { %v4032_v35 = vpop.permute.xlu0 %4031 }
 0x678   : > { %4193 = vst.msk [vmem:[%s8217_s17 + $0xd0] sm:$0xff] %vm225_vm1, %v4161_v11  ;;  %v4160_v50 = vadd.f32 %v4128_v25, %v4096_v13  ;;  %v4099_v47 = vadd.f32 %v4032_v35, %v3966_v22 }
 0x679   : > { %v4030_v9 = vpop.permute.xlu1 %4029 }
 0x67a   : > { %4192 = vst.msk [vmem:[%s8217_s17 + $0xc8] sm:$0xff] %vm225_vm1, %v4160_v50  ;;  %v4163_v58 = vadd.f32 %v4131_v15, %v4099_v47  ;;  %v4098_v39 = vadd.f32 %v4030_v9, %v3965_v62 }
 0x67b   : > { %v4036_v21 = vpop.permute.xlu0 %4035 }
 0x67c   : > { %4195 = vst.msk [vmem:[%s8217_s17 + $0xe0] sm:$0xff] %vm225_vm1, %v4163_v58  ;;  %v4162_v36 = vadd.f32 %v4130_v34, %v4098_v39  ;;  %v4101_v49 = vadd.f32 %v4036_v21, %v3968_v18 }
 0x67d   : > { %v4034_v27 = vpop.permute.xlu1 %4033 }
 0x67e   : > { %4194 = vst.msk [vmem:[%s8217_s17 + $0xd8] sm:$0xff] %vm225_vm1, %v4162_v36  ;;  %v4165_v29 = vadd.f32 %v4133_v8, %v4101_v49  ;;  %v4100_v0 = vadd.f32 %v4034_v27, %v3967_v56 }
 0x680   : > { %4197 = vst.msk [vmem:[%s8217_s17 + $0xf0] sm:$0xff] %vm225_vm1, %v4165_v29  ;;  %v4164_v16 = vadd.f32 %v4132_v48, %v4100_v0 }
 0x681   : > { %v4038_v1 = vpop.permute.xlu1 %4037 }
 0x682   : > { %4196 = vst.msk [vmem:[%s8217_s17 + $0xe8] sm:$0xff] %vm225_vm1, %v4164_v16  ;;  %v4102_v20 = vadd.f32 %v4038_v1, %v3969_v10 }
 0x684   : > { %v4166_v42 = vadd.f32 %v4134_v45, %v4102_v20 }
 0x686   : > { %4198 = vst.msk [vmem:[%s8217_s17 + $0xf8] sm:$0xff] %vm225_vm1, %v4166_v42 }
 0x687 PF: > { %s15_s18 = sadd.s32 1, %s4678_s18  }
 0x688   : > { %p12_p4 = scmp.ge.s32.totalorder %s15_s18, 4  }
 0x68a   :  { %14 = sbr.rel (!%p12_p4) target bundleno = 1 (0x1), region = 72 }

</bundles_post_ra>
